<compile_context>
chip_gen: v7x
topology: tpu7x:2x2x1
jax: 0.10.0
libtpu: 0.0.40
codegen_flags: <defaults>
</compile_context>

<pallas_src>
import functools

import jax
import jax.numpy as jnp
from jax import lax
from jax.experimental import pallas as pl
from jax.experimental.pallas import tpu as pltpu


def _round_up(v, m):
    return ((v + m - 1) // m) * m


def se3_layer_kernel(
    src_ref, dst_ref, ea_ref, x_ref,
    wn1_ref, bn1_ref, wn2u_ref,
    we1a_ref, we1b_ref, we1c_ref, be1_ref,
    we2u_ref, be2u_ref, bfin_ref,
    out_ref, xwa_ref, xwb_ref,
    *, n_slabs, slab, mm_dtype,
):
    ei = pl.program_id(0)
    n_edge_steps = pl.num_programs(0)
    tE = src_ref.shape[0]
    f32 = jnp.float32

    # ---- first edge step: zero the resident accumulator (= output block) and
    #      build the fused gather tables xwa = x@we1a, xwb = x@we1b once. ----
    @pl.when(ei == 0)
    def _init():
        out_ref[...] = jnp.zeros_like(out_ref)
        we1a = we1a_ref[...].astype(mm_dtype)
        we1b = we1b_ref[...].astype(mm_dtype)
        for s in range(n_slabs):
            base = s * slab
            xs = x_ref[pl.ds(base, slab), :].astype(mm_dtype)
            xwa_ref[pl.ds(base, slab), :] = jnp.dot(
                xs, we1a, preferred_element_type=f32)
            xwb_ref[pl.ds(base, slab), :] = jnp.dot(
                xs, we1b, preferred_element_type=f32)

    src = src_ref[...]          # (tE, 1) int32
    dst = dst_ref[...]          # (tE, 1) int32

    # ---- edge_mlp layer 1, fused with the endpoint gather:
    #      e1 = x[src]@we1a + x[dst]@we1b + eattr@we1c + be1.
    #      One-hots are built in-register per 128-wide node slab so the
    #      temporaries stay bounded regardless of N. ----
    e1 = jnp.dot(ea_ref[...].astype(mm_dtype), we1c_ref[...].astype(mm_dtype),
                 preferred_element_type=f32) + be1_ref[...]
    for s in range(n_slabs):
        base = s * slab
        iota = lax.broadcasted_iota(jnp.int32, (tE, slab), 1) + base
        src_oh = (iota == src).astype(mm_dtype)        # (tE, slab), exact 0/1
        dst_oh = (iota == dst).astype(mm_dtype)
        xa = xwa_ref[pl.ds(base, slab), :].astype(mm_dtype)
        xb = xwb_ref[pl.ds(base, slab), :].astype(mm_dtype)
        e1 = (e1
              + jnp.dot(src_oh, xa, preferred_element_type=f32)
              + jnp.dot(dst_oh, xb, preferred_element_type=f32))

    e1 = jnp.maximum(e1, 0.0)
    # edge_mlp layer 2 with the update Linear's wub folded in (we2u = we2@wub).
    h_eu = jnp.dot(e1.astype(mm_dtype), we2u_ref[...].astype(mm_dtype),
                   preferred_element_type=f32) + be2u_ref[...]
    h_eu_mm = h_eu.astype(mm_dtype)

    # ---- scatter-add into the resident accumulator: contract the edge axis of
    #      the (tE, slab) dst one-hot directly against h_eu, slab by slab. ----
    for s in range(n_slabs):
        base = s * slab
        iota = lax.broadcasted_iota(jnp.int32, (tE, slab), 1) + base
        dst_oh = (iota == dst).astype(mm_dtype)
        part = lax.dot_general(
            dst_oh, h_eu_mm,
            dimension_numbers=(((0,), (0,)), ((), ())),
            preferred_element_type=f32)                # (slab, Cp)
        out_ref[pl.ds(base, slab), :] = out_ref[pl.ds(base, slab), :] + part

    # ---- last edge step: node MLP + (folded) update Linear, slab by slab. ----
    @pl.when(ei == n_edge_steps - 1)
    def _finalize():
        wn1 = wn1_ref[...].astype(mm_dtype)
        wn2u = wn2u_ref[...].astype(mm_dtype)
        for s in range(n_slabs):
            base = s * slab
            xs = x_ref[pl.ds(base, slab), :].astype(mm_dtype)
            h1 = jnp.maximum(
                jnp.dot(xs, wn1, preferred_element_type=f32) + bn1_ref[...],
                0.0)
            nodes_u = jnp.dot(h1.astype(mm_dtype), wn2u,
                              preferred_element_type=f32) + bfin_ref[...]
            out_ref[pl.ds(base, slab), :] = (
                out_ref[pl.ds(base, slab), :] + nodes_u)


def se3_layer(x, edge_index, edge_attr, pos, params, *,
              edge_tile=512, node_slab=512, matmul_dtype=jnp.float32):
    """Pallas wrapper. x:[N,Cin] f32, edge_index:[2,E] i32, edge_attr:[E,De],
    pos:[N,3] (unused by the reference forward)."""
    del pos  # unused in the PyTorch forward pass
    x = x.astype(jnp.float32)
    edge_attr = edge_attr.astype(jnp.float32)

    N, Cin = x.shape
    E = int(edge_index.shape[1])
    De = edge_attr.shape[1]
    C = params["wn2"].shape[1]

    if E == 0:
        # PyTorch early-return path: just the node MLP (trivial, plain JAX).
        h1 = jnp.maximum(x @ params["wn1"] + params["bn1"], 0.0)
        return h1 @ params["wn2"] + params["bn2"]

    # ---- fold the update Linear into upstream weights (exact up to fp
    #      reassociation): out = h1@(wn2@wua) + (bn2@wua + bu)
    #                          + scatter(relu(e1)@(we2@wub) + be2@wub) ----
    wn2u = params["wn2"] @ params["wua"]
    bfin = params["bn2"] @ params["wua"] + params["bu"]
    we2u = params["we2"] @ params["wub"]
    be2u = params["be2"] @ params["wub"]

    # ---- lane-dense channel padding (exact: zero columns, ReLU(0)=0) ----
    Cp = _round_up(max(C, 1), 128)

    def pad_cols(w):
        return jnp.pad(w, ((0, 0), (0, Cp - w.shape[1])))

    def pad_both(w):
        return jnp.pad(w, ((0, Cp - w.shape[0]), (0, Cp - w.shape[1])))

    wn1, bn1 = pad_cols(params["wn1"]), pad_cols(params["bn1"])
    wn2u, bfin = pad_both(wn2u), pad_cols(bfin)
    we1a, we1b = pad_cols(params["we1a"]), pad_cols(params["we1b"])
    we1c, be1 = pad_cols(params["we1c"]), pad_cols(params["be1"])
    we2u, be2u = pad_both(we2u), pad_cols(be2u)

    # ---- node axis: padded to a multiple of the (lane-dense) slab width ----
    slab = _round_up(min(max(node_slab, 128), _round_up(N, 128)), 128)
    N_pad = _round_up(N, slab)
    n_slabs = N_pad // slab
    x_p = jnp.pad(x, ((0, N_pad - N), (0, 0)))

    # ---- edge axis: grid dimension, streamed; padded edges point at node
    #      index N_pad, matching no one-hot column -> contribute nothing. ----
    tE = _round_up(min(edge_tile, _round_up(E, 8)), 8)
    E_pad = _round_up(E, tE)
    pad_e = E_pad - E
    src_p = jnp.pad(edge_index[0].astype(jnp.int32), (0, pad_e),
                    constant_values=N_pad).reshape(E_pad, 1)
    dst_p = jnp.pad(edge_index[1].astype(jnp.int32), (0, pad_e),
                    constant_values=N_pad).reshape(E_pad, 1)
    ea_p = jnp.pad(edge_attr, ((0, pad_e), (0, 0)))
    n_edge_tiles = E_pad // tE

    weights = (wn1, bn1, wn2u, we1a, we1b, we1c, be1, we2u, be2u, bfin)

    edge_map = lambda e: (e, 0)
    const_map = lambda e: (0, 0)
    in_specs = [
        pl.BlockSpec((tE, 1), edge_map),            # src indices (streamed)
        pl.BlockSpec((tE, 1), edge_map),            # dst indices (streamed)
        pl.BlockSpec((tE, De), edge_map),           # edge_attr   (streamed)
        pl.BlockSpec((N_pad, Cin), const_map),      # x (full, resident)
    ] + [pl.BlockSpec(w.shape, const_map) for w in weights]
    out_specs = pl.BlockSpec((N_pad, Cp), const_map)

    # ---- VMEM budget: residents (x2 for pipelined blocks), single-buffered
    #      scratch tables, bounded per-step temporaries; capped below the
    #      physical per-core VMEM reported by the runtime. ----
    b4 = 4
    resident = (2 * N_pad * Cin * b4
                + 2 * sum(int(w.size) * b4 for w in weights)
                + 2 * N_pad * Cp * b4                 # output accumulator block
                + 2 * N_pad * Cp * b4)                # xwa + xwb scratch
    streamed = 2 * (2 * tE * 4 + tE * De * b4)
    temps = 3 * tE * slab * b4 + 4 * tE * Cp * b4 + 2 * slab * Cp * b4
    vmem_bytes = resident + streamed + temps + (4 << 20)
    try:
        phys = int(pltpu.get_tpu_info().vmem_capacity_bytes)
    except Exception:
        phys = 64 << 20
    vmem_bytes = int(max(8 << 20, min(vmem_bytes, phys - (12 << 20))))

    kernel = functools.partial(se3_layer_kernel, n_slabs=n_slabs, slab=slab,
                               mm_dtype=matmul_dtype)

    out_full = pl.pallas_call(
        kernel,
        out_shape=jax.ShapeDtypeStruct((N_pad, Cp), jnp.float32),
        grid_spec=pltpu.PrefetchScalarGridSpec(
            num_scalar_prefetch=0,
            grid=(n_edge_tiles,),
            in_specs=in_specs,
            out_specs=out_specs,
            scratch_shapes=[pltpu.VMEM((N_pad, Cp), jnp.float32),
                            pltpu.VMEM((N_pad, Cp), jnp.float32)],
        ),
        compiler_params=pltpu.CompilerParams(
            dimension_semantics=("arbitrary",),
            vmem_limit_bytes=vmem_bytes,
        ),
    )(src_p, dst_p, ea_p, x_p, *weights)

    return out_full[:N, :C]


def init_params(key, in_channels, out_channels, edge_dim):
    """Deterministic synthetic parameters (Linear weights stored as [in, out])."""
    ks = jax.random.split(key, 12)
    s = 0.1
    p = {
        "wn1": s * jax.random.normal(ks[0], (in_channels, out_channels), jnp.float32),
        "bn1": s * jax.random.normal(ks[1], (1, out_channels), jnp.float32),
        "wn2": s * jax.random.normal(ks[2], (out_channels, out_channels), jnp.float32),
        "bn2": s * jax.random.normal(ks[3], (1, out_channels), jnp.float32),
        # edge_mlp first Linear: weight over [h_src | h_dst | edge_attr], split in 3
        "we1a": s * jax.random.normal(ks[4], (in_channels, out_channels), jnp.float32),
        "we1b": s * jax.random.normal(ks[5], (in_channels, out_channels), jnp.float32),
        "we1c": s * jax.random.normal(ks[6], (edge_dim, out_channels), jnp.float32),
        "be1": s * jax.random.normal(ks[7], (1, out_channels), jnp.float32),
        "we2": s * jax.random.normal(ks[8], (out_channels, out_channels), jnp.float32),
        "be2": s * jax.random.normal(ks[9], (1, out_channels), jnp.float32),
        # update Linear: weight over [h_nodes | h_agg], split in 2
        "wua": s * jax.random.normal(ks[10], (out_channels, out_channels), jnp.float32),
        "wub": s * jax.random.normal(ks[11], (out_channels, out_channels), jnp.float32),
        "bu": s * jax.random.normal(jax.random.fold_in(key, 99), (1, out_channels), jnp.float32),
    }
    return p


def ref_forward(x, edge_index, edge_attr, params):
    """Plain-JAX reference replicating the PyTorch semantics."""
    h1 = jnp.maximum(x @ params["wn1"] + params["bn1"], 0.0)
    h_nodes = h1 @ params["wn2"] + params["bn2"]
    src, dst = edge_index[0], edge_index[1]
    h_src = x[src]
    h_dst = x[dst]
    e1 = jnp.maximum(
        h_src @ params["we1a"] + h_dst @ params["we1b"]
        + edge_attr @ params["we1c"] + params["be1"],
        0.0,
    )
    h_edges = e1 @ params["we2"] + params["be2"]
    h_agg = jnp.zeros_like(h_nodes).at[dst].add(h_edges)
    return h_nodes @ params["wua"] + h_agg @ params["wub"] + params["bu"]


if __name__ == "__main__":
    key = jax.random.PRNGKey(0)
    num_nodes, num_edges = 200, 300
    in_channels, out_channels, edge_dim = 4, 32, 5

    k_x, k_e, k_p, k_pos = jax.random.split(key, 4)
    x = jax.random.normal(k_x, (num_nodes, in_channels), jnp.float32)
    edge_attr = jax.random.normal(k_e, (num_edges, edge_dim), jnp.float32)
    pos = jax.random.normal(k_pos, (num_nodes, 3), jnp.float32)
    # deterministic edge connectivity
    src = jnp.arange(num_edges, dtype=jnp.int32) % num_nodes
    dst = (7 * jnp.arange(num_edges, dtype=jnp.int32) + 3) % num_nodes
    edge_index = jnp.stack([src, dst], axis=0)

    params = init_params(k_p, in_channels, out_channels, edge_dim)

    # small tiles so the demo exercises the edge grid axis (3 edge tiles) and
    # the in-kernel node-slab loop (2 slabs of 128 rows).
    out = se3_layer(x, edge_index, edge_attr, pos, params,
                    edge_tile=128, node_slab=128)
    out = jax.block_until_ready(out)

    expected = ref_forward(x, edge_index, edge_attr, params)
    assert out.shape == (num_nodes, out_channels)
    assert jnp.allclose(out, expected, atol=1e-4, rtol=1e-4), "mismatch vs reference"

    print("KERNEL_OK")
</pallas_src>

<mosaic_0001>
module attributes {stable_mosaic.version = 11 : i64} {
  func.func @se3_layer_kernel(%arg0: i32, %arg1: memref<128x1xi32, #tpu.memory_space<vmem>>, %arg2: memref<128x1xi32, #tpu.memory_space<vmem>>, %arg3: memref<128x5xf32, #tpu.memory_space<vmem>>, %arg4: memref<256x4xf32, #tpu.memory_space<vmem>>, %arg5: memref<4x128xf32, #tpu.memory_space<vmem>>, %arg6: memref<1x128xf32, #tpu.memory_space<vmem>>, %arg7: memref<128x128xf32, #tpu.memory_space<vmem>>, %arg8: memref<4x128xf32, #tpu.memory_space<vmem>>, %arg9: memref<4x128xf32, #tpu.memory_space<vmem>>, %arg10: memref<5x128xf32, #tpu.memory_space<vmem>>, %arg11: memref<1x128xf32, #tpu.memory_space<vmem>>, %arg12: memref<128x128xf32, #tpu.memory_space<vmem>>, %arg13: memref<1x128xf32, #tpu.memory_space<vmem>>, %arg14: memref<1x128xf32, #tpu.memory_space<vmem>>, %arg15: memref<256x128xf32, #tpu.memory_space<vmem>>, %arg16: memref<256x128xf32, #tpu.memory_space<vmem>>, %arg17: memref<256x128xf32, #tpu.memory_space<vmem>>) attributes {dimension_semantics = [#tpu.dimension_semantics<arbitrary>], iteration_bounds = array<i64: 3>, scalar_prefetch = 0 : i64, scratch_operands = 2 : i64, tpu.core_type = #tpu.core_type<tc>, window_params = [{transform_indices = @transform_0, window_bounds = array<i64: 128, 1>}, {transform_indices = @transform_1, window_bounds = array<i64: 128, 1>}, {transform_indices = @transform_2, window_bounds = array<i64: 128, 5>}, {pipeline_mode = #tpu.pipeline_mode<synchronous>, transform_indices = @transform_3, window_bounds = array<i64: 256, 4>}, {pipeline_mode = #tpu.pipeline_mode<synchronous>, transform_indices = @transform_4, window_bounds = array<i64: 4, 128>}, {pipeline_mode = #tpu.pipeline_mode<synchronous>, transform_indices = @transform_5, window_bounds = array<i64: 1, 128>}, {pipeline_mode = #tpu.pipeline_mode<synchronous>, transform_indices = @transform_6, window_bounds = array<i64: 128, 128>}, {pipeline_mode = #tpu.pipeline_mode<synchronous>, transform_indices = @transform_7, window_bounds = array<i64: 4, 128>}, {pipeline_mode = #tpu.pipeline_mode<synchronous>, transform_indices = @transform_8, window_bounds = array<i64: 4, 128>}, {pipeline_mode = #tpu.pipeline_mode<synchronous>, transform_indices = @transform_9, window_bounds = array<i64: 5, 128>}, {pipeline_mode = #tpu.pipeline_mode<synchronous>, transform_indices = @transform_10, window_bounds = array<i64: 1, 128>}, {pipeline_mode = #tpu.pipeline_mode<synchronous>, transform_indices = @transform_11, window_bounds = array<i64: 128, 128>}, {pipeline_mode = #tpu.pipeline_mode<synchronous>, transform_indices = @transform_12, window_bounds = array<i64: 1, 128>}, {pipeline_mode = #tpu.pipeline_mode<synchronous>, transform_indices = @transform_13, window_bounds = array<i64: 1, 128>}, {pipeline_mode = #tpu.pipeline_mode<synchronous>, transform_indices = @transform_14, window_bounds = array<i64: 256, 128>}]} {
    %c0_i32 = arith.constant 0 : i32
    %0 = arith.cmpi eq, %arg0, %c0_i32 : i32
    %1 = arith.extui %0 : i1 to i32
    %c0_i32_0 = arith.constant 0 : i32
    %2 = arith.cmpi ne, %1, %c0_i32_0 : i32
    scf.if %2 {
      %cst_41 = arith.constant 0.000000e+00 : f32
      %77 = vector.broadcast %cst_41 : f32 to vector<256x128xf32>
      %c0_42 = arith.constant 0 : index
      %c0_43 = arith.constant 0 : index
      %78 = vector.load %arg15[%c0_42, %c0_43] : memref<256x128xf32, #tpu.memory_space<vmem>>, vector<256x128xf32>
      tpu.vector_store %arg15[%c0_42, %c0_43], %77 {strides = array<i32>} : memref<256x128xf32, #tpu.memory_space<vmem>>, vector<256x128xf32>,
      %c0_44 = arith.constant 0 : index
      %c0_45 = arith.constant 0 : index
      %79 = vector.load %arg8[%c0_44, %c0_45] : memref<4x128xf32, #tpu.memory_space<vmem>>, vector<4x128xf32>
      %c0_46 = arith.constant 0 : index
      %c0_47 = arith.constant 0 : index
      %80 = vector.load %arg9[%c0_46, %c0_47] : memref<4x128xf32, #tpu.memory_space<vmem>>, vector<4x128xf32>
      %c0_48 = arith.constant 0 : index
      %c0_49 = arith.constant 0 : index
      %81 = vector.load %arg4[%c0_48, %c0_49] : memref<256x4xf32, #tpu.memory_space<vmem>>, vector<128x4xf32>
      %cst_50 = arith.constant dense<0.000000e+00> : vector<128x128xf32>
      %82 = tpu.matmul %81, %79, %cst_50 {dimension_numbers = #tpu.dot_dimension_numbers<[1], [0], [0], [1], [0, 0, 1, 1], [], []>} : vector<128x4xf32>, vector<4x128xf32>, vector<128x128xf32> -> vector<128x128xf32>
      %c0_51 = arith.constant 0 : index
      %c0_52 = arith.constant 0 : index
      %83 = vector.load %arg16[%c0_51, %c0_52] : memref<256x128xf32, #tpu.memory_space<vmem>>, vector<128x128xf32>
      tpu.vector_store %arg16[%c0_51, %c0_52], %82 {strides = array<i32>} : memref<256x128xf32, #tpu.memory_space<vmem>>, vector<128x128xf32>,
      %cst_53 = arith.constant dense<0.000000e+00> : vector<128x128xf32>
      %84 = tpu.matmul %81, %80, %cst_53 {dimension_numbers = #tpu.dot_dimension_numbers<[1], [0], [0], [1], [0, 0, 1, 1], [], []>} : vector<128x4xf32>, vector<4x128xf32>, vector<128x128xf32> -> vector<128x128xf32>
      %c0_54 = arith.constant 0 : index
      %c0_55 = arith.constant 0 : index
      %85 = vector.load %arg17[%c0_54, %c0_55] : memref<256x128xf32, #tpu.memory_space<vmem>>, vector<128x128xf32>
      tpu.vector_store %arg17[%c0_54, %c0_55], %84 {strides = array<i32>} : memref<256x128xf32, #tpu.memory_space<vmem>>, vector<128x128xf32>,
      %c128_56 = arith.constant 128 : index
      %c0_57 = arith.constant 0 : index
      %86 = vector.load %arg4[%c128_56, %c0_57] : memref<256x4xf32, #tpu.memory_space<vmem>>, vector<128x4xf32>
      %cst_58 = arith.constant dense<0.000000e+00> : vector<128x128xf32>
      %87 = tpu.matmul %86, %79, %cst_58 {dimension_numbers = #tpu.dot_dimension_numbers<[1], [0], [0], [1], [0, 0, 1, 1], [], []>} : vector<128x4xf32>, vector<4x128xf32>, vector<128x128xf32> -> vector<128x128xf32>
      %c128_59 = arith.constant 128 : index
      %c0_60 = arith.constant 0 : index
      %88 = vector.load %arg16[%c128_59, %c0_60] : memref<256x128xf32, #tpu.memory_space<vmem>>, vector<128x128xf32>
      tpu.vector_store %arg16[%c128_59, %c0_60], %87 {strides = array<i32>} : memref<256x128xf32, #tpu.memory_space<vmem>>, vector<128x128xf32>,
      %cst_61 = arith.constant dense<0.000000e+00> : vector<128x128xf32>
      %89 = tpu.matmul %86, %80, %cst_61 {dimension_numbers = #tpu.dot_dimension_numbers<[1], [0], [0], [1], [0, 0, 1, 1], [], []>} : vector<128x4xf32>, vector<4x128xf32>, vector<128x128xf32> -> vector<128x128xf32>
      %c128_62 = arith.constant 128 : index
      %c0_63 = arith.constant 0 : index
      %90 = vector.load %arg17[%c128_62, %c0_63] : memref<256x128xf32, #tpu.memory_space<vmem>>, vector<128x128xf32>
      tpu.vector_store %arg17[%c128_62, %c0_63], %89 {strides = array<i32>} : memref<256x128xf32, #tpu.memory_space<vmem>>, vector<128x128xf32>,
    } else {
    }
    %c0 = arith.constant 0 : index
    %c0_1 = arith.constant 0 : index
    %3 = vector.load %arg1[%c0, %c0_1] : memref<128x1xi32, #tpu.memory_space<vmem>>, vector<128x1xi32>
    %c0_2 = arith.constant 0 : index
    %c0_3 = arith.constant 0 : index
    %4 = vector.load %arg2[%c0_2, %c0_3] : memref<128x1xi32, #tpu.memory_space<vmem>>, vector<128x1xi32>
    %c0_4 = arith.constant 0 : index
    %c0_5 = arith.constant 0 : index
    %5 = vector.load %arg3[%c0_4, %c0_5] : memref<128x5xf32, #tpu.memory_space<vmem>>, vector<128x5xf32>
    %c0_6 = arith.constant 0 : index
    %c0_7 = arith.constant 0 : index
    %6 = vector.load %arg10[%c0_6, %c0_7] : memref<5x128xf32, #tpu.memory_space<vmem>>, vector<5x128xf32>
    %cst = arith.constant dense<0.000000e+00> : vector<128x128xf32>
    %7 = tpu.matmul %5, %6, %cst {dimension_numbers = #tpu.dot_dimension_numbers<[1], [0], [0], [1], [0, 0, 1, 1], [], []>} : vector<128x5xf32>, vector<5x128xf32>, vector<128x128xf32> -> vector<128x128xf32>
    %c0_8 = arith.constant 0 : index
    %c0_9 = arith.constant 0 : index
    %8 = vector.load %arg11[%c0_8, %c0_9] : memref<1x128xf32, #tpu.memory_space<vmem>>, vector<1x128xf32>
    %9 = vector.broadcast %8 : vector<1x128xf32> to vector<128x128xf32>
    %10 = arith.addf %7, %9 : vector<128x128xf32>
    %11 = tpu.iota {dimensions = array<i32: 1>} : vector<128x128xi32>
    %c0_i32_10 = arith.constant 0 : i32
    %12 = vector.broadcast %c0_i32_10 : i32 to vector<128x128xi32>
    %13 = arith.addi %11, %12 : vector<128x128xi32>
    %14 = vector.broadcast %3 : vector<128x1xi32> to vector<128x128xi32>
    %15 = arith.cmpi eq, %13, %14 : vector<128x128xi32>
    %16 = arith.extui %15 : vector<128x128xi1> to vector<128x128xi32>
    %17 = arith.sitofp %16 : vector<128x128xi32> to vector<128x128xf32>
    %18 = vector.broadcast %4 : vector<128x1xi32> to vector<128x128xi32>
    %19 = arith.cmpi eq, %13, %18 : vector<128x128xi32>
    %20 = arith.extui %19 : vector<128x128xi1> to vector<128x128xi32>
    %21 = arith.sitofp %20 : vector<128x128xi32> to vector<128x128xf32>
    %c0_11 = arith.constant 0 : index
    %c0_12 = arith.constant 0 : index
    %22 = vector.load %arg16[%c0_11, %c0_12] : memref<256x128xf32, #tpu.memory_space<vmem>>, vector<128x128xf32>
    %c0_13 = arith.constant 0 : index
    %c0_14 = arith.constant 0 : index
    %23 = vector.load %arg17[%c0_13, %c0_14] : memref<256x128xf32, #tpu.memory_space<vmem>>, vector<128x128xf32>
    %cst_15 = arith.constant dense<0.000000e+00> : vector<128x128xf32>
    %24 = tpu.matmul %17, %22, %cst_15 {dimension_numbers = #tpu.dot_dimension_numbers<[1], [0], [0], [1], [0, 0, 1, 1], [], []>} : vector<128x128xf32>, vector<128x128xf32>, vector<128x128xf32> -> vector<128x128xf32>
    %25 = arith.addf %10, %24 : vector<128x128xf32>
    %cst_16 = arith.constant dense<0.000000e+00> : vector<128x128xf32>
    %26 = tpu.matmul %21, %23, %cst_16 {dimension_numbers = #tpu.dot_dimension_numbers<[1], [0], [0], [1], [0, 0, 1, 1], [], []>} : vector<128x128xf32>, vector<128x128xf32>, vector<128x128xf32> -> vector<128x128xf32>
    %27 = arith.addf %25, %26 : vector<128x128xf32>
    %28 = tpu.iota {dimensions = array<i32: 1>} : vector<128x128xi32>
    %c128_i32 = arith.constant 128 : i32
    %29 = vector.broadcast %c128_i32 : i32 to vector<128x128xi32>
    %30 = arith.addi %28, %29 : vector<128x128xi32>
    %31 = vector.broadcast %3 : vector<128x1xi32> to vector<128x128xi32>
    %32 = arith.cmpi eq, %30, %31 : vector<128x128xi32>
    %33 = arith.extui %32 : vector<128x128xi1> to vector<128x128xi32>
    %34 = arith.sitofp %33 : vector<128x128xi32> to vector<128x128xf32>
    %35 = vector.broadcast %4 : vector<128x1xi32> to vector<128x128xi32>
    %36 = arith.cmpi eq, %30, %35 : vector<128x128xi32>
    %37 = arith.extui %36 : vector<128x128xi1> to vector<128x128xi32>
    %38 = arith.sitofp %37 : vector<128x128xi32> to vector<128x128xf32>
    %c128 = arith.constant 128 : index
    %c0_17 = arith.constant 0 : index
    %39 = vector.load %arg16[%c128, %c0_17] : memref<256x128xf32, #tpu.memory_space<vmem>>, vector<128x128xf32>
    %c128_18 = arith.constant 128 : index
    %c0_19 = arith.constant 0 : index
    %40 = vector.load %arg17[%c128_18, %c0_19] : memref<256x128xf32, #tpu.memory_space<vmem>>, vector<128x128xf32>
    %cst_20 = arith.constant dense<0.000000e+00> : vector<128x128xf32>
    %41 = tpu.matmul %34, %39, %cst_20 {dimension_numbers = #tpu.dot_dimension_numbers<[1], [0], [0], [1], [0, 0, 1, 1], [], []>} : vector<128x128xf32>, vector<128x128xf32>, vector<128x128xf32> -> vector<128x128xf32>
    %42 = arith.addf %27, %41 : vector<128x128xf32>
    %cst_21 = arith.constant dense<0.000000e+00> : vector<128x128xf32>
    %43 = tpu.matmul %38, %40, %cst_21 {dimension_numbers = #tpu.dot_dimension_numbers<[1], [0], [0], [1], [0, 0, 1, 1], [], []>} : vector<128x128xf32>, vector<128x128xf32>, vector<128x128xf32> -> vector<128x128xf32>
    %44 = arith.addf %42, %43 : vector<128x128xf32>
    %cst_22 = arith.constant 0.000000e+00 : f32
    %45 = vector.broadcast %cst_22 : f32 to vector<128x128xf32>
    %46 = arith.maximumf %44, %45 : vector<128x128xf32>
    %c0_23 = arith.constant 0 : index
    %c0_24 = arith.constant 0 : index
    %47 = vector.load %arg12[%c0_23, %c0_24] : memref<128x128xf32, #tpu.memory_space<vmem>>, vector<128x128xf32>
    %cst_25 = arith.constant dense<0.000000e+00> : vector<128x128xf32>
    %48 = tpu.matmul %46, %47, %cst_25 {dimension_numbers = #tpu.dot_dimension_numbers<[1], [0], [0], [1], [0, 0, 1, 1], [], []>} : vector<128x128xf32>, vector<128x128xf32>, vector<128x128xf32> -> vector<128x128xf32>
    %c0_26 = arith.constant 0 : index
    %c0_27 = arith.constant 0 : index
    %49 = vector.load %arg13[%c0_26, %c0_27] : memref<1x128xf32, #tpu.memory_space<vmem>>, vector<1x128xf32>
    %50 = vector.broadcast %49 : vector<1x128xf32> to vector<128x128xf32>
    %51 = arith.addf %48, %50 : vector<128x128xf32>
    %52 = tpu.iota {dimensions = array<i32: 1>} : vector<128x128xi32>
    %c0_i32_28 = arith.constant 0 : i32
    %53 = vector.broadcast %c0_i32_28 : i32 to vector<128x128xi32>
    %54 = arith.addi %52, %53 : vector<128x128xi32>
    %55 = vector.broadcast %4 : vector<128x1xi32> to vector<128x128xi32>
    %56 = arith.cmpi eq, %54, %55 : vector<128x128xi32>
    %57 = arith.extui %56 : vector<128x128xi1> to vector<128x128xi32>
    %58 = arith.sitofp %57 : vector<128x128xi32> to vector<128x128xf32>
    %cst_29 = arith.constant dense<0.000000e+00> : vector<128x128xf32>
    %59 = tpu.matmul %58, %51, %cst_29 {dimension_numbers = #tpu.dot_dimension_numbers<[0], [0], [1], [1], [0, 1, 1, 1], [], []>} : vector<128x128xf32>, vector<128x128xf32>, vector<128x128xf32> -> vector<128x128xf32>
    %c0_30 = arith.constant 0 : index
    %c0_31 = arith.constant 0 : index
    %60 = vector.load %arg15[%c0_30, %c0_31] : memref<256x128xf32, #tpu.memory_space<vmem>>, vector<128x128xf32>
    %61 = arith.addf %60, %59 : vector<128x128xf32>
    %c0_32 = arith.constant 0 : index
    %c0_33 = arith.constant 0 : index
    %62 = vector.load %arg15[%c0_32, %c0_33] : memref<256x128xf32, #tpu.memory_space<vmem>>, vector<128x128xf32>
    tpu.vector_store %arg15[%c0_32, %c0_33], %61 {strides = array<i32>} : memref<256x128xf32, #tpu.memory_space<vmem>>, vector<128x128xf32>,
    %63 = tpu.iota {dimensions = array<i32: 1>} : vector<128x128xi32>
    %c128_i32_34 = arith.constant 128 : i32
    %64 = vector.broadcast %c128_i32_34 : i32 to vector<128x128xi32>
    %65 = arith.addi %63, %64 : vector<128x128xi32>
    %66 = vector.broadcast %4 : vector<128x1xi32> to vector<128x128xi32>
    %67 = arith.cmpi eq, %65, %66 : vector<128x128xi32>
    %68 = arith.extui %67 : vector<128x128xi1> to vector<128x128xi32>
    %69 = arith.sitofp %68 : vector<128x128xi32> to vector<128x128xf32>
    %cst_35 = arith.constant dense<0.000000e+00> : vector<128x128xf32>
    %70 = tpu.matmul %69, %51, %cst_35 {dimension_numbers = #tpu.dot_dimension_numbers<[0], [0], [1], [1], [0, 1, 1, 1], [], []>} : vector<128x128xf32>, vector<128x128xf32>, vector<128x128xf32> -> vector<128x128xf32>
    %c128_36 = arith.constant 128 : index
    %c0_37 = arith.constant 0 : index
    %71 = vector.load %arg15[%c128_36, %c0_37] : memref<256x128xf32, #tpu.memory_space<vmem>>, vector<128x128xf32>
    %72 = arith.addf %71, %70 : vector<128x128xf32>
    %c128_38 = arith.constant 128 : index
    %c0_39 = arith.constant 0 : index
    %73 = vector.load %arg15[%c128_38, %c0_39] : memref<256x128xf32, #tpu.memory_space<vmem>>, vector<128x128xf32>
    tpu.vector_store %arg15[%c128_38, %c0_39], %72 {strides = array<i32>} : memref<256x128xf32, #tpu.memory_space<vmem>>, vector<128x128xf32>,
    %c2_i32 = arith.constant 2 : i32
    %74 = arith.cmpi eq, %arg0, %c2_i32 : i32
    %75 = arith.extui %74 : i1 to i32
    %c0_i32_40 = arith.constant 0 : i32
    %76 = arith.cmpi ne, %75, %c0_i32_40 : i32
    scf.if %76 {
      %c0_41 = arith.constant 0 : index
      %c0_42 = arith.constant 0 : index
      %77 = vector.load %arg5[%c0_41, %c0_42] : memref<4x128xf32, #tpu.memory_space<vmem>>, vector<4x128xf32>
      %c0_43 = arith.constant 0 : index
      %c0_44 = arith.constant 0 : index
      %78 = vector.load %arg7[%c0_43, %c0_44] : memref<128x128xf32, #tpu.memory_space<vmem>>, vector<128x128xf32>
      %c0_45 = arith.constant 0 : index
      %c0_46 = arith.constant 0 : index
      %79 = vector.load %arg4[%c0_45, %c0_46] : memref<256x4xf32, #tpu.memory_space<vmem>>, vector<128x4xf32>
      %cst_47 = arith.constant dense<0.000000e+00> : vector<128x128xf32>
      %80 = tpu.matmul %79, %77, %cst_47 {dimension_numbers = #tpu.dot_dimension_numbers<[1], [0], [0], [1], [0, 0, 1, 1], [], []>} : vector<128x4xf32>, vector<4x128xf32>, vector<128x128xf32> -> vector<128x128xf32>
      %c0_48 = arith.constant 0 : index
      %c0_49 = arith.constant 0 : index
      %81 = vector.load %arg6[%c0_48, %c0_49] : memref<1x128xf32, #tpu.memory_space<vmem>>, vector<1x128xf32>
      %82 = vector.broadcast %81 : vector<1x128xf32> to vector<128x128xf32>
      %83 = arith.addf %80, %82 : vector<128x128xf32>
      %cst_50 = arith.constant 0.000000e+00 : f32
      %84 = vector.broadcast %cst_50 : f32 to vector<128x128xf32>
      %85 = arith.maximumf %83, %84 : vector<128x128xf32>
      %cst_51 = arith.constant dense<0.000000e+00> : vector<128x128xf32>
      %86 = tpu.matmul %85, %78, %cst_51 {dimension_numbers = #tpu.dot_dimension_numbers<[1], [0], [0], [1], [0, 0, 1, 1], [], []>} : vector<128x128xf32>, vector<128x128xf32>, vector<128x128xf32> -> vector<128x128xf32>
      %c0_52 = arith.constant 0 : index
      %c0_53 = arith.constant 0 : index
      %87 = vector.load %arg14[%c0_52, %c0_53] : memref<1x128xf32, #tpu.memory_space<vmem>>, vector<1x128xf32>
      %88 = vector.broadcast %87 : vector<1x128xf32> to vector<128x128xf32>
      %89 = arith.addf %86, %88 : vector<128x128xf32>
      %c0_54 = arith.constant 0 : index
      %c0_55 = arith.constant 0 : index
      %90 = vector.load %arg15[%c0_54, %c0_55] : memref<256x128xf32, #tpu.memory_space<vmem>>, vector<128x128xf32>
      %91 = arith.addf %90, %89 : vector<128x128xf32>
      %c0_56 = arith.constant 0 : index
      %c0_57 = arith.constant 0 : index
      %92 = vector.load %arg15[%c0_56, %c0_57] : memref<256x128xf32, #tpu.memory_space<vmem>>, vector<128x128xf32>
      tpu.vector_store %arg15[%c0_56, %c0_57], %91 {strides = array<i32>} : memref<256x128xf32, #tpu.memory_space<vmem>>, vector<128x128xf32>,
      %c128_58 = arith.constant 128 : index
      %c0_59 = arith.constant 0 : index
      %93 = vector.load %arg4[%c128_58, %c0_59] : memref<256x4xf32, #tpu.memory_space<vmem>>, vector<128x4xf32>
      %cst_60 = arith.constant dense<0.000000e+00> : vector<128x128xf32>
      %94 = tpu.matmul %93, %77, %cst_60 {dimension_numbers = #tpu.dot_dimension_numbers<[1], [0], [0], [1], [0, 0, 1, 1], [], []>} : vector<128x4xf32>, vector<4x128xf32>, vector<128x128xf32> -> vector<128x128xf32>
      %c0_61 = arith.constant 0 : index
      %c0_62 = arith.constant 0 : index
      %95 = vector.load %arg6[%c0_61, %c0_62] : memref<1x128xf32, #tpu.memory_space<vmem>>, vector<1x128xf32>
      %96 = vector.broadcast %95 : vector<1x128xf32> to vector<128x128xf32>
      %97 = arith.addf %94, %96 : vector<128x128xf32>
      %cst_63 = arith.constant 0.000000e+00 : f32
      %98 = vector.broadcast %cst_63 : f32 to vector<128x128xf32>
      %99 = arith.maximumf %97, %98 : vector<128x128xf32>
      %cst_64 = arith.constant dense<0.000000e+00> : vector<128x128xf32>
      %100 = tpu.matmul %99, %78, %cst_64 {dimension_numbers = #tpu.dot_dimension_numbers<[1], [0], [0], [1], [0, 0, 1, 1], [], []>} : vector<128x128xf32>, vector<128x128xf32>, vector<128x128xf32> -> vector<128x128xf32>
      %c0_65 = arith.constant 0 : index
      %c0_66 = arith.constant 0 : index
      %101 = vector.load %arg14[%c0_65, %c0_66] : memref<1x128xf32, #tpu.memory_space<vmem>>, vector<1x128xf32>
      %102 = vector.broadcast %101 : vector<1x128xf32> to vector<128x128xf32>
      %103 = arith.addf %100, %102 : vector<128x128xf32>
      %c128_67 = arith.constant 128 : index
      %c0_68 = arith.constant 0 : index
      %104 = vector.load %arg15[%c128_67, %c0_68] : memref<256x128xf32, #tpu.memory_space<vmem>>, vector<128x128xf32>
      %105 = arith.addf %104, %103 : vector<128x128xf32>
      %c128_69 = arith.constant 128 : index
      %c0_70 = arith.constant 0 : index
      %106 = vector.load %arg15[%c128_69, %c0_70] : memref<256x128xf32, #tpu.memory_space<vmem>>, vector<128x128xf32>
      tpu.vector_store %arg15[%c128_69, %c0_70], %105 {strides = array<i32>} : memref<256x128xf32, #tpu.memory_space<vmem>>, vector<128x128xf32>,
    } else {
    }
    return
  }
  func.func @transform_0(%arg0: i32) -> (i32, i32) {
    %c0_i32 = arith.constant 0 : i32
    %c0_i32_0 = arith.constant 0 : i32
    return %arg0, %c0_i32 : i32, i32
  }
  func.func @transform_1(%arg0: i32) -> (i32, i32) {
    %c0_i32 = arith.constant 0 : i32
    %c0_i32_0 = arith.constant 0 : i32
    return %arg0, %c0_i32 : i32, i32
  }
  func.func @transform_2(%arg0: i32) -> (i32, i32) {
    %c0_i32 = arith.constant 0 : i32
    %c0_i32_0 = arith.constant 0 : i32
    return %arg0, %c0_i32 : i32, i32
  }
  func.func @transform_3(%arg0: i32) -> (i32, i32) {
    %c0_i32 = arith.constant 0 : i32
    %c0_i32_0 = arith.constant 0 : i32
    %c0_i32_1 = arith.constant 0 : i32
    return %c0_i32, %c0_i32_0 : i32, i32
  }
  func.func @transform_4(%arg0: i32) -> (i32, i32) {
    %c0_i32 = arith.constant 0 : i32
    %c0_i32_0 = arith.constant 0 : i32
    %c0_i32_1 = arith.constant 0 : i32
    return %c0_i32, %c0_i32_0 : i32, i32
  }
  func.func @transform_5(%arg0: i32) -> (i32, i32) {
    %c0_i32 = arith.constant 0 : i32
    %c0_i32_0 = arith.constant 0 : i32
    %c0_i32_1 = arith.constant 0 : i32
    return %c0_i32, %c0_i32_0 : i32, i32
  }
  func.func @transform_6(%arg0: i32) -> (i32, i32) {
    %c0_i32 = arith.constant 0 : i32
    %c0_i32_0 = arith.constant 0 : i32
    %c0_i32_1 = arith.constant 0 : i32
    return %c0_i32, %c0_i32_0 : i32, i32
  }
  func.func @transform_7(%arg0: i32) -> (i32, i32) {
    %c0_i32 = arith.constant 0 : i32
    %c0_i32_0 = arith.constant 0 : i32
    %c0_i32_1 = arith.constant 0 : i32
    return %c0_i32, %c0_i32_0 : i32, i32
  }
  func.func @transform_8(%arg0: i32) -> (i32, i32) {
    %c0_i32 = arith.constant 0 : i32
    %c0_i32_0 = arith.constant 0 : i32
    %c0_i32_1 = arith.constant 0 : i32
    return %c0_i32, %c0_i32_0 : i32, i32
  }
  func.func @transform_9(%arg0: i32) -> (i32, i32) {
    %c0_i32 = arith.constant 0 : i32
    %c0_i32_0 = arith.constant 0 : i32
    %c0_i32_1 = arith.constant 0 : i32
    return %c0_i32, %c0_i32_0 : i32, i32
  }
  func.func @transform_10(%arg0: i32) -> (i32, i32) {
    %c0_i32 = arith.constant 0 : i32
    %c0_i32_0 = arith.constant 0 : i32
    %c0_i32_1 = arith.constant 0 : i32
    return %c0_i32, %c0_i32_0 : i32, i32
  }
  func.func @transform_11(%arg0: i32) -> (i32, i32) {
    %c0_i32 = arith.constant 0 : i32
    %c0_i32_0 = arith.constant 0 : i32
    %c0_i32_1 = arith.constant 0 : i32
    return %c0_i32, %c0_i32_0 : i32, i32
  }
  func.func @transform_12(%arg0: i32) -> (i32, i32) {
    %c0_i32 = arith.constant 0 : i32
    %c0_i32_0 = arith.constant 0 : i32
    %c0_i32_1 = arith.constant 0 : i32
    return %c0_i32, %c0_i32_0 : i32, i32
  }
  func.func @transform_13(%arg0: i32) -> (i32, i32) {
    %c0_i32 = arith.constant 0 : i32
    %c0_i32_0 = arith.constant 0 : i32
    %c0_i32_1 = arith.constant 0 : i32
    return %c0_i32, %c0_i32_0 : i32, i32
  }
  func.func @transform_14(%arg0: i32) -> (i32, i32) {
    %c0_i32 = arith.constant 0 : i32
    %c0_i32_0 = arith.constant 0 : i32
    %c0_i32_1 = arith.constant 0 : i32
    return %c0_i32, %c0_i32_0 : i32, i32
  }
}

</mosaic_0001>

<bundles_post_ra>
// kernel: tpu_custom_call.1
= control target key start
LH: loop header
LB: loop body
LE: loop exit
PB: predicated region body
PF: predicated region fallthrough
CT: control target
= control target key end

     0   :  { %19 = vsyncpa [#allocation5], 0  ;;  %s6056_s29 = smov 0   ;;  %s7268_s0 = inlined_call_operand.vmem [shape: s32[384,1], index: 0, kind: input, shape index: {}]   ;;  %s7269_s1 = inlined_call_operand.vmem [shape: s32[384,1], index: 1, kind: input, shape index: {}]   ;;  %s7270_s2 = inlined_call_operand.vmem [shape: f32[384,5], index: 2, kind: input, shape index: {}]   ;;  %s7271_s3 = inlined_call_operand.vmem [shape: f32[256,4], index: 3, kind: input, shape index: {}]   ;;  %s7272_s4 = inlined_call_operand.vmem [shape: f32[4,128], index: 4, kind: input, shape index: {}]   ;;  %s7273_s5 = inlined_call_operand.vmem [shape: f32[1,128], index: 5, kind: input, shape index: {}]   ;;  %s7274_s6 = inlined_call_operand.vmem [shape: f32[128,128], index: 6, kind: input, shape index: {}]   ;;  %s7275_s7 = inlined_call_operand.vmem [shape: f32[4,128], index: 7, kind: input, shape index: {}]   ;;  %s7276_s8 = inlined_call_operand.vmem [shape: f32[4,128], index: 8, kind: input, shape index: {}]   ;;  %s7277_s9 = inlined_call_operand.vmem [shape: f32[5,128], index: 9, kind: input, shape index: {}]   ;;  %s7278_s10 = inlined_call_operand.vmem [shape: f32[1,128], index: 10, kind: input, shape index: {}]   ;;  %s7279_s11 = inlined_call_operand.vmem [shape: f32[128,128], index: 11, kind: input, shape index: {}]   ;;  %s7280_s12 = inlined_call_operand.vmem [shape: f32[1,128], index: 12, kind: input, shape index: {}]   ;;  %s7281_s13 = inlined_call_operand.vmem [shape: f32[1,128], index: 13, kind: input, shape index: {}]   ;;  %s7282_s14 = inlined_call_operand.hbm [shape: f32[256,128], index: 14, kind: output, shape index: {}]  }
   0x1 LB: > { %s6062_s30 = sadd.s32 4294967295, %s5972_s29   ;;  %p4170_p0 = scmp.ge.s32.totalorder %s5972_s29, 1  ;;  %s5972_s29 = sphi %s6056_s29, %s25_s29  }
   0x2   : > { %p431_p1 = scmp.lt.s32.totalorder %s5972_s29, 4 }
   0x4   : > { %p432_p2 = pnand %p4170_p0, %p431_p1 }
   0x5   : > { %s4171_s15 = sshll.u32 (!%p432_p2), %s6062_s30, 4  ;;  %p4177_p4 = scmp.ne.s32.totalorder (!%p432_p2), %s6062_s30, 0 }
   0x6   : > { %435 = sbr.rel (%p432_p2) target bundleno = 1750 (0x6d6), region = 76  ;;  %p483_p3 = scmp.lt.s32.totalorder (!%p432_p2), %s4171_s15, 47 }
   0xd   : > { %s7296_s15 = smov (!%p483_p3, %s4171_s15), 47  ;;  %503 = sbr.rel (%p4177_p4) target bundleno = 293 (0x125), region = 80 }
   0xe   : > { %s4172_s16 = sshll.u32 %s7296_s15, 3  ;;  %v536_v0 = vld [vmem:[%s7275_s7] sm:$0xf] (!%p4177_p4)  ;;  %vm603_vm0 = vcmask (!%p4177_p4), 1043456   ;;  %v5974_v2 = vmov (!%p4177_p4), 0.0   ;;  %vm554_vm1 = vcmask (!%p4177_p4), 31744  }
   0xf   : > { %s6070_s19 = scalar_lea.vmem %s7268_s0, %s4172_s16  ;;  %s6075_s22 = scalar_lea.vmem %s7269_s1, %s4172_s16  ;;  %v537_v1 = vld [vmem:[%s7276_s8] sm:$0xf] (!%p4177_p4)  ;;  %504 = vst [vmem:[#allocation4] sm:$0xff] (!%p4177_p4), %v5974_v2  ;;  %505 = vst [vmem:[#allocation4 + $0x8] sm:$0xff] (!%p4177_p4), %v5974_v2  ;;  %4843 = vmatprep.subr.msk.mxu0 (!%p4177_p4), %vm603_vm0, %v536_v0  ;;  %v539_v4 = vld [vmem:[%s7271_s3 + $0x8] sm:$0xff] (!%p4177_p4) }
  0x10   : > { %s6080_s25 = scalar_lea.vmem %s7270_s2, %s4172_s16  ;;  %506 = vst [vmem:[#allocation4 + $0x10] sm:$0xff] (!%p4177_p4), %v5974_v2  ;;  %507 = vst [vmem:[#allocation4 + $0x18] sm:$0xff] (!%p4177_p4), %v5974_v2  ;;  %4869 = vmatprep.subr.msk.mxu1 (!%p4177_p4), %vm603_vm0, %v537_v1  ;;  %v538_v3 = vld [vmem:[%s7271_s3] sm:$0xff] (!%p4177_p4)  ;;  %4844 = vmatpush3.msk.msra.mxu0 (!%p4177_p4), %vm603_vm0, %v536_v0  ;;  %v540_v5 = vld [vmem:[%s7271_s3 + $0x10] sm:$0xff] (!%p4177_p4) }
  0x11   : > { %508 = vst [vmem:[#allocation4 + $0x20] sm:$0xff] (!%p4177_p4), %v5974_v2  ;;  %509 = vst [vmem:[#allocation4 + $0x28] sm:$0xff] (!%p4177_p4), %v5974_v2  ;;  %4845 = vmatprep.mubr.msk.f32.mxu0 (!%p4177_p4), %vm554_vm1, %v538_v3  ;;  %4870 = vmatpush3.msk.msra.mxu1 (!%p4177_p4), %vm603_vm0, %v537_v1  ;;  %v541_v6 = vld [vmem:[%s7271_s3 + $0x18] sm:$0xff] (!%p4177_p4)  ;;  %v542_v7 = vld [vmem:[%s7271_s3 + $0x20] sm:$0xff] (!%p4177_p4) }
  0x12   : > { %510 = vst [vmem:[#allocation4 + $0x30] sm:$0xff] (!%p4177_p4), %v5974_v2  ;;  %511 = vst [vmem:[#allocation4 + $0x38] sm:$0xff] (!%p4177_p4), %v5974_v2  ;;  %4871 = vmatprep.mubr.msk.f32.mxu1 (!%p4177_p4), %vm554_vm1, %v538_v3  ;;  %4846 = vmatmul.mubr.msk.f32.vlgmr.msra.gmra.mrb[0].mxu0 (!%p4177_p4), %vm554_vm1, %v539_v4  ;;  %v543_v8 = vld [vmem:[%s7271_s3 + $0x28] sm:$0xff] (!%p4177_p4)  ;;  %v544_v9 = vld [vmem:[%s7271_s3 + $0x30] sm:$0xff] (!%p4177_p4) }
  0x13   : > { %512 = vst [vmem:[#allocation4 + $0x40] sm:$0xff] (!%p4177_p4), %v5974_v2  ;;  %513 = vst [vmem:[#allocation4 + $0x48] sm:$0xff] (!%p4177_p4), %v5974_v2  ;;  %4872 = vmatmul.mubr.msk.f32.vlgmr.msra.gmra.mrb[0].mxu1 (!%p4177_p4), %vm554_vm1, %v539_v4  ;;  %4895 = vmatprep.subr.msk.mxu0 (!%p4177_p4), %vm603_vm0, %v536_v0  ;;  %v545_v10 = vld [vmem:[%s7271_s3 + $0x38] sm:$0xff] (!%p4177_p4)  ;;  %v546_v11 = vld [vmem:[%s7271_s3 + $0x40] sm:$0xff] (!%p4177_p4) }
  0x14   : > { %514 = vst [vmem:[#allocation4 + $0x50] sm:$0xff] %v5974_v2  ;;  %515 = vst [vmem:[#allocation4 + $0x58] sm:$0xff] %v5974_v2  ;;  %4921 = vmatprep.subr.msk.mxu1 %vm603_vm0, %v537_v1  ;;  %4896 = vmatpush3.msk.msra.mxu0 %vm603_vm0, %v536_v0  ;;  %v547_v12 = vld [vmem:[%s7271_s3 + $0x48] sm:$0xff]  ;;  %v548_v13 = vld [vmem:[%s7271_s3 + $0x50] sm:$0xff] }
  0x15   : > { %516 = vst [vmem:[#allocation4 + $0x60] sm:$0xff] %v5974_v2  ;;  %517 = vst [vmem:[#allocation4 + $0x68] sm:$0xff] %v5974_v2  ;;  %4922 = vmatpush3.msk.msra.mxu1 %vm603_vm0, %v537_v1  ;;  %4848 = vmatprep.mubr.msk.f32.mxu0 %vm554_vm1, %v540_v5  ;;  %v549_v14 = vld [vmem:[%s7271_s3 + $0x58] sm:$0xff]  ;;  %v550_v15 = vld [vmem:[%s7271_s3 + $0x60] sm:$0xff] }
  0x16   : > { %518 = vst [vmem:[#allocation4 + $0x70] sm:$0xff] %v5974_v2  ;;  %519 = vst [vmem:[#allocation4 + $0x78] sm:$0xff] %v5974_v2  ;;  %4874 = vmatprep.mubr.msk.f32.mxu1 %vm554_vm1, %v540_v5  ;;  %4849 = vmatmul.mubr.msk.f32.gmra.mrb[2].mxu0 %vm554_vm1, %v541_v6  ;;  %v551_v16 = vld [vmem:[%s7271_s3 + $0x68] sm:$0xff]  ;;  %v552_v17 = vld [vmem:[%s7271_s3 + $0x70] sm:$0xff] }
  0x17   : > { %520 = vst [vmem:[#allocation4 + $0x80] sm:$0xff] %v5974_v2  ;;  %521 = vst [vmem:[#allocation4 + $0x88] sm:$0xff] %v5974_v2  ;;  %4875 = vmatmul.mubr.msk.f32.gmra.mrb[2].mxu1 %vm554_vm1, %v541_v6  ;;  %4851 = vmatprep.mubr.msk.f32.mxu0 %vm554_vm1, %v542_v7  ;;  %v553_v18 = vld [vmem:[%s7271_s3 + $0x78] sm:$0xff]  ;;  %v932_v19 = vld [vmem:[%s7271_s3 + $0x80] sm:$0xff] }
  0x18   : > { %522 = vst [vmem:[#allocation4 + $0x90] sm:$0xff] %v5974_v2  ;;  %523 = vst [vmem:[#allocation4 + $0x98] sm:$0xff] %v5974_v2  ;;  %4877 = vmatprep.mubr.msk.f32.mxu1 %vm554_vm1, %v542_v7  ;;  %v933_v20 = vld [vmem:[%s7271_s3 + $0x88] sm:$0xff]  ;;  %v934_v21 = vld [vmem:[%s7271_s3 + $0x90] sm:$0xff] }
  0x19   : > { %524 = vst [vmem:[#allocation4 + $0xa0] sm:$0xff] %v5974_v2  ;;  %525 = vst [vmem:[#allocation4 + $0xa8] sm:$0xff] %v5974_v2  ;;  %v935_v22 = vld [vmem:[%s7271_s3 + $0x98] sm:$0xff]  ;;  %v936_v23 = vld [vmem:[%s7271_s3 + $0xa0] sm:$0xff] }
  0x1a   : > { %526 = vst [vmem:[#allocation4 + $0xb0] sm:$0xff] %v5974_v2  ;;  %527 = vst [vmem:[#allocation4 + $0xb8] sm:$0xff] %v5974_v2  ;;  %4852 = vmatmul.mubr.msk.f32.gmra.mrb[4].mxu0 %vm554_vm1, %v543_v8  ;;  %v937_v24 = vld [vmem:[%s7271_s3 + $0xa8] sm:$0xff]  ;;  %v938_v25 = vld [vmem:[%s7271_s3 + $0xb0] sm:$0xff] }
  0x1b   : > { %528 = vst [vmem:[#allocation4 + $0xc0] sm:$0xff] %v5974_v2  ;;  %529 = vst [vmem:[#allocation4 + $0xc8] sm:$0xff] %v5974_v2  ;;  %4878 = vmatmul.mubr.msk.f32.gmra.mrb[4].mxu1 %vm554_vm1, %v543_v8  ;;  %4854 = vmatprep.mubr.msk.f32.mxu0 %vm554_vm1, %v544_v9  ;;  %v939_v26 = vld [vmem:[%s7271_s3 + $0xb8] sm:$0xff]  ;;  %v940_v27 = vld [vmem:[%s7271_s3 + $0xc0] sm:$0xff] }
  0x1c   : > { %530 = vst [vmem:[#allocation4 + $0xd0] sm:$0xff] %v5974_v2  ;;  %531 = vst [vmem:[#allocation4 + $0xd8] sm:$0xff] %v5974_v2  ;;  %4880 = vmatprep.mubr.msk.f32.mxu1 %vm554_vm1, %v544_v9  ;;  %v941_v28 = vld [vmem:[%s7271_s3 + $0xc8] sm:$0xff]  ;;  %v942_v29 = vld [vmem:[%s7271_s3 + $0xd0] sm:$0xff] }
  0x1d   : > { %532 = vst [vmem:[#allocation4 + $0xe0] sm:$0xff] %v5974_v2  ;;  %533 = vst [vmem:[#allocation4 + $0xe8] sm:$0xff] %v5974_v2  ;;  %v943_v30 = vld [vmem:[%s7271_s3 + $0xd8] sm:$0xff]  ;;  %v944_v31 = vld [vmem:[%s7271_s3 + $0xe0] sm:$0xff] }
  0x1e   : > { %534 = vst [vmem:[#allocation4 + $0xf0] sm:$0xff] %v5974_v2  ;;  %535 = vst [vmem:[#allocation4 + $0xf8] sm:$0xff] %v5974_v2  ;;  %4855 = vmatmul.mubr.msk.f32.gmra.mrb[6].mxu0 %vm554_vm1, %v545_v10  ;;  %v945_v32 = vld [vmem:[%s7271_s3 + $0xe8] sm:$0xff]  ;;  %v946_v33 = vld [vmem:[%s7271_s3 + $0xf0] sm:$0xff] }
  0x1f   : > { %4881 = vmatmul.mubr.msk.f32.gmra.mrb[6].mxu1 %vm554_vm1, %v545_v10  ;;  %4857 = vmatprep.mubr.msk.f32.mxu0 %vm554_vm1, %v546_v11  ;;  %v947_v34 = vld [vmem:[%s7271_s3 + $0xf8] sm:$0xff] }
  0x20   : > { %4883 = vmatprep.mubr.msk.f32.mxu1 %vm554_vm1, %v546_v11 }
  0x22   : > { %4858 = vmatmul.mubr.msk.f32.gmra.mrb[8].mxu0 %vm554_vm1, %v547_v12 }
  0x23   : > { %4884 = vmatmul.mubr.msk.f32.gmra.mrb[8].mxu1 %vm554_vm1, %v547_v12  ;;  %4860 = vmatprep.mubr.msk.f32.mxu0 %vm554_vm1, %v548_v13 }
  0x24   : > { %4886 = vmatprep.mubr.msk.f32.mxu1 %vm554_vm1, %v548_v13 }
  0x26   : > { %4861 = vmatmul.mubr.msk.f32.gmra.mrb[10].mxu0 %vm554_vm1, %v549_v14 }
  0x27   : > { %4887 = vmatmul.mubr.msk.f32.gmra.mrb[10].mxu1 %vm554_vm1, %v549_v14  ;;  %4863 = vmatprep.mubr.msk.f32.mxu0 %vm554_vm1, %v550_v15 }
  0x28   : > { %4889 = vmatprep.mubr.msk.f32.mxu1 %vm554_vm1, %v550_v15 }
  0x2a   : > { %4864 = vmatmul.mubr.msk.f32.gmra.mrb[12].mxu0 %vm554_vm1, %v551_v16 }
  0x2b   : > { %4890 = vmatmul.mubr.msk.f32.gmra.mrb[12].mxu1 %vm554_vm1, %v551_v16  ;;  %4866 = vmatprep.mubr.msk.f32.mxu0 %vm554_vm1, %v552_v17 }
  0x2c   : > { %4892 = vmatprep.mubr.msk.f32.mxu1 %vm554_vm1, %v552_v17 }
  0x2e   : > { %4867 = vmatmul.mubr.msk.f32.gmra.mrb[14].mxu0 %vm554_vm1, %v553_v18 }
  0x2f   : > { %4893 = vmatmul.mubr.msk.f32.gmra.mrb[14].mxu1 %vm554_vm1, %v553_v18  ;;  %4897 = vmatprep.mubr.msk.f32.mxu0 %vm554_vm1, %v932_v19 }
  0x30   : > { %4923 = vmatprep.mubr.msk.f32.mxu1 %vm554_vm1, %v932_v19 }
  0x32   : > { %4898 = vmatmul.mubr.msk.f32.vlgmr.msra.gmra.mrb[16].mxu0 %vm554_vm1, %v933_v20 }
  0x33   : > { %4924 = vmatmul.mubr.msk.f32.vlgmr.msra.gmra.mrb[16].mxu1 %vm554_vm1, %v933_v20  ;;  %4900 = vmatprep.mubr.msk.f32.mxu0 %vm554_vm1, %v934_v21 }
  0x34   : > { %4926 = vmatprep.mubr.msk.f32.mxu1 %vm554_vm1, %v934_v21 }
  0x36   : > { %4901 = vmatmul.mubr.msk.f32.gmra.mrb[18].mxu0 %vm554_vm1, %v935_v22 }
  0x37   : > { %4927 = vmatmul.mubr.msk.f32.gmra.mrb[18].mxu1 %vm554_vm1, %v935_v22  ;;  %4903 = vmatprep.mubr.msk.f32.mxu0 %vm554_vm1, %v936_v23 }
  0x38   : > { %4929 = vmatprep.mubr.msk.f32.mxu1 %vm554_vm1, %v936_v23 }
  0x3a   : > { %4904 = vmatmul.mubr.msk.f32.gmra.mrb[20].mxu0 %vm554_vm1, %v937_v24 }
  0x3b   : > { %4930 = vmatmul.mubr.msk.f32.gmra.mrb[20].mxu1 %vm554_vm1, %v937_v24  ;;  %4906 = vmatprep.mubr.msk.f32.mxu0 %vm554_vm1, %v938_v25 }
  0x3c   : > { %4932 = vmatprep.mubr.msk.f32.mxu1 %vm554_vm1, %v938_v25 }
  0x3e   : > { %4907 = vmatmul.mubr.msk.f32.gmra.mrb[22].mxu0 %vm554_vm1, %v939_v26 }
  0x3f   : > { %4933 = vmatmul.mubr.msk.f32.gmra.mrb[22].mxu1 %vm554_vm1, %v939_v26  ;;  %4909 = vmatprep.mubr.msk.f32.mxu0 %vm554_vm1, %v940_v27 }
  0x40   : > { %4935 = vmatprep.mubr.msk.f32.mxu1 %vm554_vm1, %v940_v27 }
  0x42   : > { %4910 = vmatmul.mubr.msk.f32.gmra.mrb[24].mxu0 %vm554_vm1, %v941_v28 }
  0x43   : > { %4936 = vmatmul.mubr.msk.f32.gmra.mrb[24].mxu1 %vm554_vm1, %v941_v28  ;;  %4912 = vmatprep.mubr.msk.f32.mxu0 %vm554_vm1, %v942_v29 }
  0x44   : > { %4938 = vmatprep.mubr.msk.f32.mxu1 %vm554_vm1, %v942_v29 }
  0x46   : > { %4913 = vmatmul.mubr.msk.f32.gmra.mrb[26].mxu0 %vm554_vm1, %v943_v30 }
  0x47   : > { %4939 = vmatmul.mubr.msk.f32.gmra.mrb[26].mxu1 %vm554_vm1, %v943_v30  ;;  %4915 = vmatprep.mubr.msk.f32.mxu0 %vm554_vm1, %v944_v31 }
  0x48   : > { %4941 = vmatprep.mubr.msk.f32.mxu1 %vm554_vm1, %v944_v31 }
  0x4a   : > { %4916 = vmatmul.mubr.msk.f32.gmra.mrb[28].mxu0 %vm554_vm1, %v945_v32 }
  0x4b   : > { %4942 = vmatmul.mubr.msk.f32.gmra.mrb[28].mxu1 %vm554_vm1, %v945_v32  ;;  %4918 = vmatprep.mubr.msk.f32.mxu0 %vm554_vm1, %v946_v33 }
  0x4c   : > { %4944 = vmatprep.mubr.msk.f32.mxu1 %vm554_vm1, %v946_v33 }
  0x4e   : > { %4919 = vmatmul.mubr.msk.f32.gmra.mrb[30].mxu0 %vm554_vm1, %v947_v34 }
  0x4f   : > { %4945 = vmatmul.mubr.msk.f32.gmra.mrb[30].mxu1 %vm554_vm1, %v947_v34 }
  0xe5   : > { %v4847_v35 = vpop.f32.mrb[0].mxu0 }
  0xe6   : > { %v4873_v36 = vpop.f32.mrb[0].mxu1  ;;  %753 = vst [vmem:[#allocation2 + $0x8] sm:$0xff] %v4847_v35  ;;  %v673_v37 = vpop.f32.mrb[1].mxu0 }
  0xe7   : > { %917 = vst [vmem:[#allocation3 + $0x8] sm:$0xff] %v4873_v36  ;;  %v837_v38 = vpop.f32.mrb[1].mxu1  ;;  %752 = vst [vmem:[#allocation2] sm:$0xff] %v673_v37 }
  0xe8   : > { %916 = vst [vmem:[#allocation3] sm:$0xff] %v837_v38 }
  0xe9   : > { %v4850_v39 = vpop.f32.mrb[2].mxu0 }
  0xea   : > { %v4876_v40 = vpop.f32.mrb[2].mxu1  ;;  %755 = vst [vmem:[#allocation2 + $0x18] sm:$0xff] %v4850_v39  ;;  %v683_v41 = vpop.f32.mrb[3].mxu0 }
  0xeb   : > { %919 = vst [vmem:[#allocation3 + $0x18] sm:$0xff] %v4876_v40  ;;  %v847_v42 = vpop.f32.mrb[3].mxu1  ;;  %754 = vst [vmem:[#allocation2 + $0x10] sm:$0xff] %v683_v41 }
  0xec   : > { %918 = vst [vmem:[#allocation3 + $0x10] sm:$0xff] %v847_v42 }
  0xed   : > { %v4853_v43 = vpop.f32.mrb[4].mxu0 }
  0xee   : > { %v4879_v44 = vpop.f32.mrb[4].mxu1  ;;  %757 = vst [vmem:[#allocation2 + $0x28] sm:$0xff] %v4853_v43  ;;  %v693_v45 = vpop.f32.mrb[5].mxu0 }
  0xef   : > { %921 = vst [vmem:[#allocation3 + $0x28] sm:$0xff] %v4879_v44  ;;  %v857_v46 = vpop.f32.mrb[5].mxu1  ;;  %756 = vst [vmem:[#allocation2 + $0x20] sm:$0xff] %v693_v45 }
  0xf0   : > { %920 = vst [vmem:[#allocation3 + $0x20] sm:$0xff] %v857_v46 }
  0xf1   : > { %v4856_v47 = vpop.f32.mrb[6].mxu0 }
  0xf2   : > { %v4882_v48 = vpop.f32.mrb[6].mxu1  ;;  %759 = vst [vmem:[#allocation2 + $0x38] sm:$0xff] %v4856_v47  ;;  %v703_v49 = vpop.f32.mrb[7].mxu0 }
  0xf3   : > { %923 = vst [vmem:[#allocation3 + $0x38] sm:$0xff] %v4882_v48  ;;  %v867_v50 = vpop.f32.mrb[7].mxu1  ;;  %758 = vst [vmem:[#allocation2 + $0x30] sm:$0xff] %v703_v49 }
  0xf4   : > { %922 = vst [vmem:[#allocation3 + $0x30] sm:$0xff] %v867_v50 }
  0xf5   : > { %v4859_v51 = vpop.f32.mrb[8].mxu0 }
  0xf6   : > { %v4885_v52 = vpop.f32.mrb[8].mxu1  ;;  %761 = vst [vmem:[#allocation2 + $0x48] sm:$0xff] %v4859_v51  ;;  %v713_v53 = vpop.f32.mrb[9].mxu0 }
  0xf7   : > { %925 = vst [vmem:[#allocation3 + $0x48] sm:$0xff] %v4885_v52  ;;  %v877_v54 = vpop.f32.mrb[9].mxu1  ;;  %760 = vst [vmem:[#allocation2 + $0x40] sm:$0xff] %v713_v53 }
  0xf8   : > { %924 = vst [vmem:[#allocation3 + $0x40] sm:$0xff] %v877_v54 }
  0xf9   : > { %v4862_v55 = vpop.f32.mrb[10].mxu0 }
  0xfa   : > { %v4888_v56 = vpop.f32.mrb[10].mxu1  ;;  %763 = vst [vmem:[#allocation2 + $0x58] sm:$0xff] %v4862_v55  ;;  %v723_v57 = vpop.f32.mrb[11].mxu0 }
  0xfb   : > { %927 = vst [vmem:[#allocation3 + $0x58] sm:$0xff] %v4888_v56  ;;  %v887_v58 = vpop.f32.mrb[11].mxu1  ;;  %762 = vst [vmem:[#allocation2 + $0x50] sm:$0xff] %v723_v57 }
  0xfc   : > { %926 = vst [vmem:[#allocation3 + $0x50] sm:$0xff] %v887_v58 }
  0xfd   : > { %v4865_v59 = vpop.f32.mrb[12].mxu0 }
  0xfe   : > { %v4891_v60 = vpop.f32.mrb[12].mxu1  ;;  %765 = vst [vmem:[#allocation2 + $0x68] sm:$0xff] %v4865_v59  ;;  %v733_v61 = vpop.f32.mrb[13].mxu0 }
  0xff   : > { %929 = vst [vmem:[#allocation3 + $0x68] sm:$0xff] %v4891_v60  ;;  %v897_v62 = vpop.f32.mrb[13].mxu1  ;;  %764 = vst [vmem:[#allocation2 + $0x60] sm:$0xff] %v733_v61 }
 0x100   : > { %928 = vst [vmem:[#allocation3 + $0x60] sm:$0xff] %v897_v62 }
 0x101   : > { %v4868_v63 = vpop.f32.mrb[14].mxu0 }
 0x102   : > { %v4894_v0 = vpop.f32.mrb[14].mxu1  ;;  %767 = vst [vmem:[#allocation2 + $0x78] sm:$0xff] %v4868_v63  ;;  %v743_v1 = vpop.f32.mrb[15].mxu0 }
 0x103   : > { %931 = vst [vmem:[#allocation3 + $0x78] sm:$0xff] %v4894_v0  ;;  %v907_v2 = vpop.f32.mrb[15].mxu1  ;;  %766 = vst [vmem:[#allocation2 + $0x70] sm:$0xff] %v743_v1 }
 0x104   : > { %930 = vst [vmem:[#allocation3 + $0x70] sm:$0xff] %v907_v2 }
 0x105   : > { %v4899_v3 = vpop.f32.mrb[16].mxu0 }
 0x106   : > { %v4925_v4 = vpop.f32.mrb[16].mxu1  ;;  %1142 = vst [vmem:[#allocation2 + $0x88] sm:$0xff] %v4899_v3  ;;  %v1062_v5 = vpop.f32.mrb[17].mxu0 }
 0x107   : > { %1303 = vst [vmem:[#allocation3 + $0x88] sm:$0xff] %v4925_v4  ;;  %v1223_v6 = vpop.f32.mrb[17].mxu1  ;;  %1141 = vst [vmem:[#allocation2 + $0x80] sm:$0xff] %v1062_v5 }
 0x108   : > { %1302 = vst [vmem:[#allocation3 + $0x80] sm:$0xff] %v1223_v6 }
 0x109   : > { %v4902_v7 = vpop.f32.mrb[18].mxu0 }
 0x10a   : > { %v4928_v8 = vpop.f32.mrb[18].mxu1  ;;  %1144 = vst [vmem:[#allocation2 + $0x98] sm:$0xff] %v4902_v7  ;;  %v1072_v9 = vpop.f32.mrb[19].mxu0 }
 0x10b   : > { %1305 = vst [vmem:[#allocation3 + $0x98] sm:$0xff] %v4928_v8  ;;  %v1233_v10 = vpop.f32.mrb[19].mxu1  ;;  %1143 = vst [vmem:[#allocation2 + $0x90] sm:$0xff] %v1072_v9 }
 0x10c   : > { %1304 = vst [vmem:[#allocation3 + $0x90] sm:$0xff] %v1233_v10 }
 0x10d   : > { %v4905_v11 = vpop.f32.mrb[20].mxu0 }
 0x10e   : > { %v4931_v12 = vpop.f32.mrb[20].mxu1  ;;  %1146 = vst [vmem:[#allocation2 + $0xa8] sm:$0xff] %v4905_v11  ;;  %v1082_v13 = vpop.f32.mrb[21].mxu0 }
 0x10f   : > { %1307 = vst [vmem:[#allocation3 + $0xa8] sm:$0xff] %v4931_v12  ;;  %v1243_v14 = vpop.f32.mrb[21].mxu1  ;;  %1145 = vst [vmem:[#allocation2 + $0xa0] sm:$0xff] %v1082_v13 }
 0x110   : > { %1306 = vst [vmem:[#allocation3 + $0xa0] sm:$0xff] %v1243_v14 }
 0x111   : > { %v4908_v15 = vpop.f32.mrb[22].mxu0 }
 0x112   : > { %v4934_v16 = vpop.f32.mrb[22].mxu1  ;;  %1148 = vst [vmem:[#allocation2 + $0xb8] sm:$0xff] %v4908_v15  ;;  %v1092_v17 = vpop.f32.mrb[23].mxu0 }
 0x113   : > { %1309 = vst [vmem:[#allocation3 + $0xb8] sm:$0xff] %v4934_v16  ;;  %v1253_v18 = vpop.f32.mrb[23].mxu1  ;;  %1147 = vst [vmem:[#allocation2 + $0xb0] sm:$0xff] %v1092_v17 }
 0x114   : > { %1308 = vst [vmem:[#allocation3 + $0xb0] sm:$0xff] %v1253_v18 }
 0x115   : > { %v4911_v19 = vpop.f32.mrb[24].mxu0 }
 0x116   : > { %v4937_v20 = vpop.f32.mrb[24].mxu1  ;;  %1150 = vst [vmem:[#allocation2 + $0xc8] sm:$0xff] %v4911_v19  ;;  %v1102_v21 = vpop.f32.mrb[25].mxu0 }
 0x117   : > { %1311 = vst [vmem:[#allocation3 + $0xc8] sm:$0xff] %v4937_v20  ;;  %v1263_v22 = vpop.f32.mrb[25].mxu1  ;;  %1149 = vst [vmem:[#allocation2 + $0xc0] sm:$0xff] %v1102_v21 }
 0x118   : > { %1310 = vst [vmem:[#allocation3 + $0xc0] sm:$0xff] %v1263_v22 }
 0x119   : > { %v4914_v23 = vpop.f32.mrb[26].mxu0 }
 0x11a   : > { %v4940_v24 = vpop.f32.mrb[26].mxu1  ;;  %1152 = vst [vmem:[#allocation2 + $0xd8] sm:$0xff] %v4914_v23  ;;  %v1112_v25 = vpop.f32.mrb[27].mxu0 }
 0x11b   : > { %1313 = vst [vmem:[#allocation3 + $0xd8] sm:$0xff] %v4940_v24  ;;  %v1273_v26 = vpop.f32.mrb[27].mxu1  ;;  %1151 = vst [vmem:[#allocation2 + $0xd0] sm:$0xff] %v1112_v25 }
 0x11c   : > { %1312 = vst [vmem:[#allocation3 + $0xd0] sm:$0xff] %v1273_v26 }
 0x11d   : > { %v4917_v27 = vpop.f32.mrb[28].mxu0 }
 0x11e   : > { %v4943_v28 = vpop.f32.mrb[28].mxu1  ;;  %1154 = vst [vmem:[#allocation2 + $0xe8] sm:$0xff] %v4917_v27  ;;  %v1122_v29 = vpop.f32.mrb[29].mxu0 }
 0x11f   : > { %1315 = vst [vmem:[#allocation3 + $0xe8] sm:$0xff] %v4943_v28  ;;  %v1283_v30 = vpop.f32.mrb[29].mxu1  ;;  %1153 = vst [vmem:[#allocation2 + $0xe0] sm:$0xff] %v1122_v29 }
 0x120   : > { %1314 = vst [vmem:[#allocation3 + $0xe0] sm:$0xff] %v1283_v30 }
 0x121   : > { %v4920_v31 = vpop.f32.mrb[30].mxu0 }
 0x122   : > { %v4946_v32 = vpop.f32.mrb[30].mxu1  ;;  %1156 = vst [vmem:[#allocation2 + $0xf8] sm:$0xff] %v4920_v31  ;;  %v1132_v33 = vpop.f32.mrb[31].mxu0 }
 0x123   : > { %1317 = vst [vmem:[#allocation3 + $0xf8] sm:$0xff] %v4946_v32  ;;  %v1293_v34 = vpop.f32.mrb[31].mxu1  ;;  %1155 = vst [vmem:[#allocation2 + $0xf0] sm:$0xff] %v1132_v33 }
 0x124   : > { %1316 = vst [vmem:[#allocation3 + $0xf0] sm:$0xff] %v1293_v34 }
 0x125 PF: > { %v1320_v35 = vld [vmem:[%s6070_s19 + $0x10] sm:$0xff]  ;;  %v1318_v36 = vld [vmem:[%s6070_s19] sm:$0xff]  ;;  %v5975_v37 = vmov 0   ;;  %v1321_v38 = vld [vmem:[%s6070_s19 + $0x18] sm:$0xff]  ;;  %vm1423_vm2 = vcmask 1044480   ;;  %vm1374_vm3 = vcmask 39936  }
 0x126   : > { %5935 = vset.pattern.permute.xlu1 %v5975_v37  ;;  %5934 = vset.pattern.permute.xlu0 %v5975_v37  ;;  %v1319_v39 = vld [vmem:[%s6070_s19 + $0x8] sm:$0xff]  ;;  %v1322_v41 = vld [vmem:[%s6070_s19 + $0x20] sm:$0xff]  ;;  %v1325_v42 = vld [vmem:[%s6070_s19 + $0x38] sm:$0xff]  ;;  %p4393_p5 = scmp.ne.s32.totalorder %s6062_s30, 2 }
 0x127   : > { %1581 = vperm.xlu1 %5935, %v1320_v35   ;;  %1575 = vperm.xlu0 %5934, %v1318_v36   ;;  %v1323_v40 = vld [vmem:[%s6070_s19 + $0x28] sm:$0xff]  ;;  %v1324_v43 = vld [vmem:[%s6070_s19 + $0x30] sm:$0xff]  ;;  %v1766_v44 = vld [vmem:[#allocation2] sm:$0xff] }
 0x128   : > { %v1767_v45 = vld [vmem:[#allocation2 + $0x8] sm:$0xff]  ;;  %v1768_v46 = vld [vmem:[#allocation2 + $0x10] sm:$0xff]  ;;  %v1769_v47 = vld [vmem:[#allocation2 + $0x18] sm:$0xff] }
 0x129   : > { %v5529_v48 = vpack.c.bf16 %v1767_v45, %v1766_v44  ;;  %v5533_v49 = vpack.c.bf16 %v1769_v47, %v1768_v46  ;;  %v1770_v50 = vld [vmem:[#allocation2 + $0x20] sm:$0xff]  ;;  %v1771_v51 = vld [vmem:[#allocation2 + $0x28] sm:$0xff]  ;;  %v1772_v55 = vld [vmem:[#allocation2 + $0x30] sm:$0xff]  ;;  %v1572_v45 = vlaneseq }
 0x12a   : > { %v1327_v52 = vld [vmem:[%s6070_s19 + $0x48] sm:$0xff]  ;;  %v1326_v53 = vld [vmem:[%s6070_s19 + $0x40] sm:$0xff]  ;;  %v5537_v54 = vpack.c.bf16 %v1771_v51, %v1770_v50  ;;  %v1773_v56 = vld [vmem:[#allocation2 + $0x38] sm:$0xff] }
 0x12b   : > { %1584 = vperm.xlu1 %5935, %v1321_v38   ;;  %1578 = vperm.xlu0 %5934, %v1319_v39   ;;  %v1329_v57 = vld [vmem:[%s6070_s19 + $0x58] sm:$0xff]  ;;  %v1328_v58 = vld [vmem:[%s6070_s19 + $0x50] sm:$0xff]  ;;  %v5541_v59 = vpack.c.bf16 %v1773_v56, %v1772_v55  ;;  %v1774_v60 = vld [vmem:[#allocation2 + $0x40] sm:$0xff] }
 0x12c   : > { %5530 = vmatprep.subr.bf16.mxu0 %v5529_v48  ;;  %v1775_v61 = vld [vmem:[#allocation2 + $0x48] sm:$0xff]  ;;  %v1330_v63 = vld [vmem:[%s6070_s19 + $0x60] sm:$0xff]  ;;  %v1776_v1 = vld [vmem:[#allocation2 + $0x50] sm:$0xff] }
 0x12d   : > { %5532 = vmatpush3.bf16.msra.mxu0 %v5529_v48  ;;  %v1331_v62 = vld [vmem:[%s6070_s19 + $0x68] sm:$0xff]  ;;  %v5545_v0 = vpack.c.bf16 %v1775_v61, %v1774_v60  ;;  %v1777_v2 = vld [vmem:[#allocation2 + $0x58] sm:$0xff]  ;;  %v1332_v4 = vld [vmem:[%s6070_s19 + $0x70] sm:$0xff]  ;;  %v6325_v48 = vand.u32 127, %v1572_v45 }
 0x12e   : > { %5534 = vmatprep.subr.bf16.mxu0 %v5533_v49  ;;  %v1333_v3 = vld [vmem:[%s6070_s19 + $0x78] sm:$0xff]  ;;  %v5549_v5 = vpack.c.bf16 %v1777_v2, %v1776_v1  ;;  %v1778_v6 = vld [vmem:[#allocation2 + $0x60] sm:$0xff]  ;;  %v1779_v7 = vld [vmem:[#allocation2 + $0x68] sm:$0xff] }
 0x12f   : > { %1590 = vperm.xlu1 %5935, %v1323_v40   ;;  %1587 = vperm.xlu0 %5934, %v1322_v41   ;;  %v1335_v8 = vld [vmem:[%s6075_s22 + $0x8] sm:$0xff]  ;;  %v1334_v9 = vld [vmem:[%s6075_s22] sm:$0xff]  ;;  %v5553_v10 = vpack.c.bf16 %v1779_v7, %v1778_v6  ;;  %v1780_v11 = vld [vmem:[#allocation2 + $0x70] sm:$0xff] }
 0x130   : > { %v1781_v12 = vld [vmem:[#allocation2 + $0x78] sm:$0xff]  ;;  %v1336_v14 = vld [vmem:[%s6075_s22 + $0x10] sm:$0xff]  ;;  %v1782_v16 = vld [vmem:[#allocation3] sm:$0xff] }
 0x131   : > { %5536 = vmatpush3.bf16.msra.mxu0 %v5533_v49  ;;  %v1337_v13 = vld [vmem:[%s6075_s22 + $0x18] sm:$0xff]  ;;  %v5557_v15 = vpack.c.bf16 %v1781_v12, %v1780_v11  ;;  %v1783_v17 = vld [vmem:[#allocation3 + $0x8] sm:$0xff]  ;;  %v1338_v19 = vld [vmem:[%s6075_s22 + $0x20] sm:$0xff] }
 0x132   : > { %5538 = vmatprep.subr.bf16.mxu0 %v5537_v54  ;;  %v1339_v18 = vld [vmem:[%s6075_s22 + $0x28] sm:$0xff]  ;;  %v6279_v20 = vpack.c.bf16 %v1783_v17, %v1782_v16  ;;  %v1341_v21 = vld [vmem:[%s6075_s22 + $0x38] sm:$0xff]  ;;  %v1340_v22 = vld [vmem:[%s6075_s22 + $0x30] sm:$0xff] }
 0x133   : > { %1596 = vperm.xlu1 %5935, %v1325_v42   ;;  %1593 = vperm.xlu0 %5934, %v1324_v43   ;;  %v1343_v23 = vld [vmem:[%s6075_s22 + $0x48] sm:$0xff]  ;;  %v1342_v24 = vld [vmem:[%s6075_s22 + $0x40] sm:$0xff]  ;;  %v1345_v25 = vld [vmem:[%s6075_s22 + $0x58] sm:$0xff] }
 0x134   : > { %v1344_v26 = vld [vmem:[%s6075_s22 + $0x50] sm:$0xff]  ;;  %v1347_v27 = vld [vmem:[%s6075_s22 + $0x68] sm:$0xff]  ;;  %v1346_v28 = vld [vmem:[%s6075_s22 + $0x60] sm:$0xff] }
 0x135   : > { %5540 = vmatpush3.bf16.msra.mxu0 %v5537_v54  ;;  %v1349_v29 = vld [vmem:[%s6075_s22 + $0x78] sm:$0xff]  ;;  %v1348_v30 = vld [vmem:[%s6075_s22 + $0x70] sm:$0xff]  ;;  %v1366_v31 = vld [vmem:[%s7277_s9] sm:$0x1f]  ;;  %v5976_v54 = vmov 1.0  }
 0x136   : > { %5542 = vmatprep.subr.bf16.mxu0 %v5541_v59  ;;  %v1350_v32 = vld [vmem:[%s6080_s25] sm:$0xff]  ;;  %4947 = vmatprep.subr.msk.mxu1 %vm1423_vm2, %v1366_v31  ;;  %v1351_v33 = vld [vmem:[%s6080_s25 + $0x8] sm:$0xff]  ;;  %v1352_v34 = vld [vmem:[%s6080_s25 + $0x10] sm:$0xff] }
 0x137   : > { %1602 = vperm.xlu1 %5935, %v1327_v52   ;;  %1599 = vperm.xlu0 %5934, %v1326_v53   ;;  %v1353_v35 = vld [vmem:[%s6080_s25 + $0x18] sm:$0xff]  ;;  %v1354_v36 = vld [vmem:[%s6080_s25 + $0x20] sm:$0xff]  ;;  %v1355_v37 = vld [vmem:[%s6080_s25 + $0x28] sm:$0xff] }
 0x138   : > { %4949 = vmatprep.mubr.msk.f32.mxu1 %vm1374_vm3, %v1350_v32  ;;  %4948 = vmatpush3.msk.msra.mxu1 %vm1423_vm2, %v1366_v31  ;;  %v1356_v38 = vld [vmem:[%s6080_s25 + $0x30] sm:$0xff]  ;;  %v1357_v39 = vld [vmem:[%s6080_s25 + $0x38] sm:$0xff]  ;;  %v1358_v40 = vld [vmem:[%s6080_s25 + $0x40] sm:$0xff] }
 0x139   : > { %5544 = vmatpush3.bf16.msra.mxu0 %v5541_v59  ;;  %4950 = vmatmul.mubr.msk.f32.vlgmr.msra.gmra.mrb[0].mxu1 %vm1374_vm3, %v1351_v33  ;;  %v1359_v41 = vld [vmem:[%s6080_s25 + $0x48] sm:$0xff]  ;;  %v1360_v42 = vld [vmem:[%s6080_s25 + $0x50] sm:$0xff]  ;;  %v1361_v43 = vld [vmem:[%s6080_s25 + $0x58] sm:$0xff] }
 0x13a   : > { %5546 = vmatprep.subr.bf16.mxu0 %v5545_v0  ;;  %4952 = vmatprep.mubr.msk.f32.mxu1 %vm1374_vm3, %v1352_v34  ;;  %v1362_v44 = vld [vmem:[%s6080_s25 + $0x60] sm:$0xff]  ;;  %v1363_v46 = vld [vmem:[%s6080_s25 + $0x68] sm:$0xff]  ;;  %v1364_v47 = vld [vmem:[%s6080_s25 + $0x70] sm:$0xff] }
 0x13b   : > { %1608 = vperm.xlu1 %5935, %v1329_v57   ;;  %1605 = vperm.xlu0 %5934, %v1328_v58   ;;  %v1365_v49 = vld [vmem:[%s6080_s25 + $0x78] sm:$0xff]  ;;  %v1784_v52 = vld [vmem:[#allocation3 + $0x10] sm:$0xff]  ;;  %v2587_v55 = vld [vmem:[%s7279_s11] sm:$0xff] }
 0x13c   : > { %v1785_v53 = vld [vmem:[#allocation3 + $0x18] sm:$0xff]  ;;  %v2588_v56 = vld [vmem:[%s7279_s11 + $0x8] sm:$0xff]  ;;  %v2589_v57 = vld [vmem:[%s7279_s11 + $0x10] sm:$0xff] }
 0x13d   : > { %5548 = vmatpush3.bf16.msra.mxu0 %v5545_v0  ;;  %4953 = vmatmul.mubr.msk.f32.gmra.mrb[2].mxu1 %vm1374_vm3, %v1353_v35  ;;  %v5565_v60 = vpack.c.bf16 %v1785_v53, %v1784_v52  ;;  %v5657_v61 = vpack.c.bf16 %v2588_v56, %v2587_v55  ;;  %v1787_v0 = vld [vmem:[#allocation3 + $0x28] sm:$0xff]  ;;  %v2591_v2 = vld [vmem:[%s7279_s11 + $0x20] sm:$0xff]  ;;  %v1788_v7 = vld [vmem:[#allocation3 + $0x30] sm:$0xff] }
 0x13e   : > { %5550 = vmatprep.subr.bf16.mxu0 %v5549_v5  ;;  %4955 = vmatprep.mubr.msk.f32.mxu1 %vm1374_vm3, %v1354_v36  ;;  %v2594_v11 = vld [vmem:[%s7279_s11 + $0x38] sm:$0xff]  ;;  %v1791_v16 = vld [vmem:[#allocation3 + $0x48] sm:$0xff]  ;;  %v1794_v31 = vld [vmem:[#allocation3 + $0x60] sm:$0xff] }
 0x13f   : > { %1614 = vperm.xlu1 %5935, %v1331_v62   ;;  %1611 = vperm.xlu0 %5934, %v1330_v63   ;;  %v2590_v62 = vld [vmem:[%s7279_s11 + $0x18] sm:$0xff]  ;;  %v1786_v63 = vld [vmem:[#allocation3 + $0x20] sm:$0xff]  ;;  %v1795_v32 = vld [vmem:[#allocation3 + $0x68] sm:$0xff] }
 0x140   : > { %5658 = vmatprep.subr.bf16.mxu1 %v5657_v61  ;;  %v5661_v1 = vpack.c.bf16 %v2590_v62, %v2589_v57  ;;  %v5569_v6 = vpack.c.bf16 %v1787_v0, %v1786_v63  ;;  %v5585_v36 = vpack.c.bf16 %v1795_v32, %v1794_v31  ;;  %v2219_v55 = vld [vmem:[#allocation2 + $0x90] sm:$0xff]  ;;  %v2220_v56 = vld [vmem:[#allocation2 + $0x98] sm:$0xff]  ;;  %v2221_v63 = vld [vmem:[#allocation2 + $0xa0] sm:$0xff] }
 0x141   : > { %5552 = vmatpush3.bf16.msra.mxu0 %v5549_v5  ;;  %4956 = vmatmul.mubr.msk.f32.gmra.mrb[4].mxu1 %vm1374_vm3, %v1355_v37  ;;  %v1796_v37 = vld [vmem:[#allocation3 + $0x70] sm:$0xff]  ;;  %v2222_v0 = vld [vmem:[#allocation2 + $0xa8] sm:$0xff] }
 0x142   : > { %5554 = vmatprep.subr.bf16.mxu0 %v5553_v10  ;;  %4958 = vmatprep.mubr.msk.f32.mxu1 %vm1374_vm3, %v1356_v38  ;;  %v1797_v38 = vld [vmem:[#allocation3 + $0x78] sm:$0xff] }
 0x143   : > { %1620 = vperm.xlu1 %5935, %v1333_v3   ;;  %1617 = vperm.xlu0 %5934, %v1332_v4   ;;  %v2592_v3 = vld [vmem:[%s7279_s11 + $0x28] sm:$0xff] }
 0x144   : > { %5660 = vmatpush3.bf16.msra.mxu1 %v5657_v61  ;;  %v5597_v61 = vpack.c.bf16 %v2220_v56, %v2219_v55  ;;  %v2231_v56 = vld [vmem:[#allocation2 + $0xf0] sm:$0xff] }
 0x145   : > { %5556 = vmatpush3.bf16.msra.mxu0 %v5553_v10  ;;  %4959 = vmatmul.mubr.msk.f32.gmra.mrb[6].mxu1 %vm1374_vm3, %v1357_v39  ;;  %v2593_v10 = vld [vmem:[%s7279_s11 + $0x30] sm:$0xff]  ;;  %v6433_v39 = vadd.s32 128, %v6325_v48 }
 0x146   : > { %5558 = vmatprep.subr.bf16.mxu0 %v5557_v15  ;;  %4961 = vmatprep.mubr.msk.f32.mxu1 %vm1374_vm3, %v1358_v40  ;;  %v5669_v17 = vpack.c.bf16 %v2594_v11, %v2593_v10 }
 0x147   : > { %1674 = vperm.xlu1 %5935, %v1335_v8   ;;  %1671 = vperm.xlu0 %5934, %v1334_v9   ;;  %v1789_v8 = vld [vmem:[#allocation3 + $0x38] sm:$0xff]  ;;  %v5665_v9 = vpack.c.bf16 %v2592_v3, %v2591_v2 }
 0x148   : > { %5662 = vmatprep.subr.bf16.mxu1 %v5661_v1 }
 0x149   : > { %5560 = vmatpush3.bf16.msra.mxu0 %v5557_v15  ;;  %4962 = vmatmul.mubr.msk.f32.gmra.mrb[8].mxu1 %vm1374_vm3, %v1359_v41  ;;  %v1790_v15 = vld [vmem:[#allocation3 + $0x40] sm:$0xff] }
 0x14a   : > { %5562 = vmatprep.subr.bf16.mxu0 %v6279_v20  ;;  %4964 = vmatprep.mubr.msk.f32.mxu1 %vm1374_vm3, %v1360_v42  ;;  %v5589_v42 = vpack.c.bf16 %v1797_v38, %v1796_v37  ;;  %v2229_v37 = vld [vmem:[#allocation2 + $0xe0] sm:$0xff]  ;;  %v2230_v38 = vld [vmem:[#allocation2 + $0xe8] sm:$0xff] }
 0x14b   : > { %1680 = vperm.xlu1 %5935, %v1337_v13   ;;  %1677 = vperm.xlu0 %5934, %v1336_v14   ;;  %v5573_v14 = vpack.c.bf16 %v1789_v8, %v1788_v7  ;;  %v2223_v8 = vld [vmem:[#allocation2 + $0xb0] sm:$0xff] }
 0x14c   : > { %5664 = vmatpush3.bf16.msra.mxu1 %v5661_v1 }
 0x14d   : > { %4965 = vmatmul.mubr.msk.f32.gmra.mrb[10].mxu1 %vm1374_vm3, %v1361_v43  ;;  %5666 = vmatprep.subr.bf16.mxu1 %v5665_v9  ;;  %v2217_v43 = vld [vmem:[#allocation2 + $0x80] sm:$0xff] }
 0x14e   : > { %4967 = vmatprep.mubr.msk.f32.mxu1 %vm1374_vm3, %v1362_v44  ;;  %v2218_v44 = vld [vmem:[#allocation2 + $0x88] sm:$0xff] }
 0x14f   : > { %1686 = vperm.xlu1 %5935, %v1339_v18   ;;  %1683 = vperm.xlu0 %5934, %v1338_v19   ;;  %v2595_v18 = vld [vmem:[%s7279_s11 + $0x40] sm:$0xff]  ;;  %v2596_v19 = vld [vmem:[%s7279_s11 + $0x48] sm:$0xff] }
 0x150   : > { %5668 = vmatpush3.bf16.msra.mxu1 %v5665_v9  ;;  %v2224_v9 = vld [vmem:[#allocation2 + $0xb8] sm:$0xff] }
 0x151   : > { %4968 = vmatmul.mubr.msk.f32.gmra.mrb[12].mxu1 %vm1374_vm3, %v1363_v46  ;;  %5670 = vmatprep.subr.bf16.mxu1 %v5669_v17 }
 0x152   : > { %4970 = vmatprep.mubr.msk.f32.mxu1 %vm1374_vm3, %v1364_v47  ;;  %v5593_v47 = vpack.c.bf16 %v2218_v44, %v2217_v43 }
 0x153   : > { %1692 = vperm.xlu1 %5935, %v1341_v21   ;;  %1689 = vperm.xlu0 %5934, %v1340_v22   ;;  %v5577_v22 = vpack.c.bf16 %v1791_v16, %v1790_v15  ;;  %v5605_v15 = vpack.c.bf16 %v2224_v9, %v2223_v8  ;;  %v2233_v8 = vld [vmem:[#allocation3 + $0x80] sm:$0xff]  ;;  %v2234_v9 = vld [vmem:[#allocation3 + $0x88] sm:$0xff] }
 0x154   : > { %5672 = vmatpush3.bf16.msra.mxu1 %v5669_v17  ;;  %v2225_v17 = vld [vmem:[#allocation2 + $0xc0] sm:$0xff] }
 0x155   : > { %4971 = vmatmul.mubr.msk.f32.gmra.mrb[14].mxu1 %vm1374_vm3, %v1365_v49  ;;  %v5977_v49 = vmov 0.0  }
 0x157   : > { %1698 = vperm.xlu1 %5935, %v1343_v23   ;;  %1695 = vperm.xlu0 %5934, %v1342_v24   ;;  %v1792_v23 = vld [vmem:[#allocation3 + $0x50] sm:$0xff]  ;;  %v1793_v24 = vld [vmem:[#allocation3 + $0x58] sm:$0xff] }
 0x15b   : > { %1704 = vperm.xlu1 %5935, %v1345_v25   ;;  %1701 = vperm.xlu0 %5934, %v1344_v26   ;;  %v5673_v25 = vpack.c.bf16 %v2596_v19, %v2595_v18  ;;  %v2597_v26 = vld [vmem:[%s7279_s11 + $0x50] sm:$0xff]  ;;  %v2226_v18 = vld [vmem:[#allocation2 + $0xc8] sm:$0xff] }
 0x15d   : > { %5674 = vmatprep.subr.bf16.mxu1 %v5673_v25 }
 0x15e   : > { %5676 = vmatpush3.bf16.msra.mxu1 %v5673_v25 }
 0x15f   : > { %1710 = vperm.xlu1 %5935, %v1347_v27   ;;  %1707 = vperm.xlu0 %5934, %v1346_v28   ;;  %v2598_v27 = vld [vmem:[%s7279_s11 + $0x58] sm:$0xff] }
 0x160   : > { %v5677_v33 = vpack.c.bf16 %v2598_v27, %v2597_v26  ;;  %v2227_v26 = vld [vmem:[#allocation2 + $0xd0] sm:$0xff]  ;;  %v2228_v27 = vld [vmem:[#allocation2 + $0xd8] sm:$0xff] }
 0x162   : > { %5678 = vmatprep.subr.bf16.mxu1 %v5677_v33 }
 0x163   : > { %1716 = vperm.xlu1 %5935, %v1349_v29   ;;  %1713 = vperm.xlu0 %5934, %v1348_v30   ;;  %v5581_v30 = vpack.c.bf16 %v1793_v24, %v1792_v23  ;;  %v5609_v24 = vpack.c.bf16 %v2226_v18, %v2225_v17  ;;  %v2235_v17 = vld [vmem:[#allocation3 + $0x90] sm:$0xff]  ;;  %v2236_v18 = vld [vmem:[#allocation3 + $0x98] sm:$0xff] }
 0x164   : > { %5680 = vmatpush3.bf16.msra.mxu1 %v5677_v33  ;;  %v5613_v33 = vpack.c.bf16 %v2228_v27, %v2227_v26  ;;  %v2238_v26 = vld [vmem:[#allocation3 + $0xa8] sm:$0xff] }
 0x1a6   : > { %v6328_v50 = vpop.permute.xlu1 %1581  ;;  %v6330_v51 = vpop.permute.xlu0 %1575 }
 0x1a7   : > { %vm1622_vm4 = vcmp.eq.s32.totalorder %v6325_v48, %v6330_v51  ;;  %vm1624_vm5 = vcmp.eq.s32.totalorder %v6325_v48, %v6328_v50 }
 0x1a8   : > { %5005 = vmatprep.mubr.msk.f32.mxu0 %vm1622_vm4, %v5976_v54 }
 0x1aa   : > { %v6347_v58 = vpop.permute.xlu1 %1584  ;;  %v6349_v59 = vpop.permute.xlu0 %1578 }
 0x1ab   : > { %vm1623_vm6 = vcmp.eq.s32.totalorder %v6325_v48, %v6349_v59  ;;  %vm1625_vm7 = vcmp.eq.s32.totalorder %v6325_v48, %v6347_v58 }
 0x1ac   : > { %5006 = vmatmul.mubr.msk.f32.vlgmr.msra.gmra.mrb[0].mxu0 %vm1623_vm6, %v5976_v54 }
 0x1ad   : > { %5008 = vmatprep.mubr.msk.f32.mxu0 %vm1624_vm5, %v5976_v54  ;;  %5564 = vmatpush3.bf16.msra.mxu0 %v6279_v20 }
 0x1ae   : > { %v6365_v4 = vpop.permute.xlu1 %1590  ;;  %v6367_v5 = vpop.permute.xlu0 %1587  ;;  %5566 = vmatprep.subr.bf16.mxu0 %v5565_v60 }
 0x1af   : > { %vm1626_vm8 = vcmp.eq.s32.totalorder %v6325_v48, %v6367_v5  ;;  %vm1627_vm9 = vcmp.eq.s32.totalorder %v6325_v48, %v6365_v4 }
 0x1b0   : > { %5009 = vmatmul.mubr.msk.f32.gmra.mrb[2].mxu0 %vm1625_vm7, %v5976_v54 }
 0x1b1   : > { %5011 = vmatprep.mubr.msk.f32.mxu0 %vm1626_vm8, %v5976_v54  ;;  %5568 = vmatpush3.bf16.msra.mxu0 %v5565_v60 }
 0x1b2   : > { %v6381_v12 = vpop.permute.xlu1 %1596  ;;  %v6383_v13 = vpop.permute.xlu0 %1593  ;;  %5570 = vmatprep.subr.bf16.mxu0 %v5569_v6 }
 0x1b3   : > { %vm1628_vm10 = vcmp.eq.s32.totalorder %v6325_v48, %v6383_v13  ;;  %vm1629_vm11 = vcmp.eq.s32.totalorder %v6325_v48, %v6381_v12 }
 0x1b4   : > { %5012 = vmatmul.mubr.msk.f32.gmra.mrb[4].mxu0 %vm1627_vm9, %v5976_v54 }
 0x1b5   : > { %5014 = vmatprep.mubr.msk.f32.mxu0 %vm1628_vm10, %v5976_v54  ;;  %5572 = vmatpush3.bf16.msra.mxu0 %v5569_v6  ;;  %v5601_v6 = vpack.c.bf16 %v2222_v0, %v2221_v63 }
 0x1b6   : > { %v6397_v20 = vpop.permute.xlu1 %1602  ;;  %v6399_v21 = vpop.permute.xlu0 %1599  ;;  %5574 = vmatprep.subr.bf16.mxu0 %v5573_v14 }
 0x1b7   : > { %vm1630_vm12 = vcmp.eq.s32.totalorder %v6325_v48, %v6399_v21  ;;  %vm1631_vm13 = vcmp.eq.s32.totalorder %v6325_v48, %v6397_v20 }
 0x1b8   : > { %5015 = vmatmul.mubr.msk.f32.gmra.mrb[6].mxu0 %vm1629_vm11, %v5976_v54 }
 0x1b9   : > { %5017 = vmatprep.mubr.msk.f32.mxu0 %vm1630_vm12, %v5976_v54  ;;  %5576 = vmatpush3.bf16.msra.mxu0 %v5573_v14 }
 0x1ba   : > { %v6413_v28 = vpop.permute.xlu1 %1608  ;;  %v6415_v29 = vpop.permute.xlu0 %1605  ;;  %5578 = vmatprep.subr.bf16.mxu0 %v5577_v22 }
 0x1bb   : > { %vm1632_vm14 = vcmp.eq.s32.totalorder %v6325_v48, %v6415_v29  ;;  %vm1633_vm15 = vcmp.eq.s32.totalorder %v6325_v48, %v6413_v28 }
 0x1bc   : > { %5018 = vmatmul.mubr.msk.f32.gmra.mrb[8].mxu0 %vm1631_vm13, %v5976_v54 }
 0x1bd   : > { %5020 = vmatprep.mubr.msk.f32.mxu0 %vm1632_vm14, %v5976_v54  ;;  %5580 = vmatpush3.bf16.msra.mxu0 %v5577_v22 }
 0x1be   : > { %v6423_v34 = vpop.permute.xlu1 %1614  ;;  %v6425_v35 = vpop.permute.xlu0 %1611  ;;  %5582 = vmatprep.subr.bf16.mxu0 %v5581_v30 }
 0x1bf   : > { %vm1634_vm0 = vcmp.eq.s32.totalorder %v6325_v48, %v6425_v35  ;;  %vm1635_vm1 = vcmp.eq.s32.totalorder %v6325_v48, %v6423_v34 }
 0x1c0   : > { %5021 = vmatmul.mubr.msk.f32.gmra.mrb[10].mxu0 %vm1633_vm15, %v5976_v54 }
 0x1c1   : > { %5023 = vmatprep.mubr.msk.f32.mxu0 %vm1634_vm0, %v5976_v54  ;;  %5584 = vmatpush3.bf16.msra.mxu0 %v5581_v30 }
 0x1c2   : > { %v6436_v40 = vpop.permute.xlu1 %1620  ;;  %v6438_v41 = vpop.permute.xlu0 %1617  ;;  %5586 = vmatprep.subr.bf16.mxu0 %v5585_v36 }
 0x1c3   : > { %vm2136_vm2 = vcmp.eq.s32.totalorder %v6433_v39, %v6436_v40  ;;  %vm1636_vm3 = vcmp.eq.s32.totalorder %v6325_v48, %v6438_v41  ;;  %vm1637_vm4 = vcmp.eq.s32.totalorder %v6325_v48, %v6436_v40  ;;  %v2601_v40 = vld [vmem:[%s7279_s11 + $0x70] sm:$0xff] }
 0x1c4   : > { %5024 = vmatmul.mubr.msk.f32.gmra.mrb[12].mxu0 %vm1635_vm1, %v5976_v54 }
 0x1c5   : > { %5026 = vmatprep.mubr.msk.f32.mxu0 %vm1636_vm3, %v5976_v54  ;;  %5588 = vmatpush3.bf16.msra.mxu0 %v5585_v36 }
 0x1c6   : > { %v6448_v45 = vpop.permute.xlu1 %1674  ;;  %v6450_v46 = vpop.permute.xlu0 %1671  ;;  %5590 = vmatprep.subr.bf16.mxu0 %v5589_v42 }
 0x1c7   : > { %vm1718_vm5 = vcmp.eq.s32.totalorder %v6325_v48, %v6450_v46  ;;  %vm2169_vm6 = vcmp.eq.s32.totalorder %v6433_v39, %v6450_v46  ;;  %vm2170_vm7 = vcmp.eq.s32.totalorder %v6433_v39, %v6448_v45  ;;  %vm1719_vm8 = vcmp.eq.s32.totalorder %v6325_v48, %v6448_v45 }
 0x1c8   : > { %5027 = vmatmul.mubr.msk.f32.gmra.mrb[14].mxu0 %vm1637_vm4, %v5976_v54  ;;  %v4344_v52 = vsel %vm2169_vm6, 1.0, %v5977_v49  ;;  %v4280_v53 = vsel %vm1718_vm5, 1.0, %v5977_v49  ;;  %v4345_v62 = vsel %vm2170_vm7, 1.0, %v5977_v49  ;;  %v4281_v1 = vsel %vm1719_vm8, 1.0, %v5977_v49 }
 0x1c9   : > { %5592 = vmatpush3.bf16.msra.mxu0 %v5589_v42  ;;  %2980 = vxpose.xlu1.b32.start [1/16] %v4344_v52, 128  ;;  %v2600_v52 = vld [vmem:[%s7279_s11 + $0x68] sm:$0xff] }
 0x1ca   : > { %5061 = vmatprep.mubr.msk.f32.mxu0 %vm1718_vm5, %v5976_v54  ;;  %2755 = vxpose.xlu0.b32.start [1/16] %v4280_v53, 128  ;;  %v6469_v57 = vpop.permute.xlu1 %1680  ;;  %v6471_v60 = vpop.permute.xlu0 %1677  ;;  %v5617_v53 = vpack.c.bf16 %v2230_v38, %v2229_v37  ;;  %v2241_v37 = vld [vmem:[#allocation3 + $0xc0] sm:$0xff]  ;;  %v2242_v38 = vld [vmem:[#allocation3 + $0xc8] sm:$0xff] }
 0x1cb   : > { %vm1720_vm9 = vcmp.eq.s32.totalorder %v6325_v48, %v6471_v60  ;;  %5594 = vmatprep.subr.bf16.mxu0 %v5593_v47  ;;  %vm2171_vm10 = vcmp.eq.s32.totalorder %v6433_v39, %v6471_v60  ;;  %vm1721_vm11 = vcmp.eq.s32.totalorder %v6325_v48, %v6469_v57  ;;  %vm7288_vm13 = vcmp.eq.s32.totalorder %v6433_v39, %v6469_v57 }
 0x1cc   : > { %5062 = vmatmul.mubr.msk.f32.vlgmr.msra.gmra.mrb[0].mxu0 %vm1719_vm8, %v5976_v54  ;;  %v4346_v7 = vsel %vm2171_vm10, 1.0, %v5977_v49  ;;  %v4282_v10 = vsel %vm1720_vm9, 1.0, %v5977_v49  ;;  %v4347_v16 = vsel %vm7288_vm13, 1.0, %v5977_v49  ;;  %v4283_v19 = vsel %vm1721_vm11, 1.0, %v5977_v49 }
 0x1cd   : > { %2981 = vxpose.xlu1.b32.cont [2/16] %v4345_v62, 128  ;;  %5596 = vmatpush3.bf16.msra.mxu0 %v5593_v47  ;;  %v2599_v47 = vld [vmem:[%s7279_s11 + $0x60] sm:$0xff]  ;;  %vm2123_vm13 = vcmp.eq.s32.totalorder %v6433_v39, %v6328_v50 }
 0x1ce   : > { %2756 = vxpose.xlu0.b32.cont [2/16] %v4281_v1, 128  ;;  %5064 = vmatprep.mubr.msk.f32.mxu0 %vm1720_vm9, %v5976_v54  ;;  %v6487_v2 = vpop.permute.xlu1 %1686  ;;  %v6489_v3 = vpop.permute.xlu0 %1683  ;;  %v5681_v63 = vpack.c.bf16 %v2600_v52, %v2599_v47  ;;  %v2243_v47 = vld [vmem:[#allocation3 + $0xd0] sm:$0xff]  ;;  %v2244_v52 = vld [vmem:[#allocation3 + $0xd8] sm:$0xff] }
 0x1cf   : > { %vm1722_vm12 = vcmp.eq.s32.totalorder %v6325_v48, %v6489_v3  ;;  %5598 = vmatprep.subr.bf16.mxu0 %v5597_v61  ;;  %vm1723_vm14 = vcmp.eq.s32.totalorder %v6325_v48, %v6487_v2  ;;  %vm7286_vm0 = vcmp.eq.s32.totalorder %v6433_v39, %v6489_v3  ;;  %vm7284_vm4 = vcmp.eq.s32.totalorder %v6433_v39, %v6487_v2 }
 0x1d0   : > { %5065 = vmatmul.mubr.msk.f32.gmra.mrb[2].mxu0 %vm1721_vm11, %v5976_v54  ;;  %v4348_v25 = vsel %vm7286_vm0, 1.0, %v5977_v49  ;;  %v4284_v30 = vsel %vm1722_vm12, 1.0, %v5977_v49  ;;  %v4349_v36 = vsel %vm7284_vm4, 1.0, %v5977_v49  ;;  %v4285_v42 = vsel %vm1723_vm14, 1.0, %v5977_v49  ;;  %5682 = vmatprep.subr.bf16.mxu1 %v5681_v63 }
 0x1d1   : > { %5600 = vmatpush3.bf16.msra.mxu0 %v5597_v61  ;;  %2982 = vxpose.xlu1.b32.cont [3/16] %v4346_v7, 128  ;;  %v2232_v61 = vld [vmem:[#allocation2 + $0xf8] sm:$0xff] }
 0x1d2   : > { %2757 = vxpose.xlu0.b32.cont [3/16] %v4282_v10, 128  ;;  %5067 = vmatprep.mubr.msk.f32.mxu0 %vm1722_vm12, %v5976_v54  ;;  %v6513_v11 = vpop.permute.xlu1 %1692  ;;  %v6515_v14 = vpop.permute.xlu0 %1689  ;;  %v5621_v1 = vpack.c.bf16 %v2232_v61, %v2231_v56  ;;  %v2246_v56 = vld [vmem:[#allocation3 + $0xe8] sm:$0xff] }
 0x1d3   : > { %vm1724_vm15 = vcmp.eq.s32.totalorder %v6325_v48, %v6515_v14  ;;  %5602 = vmatprep.subr.bf16.mxu0 %v5601_v6  ;;  %vm1725_vm1 = vcmp.eq.s32.totalorder %v6325_v48, %v6513_v11  ;;  %vm7283_vm9 = vcmp.eq.s32.totalorder %v6433_v39, %v6515_v14  ;;  %5684 = vmatpush3.bf16.msra.mxu1 %v5681_v63  ;;  %v2248_v63 = vld [vmem:[#allocation3 + $0xf8] sm:$0xff] }
 0x1d4   : > { %5068 = vmatmul.mubr.msk.f32.gmra.mrb[4].mxu0 %vm1723_vm14, %v5976_v54  ;;  %v4350_v55 = vsel %vm7283_vm9, 1.0, %v5977_v49  ;;  %vm7285_vm14 = vcmp.eq.s32.totalorder %v6433_v39, %v6513_v11  ;;  %v4286_v62 = vsel %vm1724_vm15, 1.0, %v5977_v49  ;;  %v4287_v10 = vsel %vm1725_vm1, 1.0, %v5977_v49 }
 0x1d5   : > { %5604 = vmatpush3.bf16.msra.mxu0 %v5601_v6  ;;  %2983 = vxpose.xlu1.b32.cont [4/16] %v4347_v16, 128  ;;  %v4351_v6 = vsel %vm7285_vm14, 1.0, %v5977_v49 }
 0x1d6   : > { %2758 = vxpose.xlu0.b32.cont [4/16] %v4283_v19, 128  ;;  %5070 = vmatprep.mubr.msk.f32.mxu0 %vm1724_vm15, %v5976_v54  ;;  %v6539_v22 = vpop.permute.xlu1 %1698  ;;  %v6541_v23 = vpop.permute.xlu0 %1695 }
 0x1d7   : > { %vm1726_vm3 = vcmp.eq.s32.totalorder %v6325_v48, %v6541_v23  ;;  %5606 = vmatprep.subr.bf16.mxu0 %v5605_v15  ;;  %vm1727_vm5 = vcmp.eq.s32.totalorder %v6325_v48, %v6539_v22  ;;  %vm7287_vm15 = vcmp.eq.s32.totalorder %v6433_v39, %v6541_v23  ;;  %vm2178_vm0 = vcmp.eq.s32.totalorder %v6433_v39, %v6539_v22 }
 0x1d8   : > { %5071 = vmatmul.mubr.msk.f32.gmra.mrb[6].mxu0 %vm1725_vm1, %v5976_v54  ;;  %v4352_v16 = vsel %vm7287_vm15, 1.0, %v5977_v49  ;;  %vm2121_vm1 = vcmp.eq.s32.totalorder %v6433_v39, %v6330_v51  ;;  %v4288_v19 = vsel %vm1726_vm3, 1.0, %v5977_v49  ;;  %vm2122_vm15 = vcmp.eq.s32.totalorder %v6433_v39, %v6349_v59 }
 0x1d9   : > { %5608 = vmatpush3.bf16.msra.mxu0 %v5605_v15  ;;  %2984 = vxpose.xlu1.b32.cont [5/16] %v4348_v25, 128  ;;  %v5625_v15 = vpack.c.bf16 %v2234_v9, %v2233_v8  ;;  %v4353_v51 = vsel %vm2178_vm0, 1.0, %v5977_v49  ;;  %v2237_v25 = vld [vmem:[#allocation3 + $0xa0] sm:$0xff]  ;;  %v4289_v27 = vsel %vm1727_vm5, 1.0, %v5977_v49 }
 0x1da   : > { %2759 = vxpose.xlu0.b32.cont [5/16] %v4284_v30, 128  ;;  %5073 = vmatprep.mubr.msk.f32.mxu0 %vm1726_vm3, %v5976_v54  ;;  %v6565_v31 = vpop.permute.xlu1 %1704  ;;  %v6567_v32 = vpop.permute.xlu0 %1701  ;;  %v5633_v50 = vpack.c.bf16 %v2238_v26, %v2237_v25  ;;  %v2239_v30 = vld [vmem:[#allocation3 + $0xb0] sm:$0xff] }
 0x1db   : > { %vm1728_vm8 = vcmp.eq.s32.totalorder %v6325_v48, %v6567_v32  ;;  %5610 = vmatprep.subr.bf16.mxu0 %v5609_v24  ;;  %vm1729_vm11 = vcmp.eq.s32.totalorder %v6325_v48, %v6565_v31  ;;  %vm2179_vm3 = vcmp.eq.s32.totalorder %v6433_v39, %v6567_v32 }
 0x1dc   : > { %5074 = vmatmul.mubr.msk.f32.gmra.mrb[8].mxu0 %vm1727_vm5, %v5976_v54  ;;  %v4354_v59 = vsel %vm2179_vm3, 1.0, %v5977_v49  ;;  %vm2126_vm5 = vcmp.eq.s32.totalorder %v6433_v39, %v6365_v4  ;;  %v5641_v4 = vpack.c.bf16 %v2242_v38, %v2241_v37 }
 0x1dd   : > { %5612 = vmatpush3.bf16.msra.mxu0 %v5609_v24  ;;  %2985 = vxpose.xlu1.b32.cont [6/16] %v4349_v36, 128  ;;  %v5629_v24 = vpack.c.bf16 %v2236_v18, %v2235_v17 }
 0x1de   : > { %2760 = vxpose.xlu0.b32.cont [6/16] %v4285_v42, 128  ;;  %5076 = vmatprep.mubr.msk.f32.mxu0 %vm1728_vm8, %v5976_v54  ;;  %v6591_v43 = vpop.permute.xlu1 %1710  ;;  %v6593_v44 = vpop.permute.xlu0 %1707  ;;  %v4291_v42 = vsel %vm1729_vm11, 1.0, %v5977_v49 }
 0x1df   : > { %vm1730_vm12 = vcmp.eq.s32.totalorder %v6325_v48, %v6593_v44  ;;  %5614 = vmatprep.subr.bf16.mxu0 %v5613_v33  ;;  %vm1731_vm9 = vcmp.eq.s32.totalorder %v6325_v48, %v6591_v43 }
 0x1e0   : > { %5077 = vmatmul.mubr.msk.f32.gmra.mrb[10].mxu0 %vm1729_vm11, %v5976_v54  ;;  %vm2182_vm11 = vcmp.eq.s32.totalorder %v6433_v39, %v6591_v43  ;;  %v4293_v61 = vsel %vm1731_vm9, 1.0, %v5977_v49  ;;  %v6859_v43 = vld [vmem:[%s7278_s10] ss:$0 sm:$0xff] }
 0x1e1   : > { %5616 = vmatpush3.bf16.msra.mxu0 %v5613_v33  ;;  %2986 = vxpose.xlu1.b32.cont [7/16] %v4350_v55, 128  ;;  %v2240_v33 = vld [vmem:[#allocation3 + $0xb8] sm:$0xff]  ;;  %v2245_v55 = vld [vmem:[#allocation3 + $0xe0] sm:$0xff] }
 0x1e2   : > { %2761 = vxpose.xlu0.b32.cont [7/16] %v4286_v62, 128  ;;  %5079 = vmatprep.mubr.msk.f32.mxu0 %vm1730_vm12, %v5976_v54  ;;  %v6623_v0 = vpop.permute.xlu0 %1713  ;;  %v6633_v7 = vpop.permute.xlu1 %1716  ;;  %v2247_v62 = vld [vmem:[#allocation3 + $0xf0] sm:$0xff] }
 0x1e3   : > { %vm1732_vm4 = vcmp.eq.s32.totalorder %v6325_v48, %v6623_v0  ;;  %5618 = vmatprep.subr.bf16.mxu0 %v5617_v53  ;;  %vm1733_vm14 = vcmp.eq.s32.totalorder %v6325_v48, %v6633_v7 }
 0x1e4   : > { %5080 = vmatmul.mubr.msk.f32.gmra.mrb[12].mxu0 %vm1731_vm9, %v5976_v54  ;;  %vm2184_vm9 = vcmp.eq.s32.totalorder %v6433_v39, %v6633_v7 }
 0x1e5   : > { %5620 = vmatpush3.bf16.msra.mxu0 %v5617_v53  ;;  %2987 = vxpose.xlu1.b32.cont [8/16] %v4351_v6, 128  ;;  %v4357_v53 = vsel %vm2182_vm11, 1.0, %v5977_v49  ;;  %v4295_v6 = vsel %vm1733_vm14, 1.0, %v5977_v49 }
 0x1e6   : > { %2762 = vxpose.xlu0.b32.cont [8/16] %v4287_v10, 128  ;;  %5082 = vmatprep.mubr.msk.f32.mxu0 %vm1732_vm4, %v5976_v54 }
 0x1e7   : > { %5622 = vmatprep.subr.bf16.mxu0 %v5621_v1 }
 0x1e8   : > { %5083 = vmatmul.mubr.msk.f32.gmra.mrb[14].mxu0 %vm1733_vm14, %v5976_v54  ;;  %vm7294_vm14 = vcmp.eq.s32.totalorder %v6433_v39, %v6541_v23 }
 0x1e9   : > { %5624 = vmatpush3.bf16.msra.mxu0 %v5621_v1  ;;  %2988 = vxpose.xlu1.b32.cont [9/16] %v4352_v16, 128  ;;  %v4359_v1 = vsel %vm2184_vm9, 1.0, %v5977_v49 }
 0x1ea   : > { %2763 = vxpose.xlu0.b32.cont [9/16] %v4288_v19, 128  ;;  %5117 = vmatprep.mubr.msk.f32.mxu0 %vm2121_vm1, %v5976_v54  ;;  %vm2124_vm1 = vcmp.eq.s32.totalorder %v6433_v39, %v6347_v58  ;;  %v4290_v58 = vsel %vm1728_vm8, 1.0, %v5977_v49  ;;  %vm2181_vm8 = vcmp.eq.s32.totalorder %v6433_v39, %v6593_v44 }
 0x1eb   : > { %5626 = vmatprep.subr.bf16.mxu0 %v5625_v15 }
 0x1ec   : > { %5118 = vmatmul.mubr.msk.f32.vlgmr.msra.gmra.mrb[0].mxu0 %vm2122_vm15, %v5976_v54  ;;  %vm2125_vm15 = vcmp.eq.s32.totalorder %v6433_v39, %v6367_v5  ;;  %v5637_v5 = vpack.c.bf16 %v2240_v33, %v2239_v30 }
 0x1ed   : > { %2989 = vxpose.xlu1.b32.cont [10/16] %v4353_v51, 128  ;;  %5120 = vmatprep.mubr.msk.f32.mxu0 %vm2123_vm13, %v5976_v54  ;;  %vm2180_vm13 = vcmp.eq.s32.totalorder %v6433_v39, %v6565_v31 }
 0x1ee   : > { %2764 = vxpose.xlu0.b32.cont [10/16] %v4289_v27, 128  ;;  %5628 = vmatpush3.bf16.msra.mxu0 %v5625_v15  ;;  %v4355_v36 = vsel %vm2180_vm13, 1.0, %v5977_v49 }
 0x1ef   : > { %5630 = vmatprep.subr.bf16.mxu0 %v5629_v24 }
 0x1f0   : > { %5121 = vmatmul.mubr.msk.f32.gmra.mrb[2].mxu0 %vm2124_vm1, %v5976_v54  ;;  %vm2127_vm1 = vcmp.eq.s32.totalorder %v6433_v39, %v6383_v13  ;;  %v4356_v13 = vsel %vm2181_vm8, 1.0, %v5977_v49 }
 0x1f1   : > { %2990 = vxpose.xlu1.b32.cont [11/16] %v4354_v59, 128  ;;  %5123 = vmatprep.mubr.msk.f32.mxu0 %vm2125_vm15, %v5976_v54  ;;  %vm2128_vm15 = vcmp.eq.s32.totalorder %v6433_v39, %v6381_v12  ;;  %v4292_v12 = vsel %vm1730_vm12, 1.0, %v5977_v49  ;;  %vm2183_vm12 = vcmp.eq.s32.totalorder %v6433_v39, %v6623_v0 }
 0x1f2   : > { %2765 = vxpose.xlu0.b32.cont [11/16] %v4290_v58, 128  ;;  %5632 = vmatpush3.bf16.msra.mxu0 %v5629_v24 }
 0x1f3   : > { %5634 = vmatprep.subr.bf16.mxu0 %v5633_v50 }
 0x1f4   : > { %5124 = vmatmul.mubr.msk.f32.gmra.mrb[4].mxu0 %vm2126_vm5, %v5976_v54  ;;  %vm2129_vm5 = vcmp.eq.s32.totalorder %v6433_v39, %v6399_v21  ;;  %v5645_v21 = vpack.c.bf16 %v2244_v52, %v2243_v47 }
 0x1f5   : > { %2991 = vxpose.xlu1.b32.cont [12/16] %v4355_v36, 128  ;;  %5126 = vmatprep.mubr.msk.f32.mxu0 %vm2127_vm1, %v5976_v54  ;;  %vm2130_vm1 = vcmp.eq.s32.totalorder %v6433_v39, %v6397_v20  ;;  %v5649_v20 = vpack.c.bf16 %v2246_v56, %v2245_v55 }
 0x1f6   : > { %2766 = vxpose.xlu0.b32.cont [12/16] %v4291_v42, 128  ;;  %5636 = vmatpush3.bf16.msra.mxu0 %v5633_v50 }
 0x1f7   : > { %5638 = vmatprep.subr.bf16.mxu0 %v5637_v5 }
 0x1f8   : > { %5127 = vmatmul.mubr.msk.f32.gmra.mrb[6].mxu0 %vm2128_vm15, %v5976_v54  ;;  %vm2131_vm15 = vcmp.eq.s32.totalorder %v6433_v39, %v6415_v29  ;;  %v4358_v29 = vsel %vm2183_vm12, 1.0, %v5977_v49 }
 0x1f9   : > { %2992 = vxpose.xlu1.b32.cont [13/16] %v4356_v13, 128  ;;  %5129 = vmatprep.mubr.msk.f32.mxu0 %vm2129_vm5, %v5976_v54  ;;  %vm2132_vm5 = vcmp.eq.s32.totalorder %v6433_v39, %v6413_v28  ;;  %v4294_v28 = vsel %vm1732_vm4, 1.0, %v5977_v49  ;;  %vm7291_vm4 = vcmp.eq.s32.totalorder %v6433_v39, %v6487_v2 }
 0x1fa   : > { %2767 = vxpose.xlu0.b32.cont [13/16] %v4292_v12, 128  ;;  %5640 = vmatpush3.bf16.msra.mxu0 %v5637_v5 }
 0x1fb   : > { %5642 = vmatprep.subr.bf16.mxu0 %v5641_v4 }
 0x1fc   : > { %5130 = vmatmul.mubr.msk.f32.gmra.mrb[8].mxu0 %vm2130_vm1, %v5976_v54  ;;  %vm2133_vm1 = vcmp.eq.s32.totalorder %v6433_v39, %v6425_v35  ;;  %v5653_v35 = vpack.c.bf16 %v2248_v63, %v2247_v62 }
 0x1fd   : > { %2993 = vxpose.xlu1.b32.cont [14/16] %v4357_v53, 128  ;;  %5132 = vmatprep.mubr.msk.f32.mxu0 %vm2131_vm15, %v5976_v54  ;;  %vm2134_vm15 = vcmp.eq.s32.totalorder %v6433_v39, %v6423_v34 }
 0x1fe   : > { %2768 = vxpose.xlu0.b32.cont [14/16] %v4293_v61, 128  ;;  %5644 = vmatpush3.bf16.msra.mxu0 %v5641_v4 }
 0x1ff   : > { %5646 = vmatprep.subr.bf16.mxu0 %v5645_v21 }
 0x200   : > { %5133 = vmatmul.mubr.msk.f32.gmra.mrb[10].mxu0 %vm2132_vm5, %v5976_v54  ;;  %vm2135_vm5 = vcmp.eq.s32.totalorder %v6433_v39, %v6438_v41  ;;  %v2602_v41 = vld [vmem:[%s7279_s11 + $0x78] sm:$0xff] }
 0x201   : > { %2994 = vxpose.xlu1.b32.cont [15/16] %v4358_v29, 128  ;;  %5135 = vmatprep.mubr.msk.f32.mxu0 %vm2133_vm1, %v5976_v54  ;;  %v5685_v46 = vpack.c.bf16 %v2602_v41, %v2601_v40 }
 0x202   : > { %5648 = vmatpush3.bf16.msra.mxu0 %v5645_v21  ;;  %2769 = vxpose.xlu0.b32.cont [15/16] %v4294_v28, 128 }
 0x203   : > { %5650 = vmatprep.subr.bf16.mxu0 %v5649_v20  ;;  %5686 = vmatprep.subr.bf16.mxu1 %v5685_v46 }
 0x204   : > { %5136 = vmatmul.mubr.msk.f32.gmra.mrb[12].mxu0 %vm2134_vm15, %v5976_v54  ;;  %5688 = vmatpush3.bf16.msra.mxu1 %v5685_v46 }
 0x205   : > { %2995 = vxpose.xlu1.b32.end [16/16] %v4359_v1, 128  ;;  %5138 = vmatprep.mubr.msk.f32.mxu0 %vm2135_vm5, %v5976_v54 }
 0x206   : > { %5652 = vmatpush3.bf16.msra.mxu0 %v5649_v20  ;;  %2770 = vxpose.xlu0.b32.end [16/16] %v4295_v6, 128 }
 0x207   : > { %5654 = vmatprep.subr.bf16.mxu0 %v5653_v35 }
 0x208   : > { %5139 = vmatmul.mubr.msk.f32.gmra.mrb[14].mxu0 %vm2136_vm2, %v5976_v54  ;;  %vm7289_vm2 = vcmp.eq.s32.totalorder %v6433_v39, %v6469_v57 }
 0x209   : > { %5173 = vmatprep.mubr.msk.f32.mxu0 %vm2169_vm6, %v5976_v54  ;;  %vm7290_vm6 = vcmp.eq.s32.totalorder %v6433_v39, %v6489_v3 }
 0x20a   : > { %5656 = vmatpush3.bf16.msra.mxu0 %v5653_v35 }
 0x20c   : > { %v4951_v48 = vpop.f32.mrb[0].mxu1 }
 0x20d   : > { %5174 = vmatmul.mubr.msk.f32.vlgmr.msra.gmra.mrb[0].mxu0 %vm2170_vm7, %v5976_v54  ;;  %vm7292_vm7 = vcmp.eq.s32.totalorder %v6433_v39, %v6515_v14  ;;  %v1493_v34 = vpop.f32.mrb[1].mxu1  ;;  %v1499_v44 = vadd.f32 %v4951_v48, %v6859_v43 }
 0x20e   : > { %5176 = vmatprep.mubr.msk.f32.mxu0 %vm2171_vm10, %v5976_v54  ;;  %vm7293_vm10 = vcmp.eq.s32.totalorder %v6433_v39, %v6513_v11  ;;  %v1494_v0 = vadd.f32 %v6859_v43, %v1493_v34 }
 0x210   : > { %v4954_v45 = vpop.f32.mrb[2].mxu1 }
 0x211   : > { %5177 = vmatmul.mubr.msk.f32.gmra.mrb[2].mxu0 %vm7289_vm2, %v5976_v54  ;;  %v1503_v49 = vpop.f32.mrb[3].mxu1  ;;  %v1509_v9 = vadd.f32 %v4954_v45, %v6859_v43 }
 0x212   : > { %5179 = vmatprep.mubr.msk.f32.mxu0 %vm7290_vm6, %v5976_v54  ;;  %v1504_v16 = vadd.f32 %v6859_v43, %v1503_v49 }
 0x214   : > { %v4957_v57 = vpop.f32.mrb[4].mxu1 }
 0x215   : > { %5180 = vmatmul.mubr.msk.f32.gmra.mrb[4].mxu0 %vm7291_vm4, %v5976_v54  ;;  %v1513_v60 = vpop.f32.mrb[5].mxu1  ;;  %v1519_v51 = vadd.f32 %v4957_v57, %v6859_v43 }
 0x216   : > { %5182 = vmatprep.mubr.msk.f32.mxu0 %vm7292_vm7, %v5976_v54  ;;  %v1514_v27 = vadd.f32 %v6859_v43, %v1513_v60 }
 0x218   : > { %v4960_v2 = vpop.f32.mrb[6].mxu1 }
 0x219   : > { %5183 = vmatmul.mubr.msk.f32.gmra.mrb[6].mxu0 %vm7293_vm10, %v5976_v54  ;;  %v1523_v39 = vpop.f32.mrb[7].mxu1  ;;  %v1529_v58 = vadd.f32 %v4960_v2, %v6859_v43 }
 0x21a   : > { %5185 = vmatprep.mubr.msk.f32.mxu0 %vm7294_vm14, %v5976_v54  ;;  %v1524_v37 = vadd.f32 %v6859_v43, %v1523_v39 }
 0x21d   : > { %5186 = vmatmul.mubr.msk.f32.gmra.mrb[8].mxu0 %vm2178_vm0, %v5976_v54  ;;  %vm3298_vm0 = vcmask (!%p4393_p5), 1043456  }
 0x21e   : > { %5188 = vmatprep.mubr.msk.f32.mxu0 %vm2179_vm3, %v5976_v54  ;;  %vm3249_vm3 = vcmask (!%p4393_p5), 31744  }
 0x221   : > { %5189 = vmatmul.mubr.msk.f32.gmra.mrb[10].mxu0 %vm2180_vm13, %v5976_v54 }
 0x222   : > { %5191 = vmatprep.mubr.msk.f32.mxu0 %vm2181_vm8, %v5976_v54 }
 0x225   : > { %5192 = vmatmul.mubr.msk.f32.gmra.mrb[12].mxu0 %vm2182_vm11, %v5976_v54 }
 0x226   : > { %5194 = vmatprep.mubr.msk.f32.mxu0 %vm2183_vm12, %v5976_v54 }
 0x229   : > { %5195 = vmatmul.mubr.msk.f32.gmra.mrb[14].mxu0 %vm2184_vm9, %v5976_v54  ;;  %v4963_v54 = vpop.f32.mrb[8].mxu1 }
 0x22a   : > { %v1533_v3 = vpop.f32.mrb[9].mxu1  ;;  %v1539_v47 = vadd.f32 %v4963_v54, %v6859_v43 }
 0x22b   : > { %v4966_v11 = vpop.f32.mrb[10].mxu1  ;;  %v1534_v21 = vadd.f32 %v6859_v43, %v1533_v3 }
 0x22c   : > { %v1543_v14 = vpop.f32.mrb[11].mxu1  ;;  %v1549_v20 = vadd.f32 %v4966_v11, %v6859_v43 }
 0x22d   : > { %v4969_v22 = vpop.f32.mrb[12].mxu1  ;;  %v1544_v63 = vadd.f32 %v6859_v43, %v1543_v14 }
 0x22e   : > { %v1553_v23 = vpop.f32.mrb[13].mxu1  ;;  %v1559_v48 = vadd.f32 %v4969_v22, %v6859_v43 }
 0x22f   : > { %v6852_v31 = vpop.f32.mrb[14].mxu1  ;;  %v1554_v41 = vadd.f32 %v6859_v43, %v1553_v23 }
 0x230   : > { %v6854_v32 = vpop.f32.mrb[15].mxu1  ;;  %v1569_v60 = vadd.f32 %v6852_v31, %v6859_v43 }
 0x231   : > { %v1564_v54 = vadd.f32 %v6859_v43, %v6854_v32 }
 0x24a   : > { %v2771_v31 = vpop.trf.xlu0 }
 0x2e0   : > { %v5175_v7 = vpop.f32.mrb[0].mxu0 }
 0x2e1   : > { %v5818_v8 = vadd.f32 %v5175_v7, %v1499_v44  ;;  %v2476_v10 = vpop.f32.mrb[1].mxu0 }
 0x2e2   : > { %v5820_v15 = vadd.f32 %v2476_v10, %v1494_v0  ;;  %v4392_v10 = vld [vmem:[%s7280_s12] ss:$0 sm:$0xff] }
 0x2e3   : > { %v2572_v19 = vmax.f32 %v5818_v8, 0.0  ;;  %v6879_v8 = vpop.trf.xlu0 }
 0x2e4   : > { %v2571_v17 = vmax.f32 %v5820_v15, 0.0  ;;  %v5178_v18 = vpop.f32.mrb[2].mxu0 }
 0x2e5   : > { %v5822_v24 = vadd.f32 %v5178_v18, %v1509_v9  ;;  %v2486_v25 = vpop.f32.mrb[3].mxu0 }
 0x2e6   : > { %v5824_v26 = vadd.f32 %v2486_v25, %v1504_v16  ;;  %5229 = vmatprep.mubr.f32.mxu1 %v2571_v17 }
 0x2e7   : > { %5230 = vmatmul.mubr.f32.vlgmr.msra.gmra.mrb[16].mxu1 %v2572_v19  ;;  %v2574_v30 = vmax.f32 %v5822_v24, 0.0  ;;  %v6881_v9 = vpop.trf.xlu0 }
 0x2e8   : > { %v2573_v50 = vmax.f32 %v5824_v26, 0.0  ;;  %v5181_v59 = vpop.f32.mrb[4].mxu0 }
 0x2e9   : > { %v5826_v33 = vadd.f32 %v5181_v59, %v1519_v51  ;;  %v2496_v5 = vpop.f32.mrb[5].mxu0 }
 0x2ea   : > { %v5828_v36 = vadd.f32 %v2496_v5, %v1514_v27  ;;  %5232 = vmatprep.mubr.f32.mxu1 %v2573_v50  ;;  %v6894_v27 = vpop.trf.xlu1 }
 0x2eb   : > { %5233 = vmatmul.mubr.f32.gmra.mrb[18].mxu1 %v2574_v30  ;;  %v2576_v4 = vmax.f32 %v5826_v33, 0.0  ;;  %v6883_v32 = vpop.trf.xlu0 }
 0x2ec   : > { %v2575_v38 = vmax.f32 %v5828_v36, 0.0  ;;  %v5184_v42 = vpop.f32.mrb[6].mxu0 }
 0x2ed   : > { %v5830_v13 = vadd.f32 %v5184_v42, %v1529_v58  ;;  %v2506_v52 = vpop.f32.mrb[7].mxu0 }
 0x2ee   : > { %v5832_v12 = vadd.f32 %v2506_v52, %v1524_v37  ;;  %5235 = vmatprep.mubr.f32.mxu1 %v2575_v38  ;;  %v6904_v37 = vpop.trf.xlu1 }
 0x2ef   : > { %5236 = vmatmul.mubr.f32.gmra.mrb[20].mxu1 %v2576_v4  ;;  %v2578_v56 = vmax.f32 %v5830_v13, 0.0  ;;  %v6885_v43 = vpop.trf.xlu0 }
 0x2f0   : > { %v2577_v53 = vmax.f32 %v5832_v12, 0.0  ;;  %v5187_v55 = vpop.f32.mrb[8].mxu0 }
 0x2f1   : > { %v5834_v61 = vadd.f32 %v5187_v55, %v1539_v47  ;;  %v2516_v29 = vpop.f32.mrb[9].mxu0 }
 0x2f2   : > { %v5836_v62 = vadd.f32 %v2516_v29, %v1534_v21  ;;  %5238 = vmatprep.mubr.f32.mxu1 %v2577_v53 }
 0x2f3   : > { %5239 = vmatmul.mubr.f32.gmra.mrb[22].mxu1 %v2578_v56  ;;  %v2580_v1 = vmax.f32 %v5834_v61, 0.0  ;;  %v6890_v19 = vpop.trf.xlu0  ;;  %v6906_v56 = vpop.trf.xlu1 }
 0x2f4   : > { %v2579_v28 = vmax.f32 %v5836_v62, 0.0  ;;  %v5190_v35 = vpop.f32.mrb[10].mxu0 }
 0x2f5   : > { %v5838_v6 = vadd.f32 %v5190_v35, %v1549_v20  ;;  %v2526_v34 = vpop.f32.mrb[11].mxu0 }
 0x2f6   : > { %v5840_v40 = vadd.f32 %v2526_v34, %v1544_v63  ;;  %5241 = vmatprep.mubr.f32.mxu1 %v2579_v28 }
 0x2f7   : > { %5242 = vmatmul.mubr.f32.gmra.mrb[24].mxu1 %v2580_v1  ;;  %v2582_v49 = vmax.f32 %v5838_v6, 0.0  ;;  %v6900_v5 = vpop.trf.xlu0  ;;  %v6908_v1 = vpop.trf.xlu1 }
 0x2f8   : > { %v2581_v45 = vmax.f32 %v5840_v40, 0.0  ;;  %v5193_v46 = vpop.f32.mrb[12].mxu0 }
 0x2f9   : > { %v5842_v57 = vadd.f32 %v5193_v46, %v1559_v48  ;;  %v2536_v2 = vpop.f32.mrb[13].mxu0 }
 0x2fa   : > { %v5844_v39 = vadd.f32 %v2536_v2, %v1554_v41  ;;  %5244 = vmatprep.mubr.f32.mxu1 %v2581_v45 }
 0x2fb   : > { %5245 = vmatmul.mubr.f32.gmra.mrb[26].mxu1 %v2582_v49  ;;  %v2584_v14 = vmax.f32 %v5842_v57, 0.0  ;;  %v2778_v52 = vpop.trf.xlu0  ;;  %v3000_v2 = vpop.trf.xlu1 }
 0x2fc   : > { %v2583_v3 = vmax.f32 %v5844_v39, 0.0  ;;  %v5196_v11 = vpop.f32.mrb[14].mxu0 }
 0x2fd   : > { %v5846_v22 = vadd.f32 %v5196_v11, %v1569_v60  ;;  %v2546_v23 = vpop.f32.mrb[15].mxu0 }
 0x2fe   : > { %v5848_v44 = vadd.f32 %v2546_v23, %v1564_v54  ;;  %5247 = vmatprep.mubr.f32.mxu1 %v2583_v3 }
 0x2ff   : > { %5248 = vmatmul.mubr.f32.gmra.mrb[28].mxu1 %v2584_v14  ;;  %v2586_v7 = vmax.f32 %v5846_v22, 0.0  ;;  %v2779_v28 = vpop.trf.xlu0  ;;  %v3001_v11 = vpop.trf.xlu1 }
 0x300   : > { %v2585_v0 = vmax.f32 %v5848_v44, 0.0 }
 0x302   : > { %5250 = vmatprep.mubr.f32.mxu1 %v2585_v0 }
 0x303   : > { %5251 = vmatmul.mubr.f32.gmra.mrb[30].mxu1 %v2586_v7  ;;  %v2780_v45 = vpop.trf.xlu0  ;;  %v3002_v22 = vpop.trf.xlu1 }
 0x304   : > { %5285 = vmatprep.mubr.f32.mxu1 %v2771_v31 }
 0x307   : > { %v2781_v3 = vpop.trf.xlu0  ;;  %v3003_v44 = vpop.trf.xlu1 }
 0x30b   : > { %v2782_v14 = vpop.trf.xlu0  ;;  %v3004_v7 = vpop.trf.xlu1 }
 0x30f   : > { %v2783_v23 = vpop.trf.xlu0 }
 0x313   : > { %v2784_v0 = vpop.trf.xlu0 }
 0x317   : > { %v2785_v31 = vpop.trf.xlu0 }
 0x3ba   : > { %v5231_v15 = vpop.f32.mrb[16].mxu1 }
 0x3bb   : > { %v2682_v16 = vadd.f32 %v5231_v15, %v4392_v10  ;;  %v2676_v17 = vpop.f32.mrb[17].mxu1 }
 0x3bc   : > { %v2677_v18 = vadd.f32 %v4392_v10, %v2676_v17 }
 0x3be   : > { %v6892_v24 = vpack.c.bf16 %v2682_v16, %v2677_v18  ;;  %v5234_v51 = vpop.f32.mrb[18].mxu1  ;;  %v2933_v18 = vld [vmem:[#allocation4 + $0x8] sm:$0xff] }
 0x3bf   : > { %v2692_v25 = vadd.f32 %v5234_v51, %v4392_v10  ;;  %v2686_v26 = vpop.f32.mrb[19].mxu1 }
 0x3c0   : > { %v2687_v50 = vadd.f32 %v4392_v10, %v2686_v26  ;;  %5690 = vmatprep.subr.bf16.mxu1 %v6892_v24 }
 0x3c1   : > { %5692 = vmatpush3.bf16.msra.mxu1 %v6892_v24 }
 0x3c2   : > { %v6898_v59 = vpack.c.bf16 %v2692_v25, %v2687_v50  ;;  %v5237_v30 = vpop.f32.mrb[20].mxu1  ;;  %v2934_v50 = vld [vmem:[#allocation4 + $0x10] sm:$0xff] }
 0x3c3   : > { %v2702_v33 = vadd.f32 %v5237_v30, %v4392_v10  ;;  %v2696_v58 = vpop.f32.mrb[21].mxu1 }
 0x3c4   : > { %v2697_v36 = vadd.f32 %v4392_v10, %v2696_v58  ;;  %5694 = vmatprep.subr.bf16.mxu1 %v6898_v59 }
 0x3c5   : > { %5696 = vmatpush3.bf16.msra.mxu1 %v6898_v59 }
 0x3c6   : > { %v5697_v38 = vpack.c.bf16 %v2702_v33, %v2697_v36  ;;  %v5240_v42 = vpop.f32.mrb[22].mxu1  ;;  %v2936_v36 = vld [vmem:[#allocation4 + $0x20] sm:$0xff] }
 0x3c7   : > { %v2712_v4 = vadd.f32 %v5240_v42, %v4392_v10  ;;  %v2706_v13 = vpop.f32.mrb[23].mxu1 }
 0x3c8   : > { %v2707_v47 = vadd.f32 %v4392_v10, %v2706_v13  ;;  %5698 = vmatprep.subr.bf16.mxu1 %v5697_v38  ;;  %v2939_v13 = vld [vmem:[#allocation4 + $0x38] sm:$0xff] }
 0x3c9   : > { %5700 = vmatpush3.bf16.msra.mxu1 %v5697_v38 }
 0x3ca   : > { %v5701_v12 = vpack.c.bf16 %v2712_v4, %v2707_v47  ;;  %v5243_v21 = vpop.f32.mrb[24].mxu1  ;;  %v2938_v47 = vld [vmem:[#allocation4 + $0x30] sm:$0xff] }
 0x3cb   : > { %v2722_v53 = vadd.f32 %v5243_v21, %v4392_v10  ;;  %v2716_v55 = vpop.f32.mrb[25].mxu1 }
 0x3cc   : > { %v2717_v61 = vadd.f32 %v4392_v10, %v2716_v55  ;;  %5702 = vmatprep.subr.bf16.mxu1 %v5701_v12  ;;  %v2941_v55 = vld [vmem:[#allocation4 + $0x48] sm:$0xff] }
 0x3cd   : > { %5704 = vmatpush3.bf16.msra.mxu1 %v5701_v12 }
 0x3ce   : > { %v5705_v20 = vpack.c.bf16 %v2722_v53, %v2717_v61  ;;  %v5246_v29 = vpop.f32.mrb[26].mxu1 }
 0x3cf   : > { %v2732_v62 = vadd.f32 %v5246_v29, %v4392_v10  ;;  %v2726_v63 = vpop.f32.mrb[27].mxu1 }
 0x3d0   : > { %v2727_v35 = vadd.f32 %v4392_v10, %v2726_v63  ;;  %5706 = vmatprep.subr.bf16.mxu1 %v5705_v20  ;;  %v2943_v63 = vld [vmem:[#allocation4 + $0x58] sm:$0xff] }
 0x3d1   : > { %5708 = vmatpush3.bf16.msra.mxu1 %v5705_v20 }
 0x3d2   : > { %v5709_v6 = vpack.c.bf16 %v2732_v62, %v2727_v35  ;;  %v5249_v48 = vpop.f32.mrb[28].mxu1 }
 0x3d3   : > { %v2742_v34 = vadd.f32 %v5249_v48, %v4392_v10  ;;  %v2736_v40 = vpop.f32.mrb[29].mxu1 }
 0x3d4   : > { %v2737_v41 = vadd.f32 %v4392_v10, %v2736_v40  ;;  %5710 = vmatprep.subr.bf16.mxu1 %v5709_v6  ;;  %v2944_v40 = vld [vmem:[#allocation4 + $0x60] sm:$0xff] }
 0x3d5   : > { %5712 = vmatpush3.bf16.msra.mxu1 %v5709_v6 }
 0x3d6   : > { %v5713_v46 = vpack.c.bf16 %v2742_v34, %v2737_v41  ;;  %v5252_v49 = vpop.f32.mrb[30].mxu1  ;;  %v2945_v34 = vld [vmem:[#allocation4 + $0x68] sm:$0xff] }
 0x3d7   : > { %v2752_v57 = vadd.f32 %v5252_v49, %v4392_v10  ;;  %v2746_v60 = vpop.f32.mrb[31].mxu1 }
 0x3d8   : > { %v2747_v39 = vadd.f32 %v4392_v10, %v2746_v60  ;;  %5714 = vmatprep.subr.bf16.mxu1 %v5713_v46  ;;  %v2946_v60 = vld [vmem:[#allocation4 + $0x70] sm:$0xff] }
 0x3d9   : > { %5716 = vmatpush3.bf16.msra.mxu1 %v5713_v46 }
 0x3da   : > { %v5717_v54 = vpack.c.bf16 %v2752_v57, %v2747_v39  ;;  %v2947_v57 = vld [vmem:[#allocation4 + $0x78] sm:$0xff] }
 0x3dc   : > { %5718 = vmatprep.subr.bf16.mxu1 %v5717_v54 }
 0x3dd   : > { %5720 = vmatpush3.bf16.msra.mxu1 %v5717_v54 }
 0x3de   : > { %5722 = vmatprep.subr.bf16.mxu1 %v6892_v24 }
 0x3e0   : > { %5286 = vmatmul.mubr.f32.vlgmr.msra.gmra.mrb[32].mxu1 %v6879_v8  ;;  %v3005_v8 = vpop.trf.xlu1 }
 0x3e1   : > { %5288 = vmatprep.mubr.f32.mxu1 %v6881_v9  ;;  %5724 = vmatpush3.bf16.msra.mxu1 %v6892_v24  ;;  %v2786_v9 = vpop.trf.xlu0 }
 0x3e2   : > { %5726 = vmatprep.subr.bf16.mxu1 %v6898_v59 }
 0x3e4   : > { %5289 = vmatmul.mubr.f32.gmra.mrb[34].mxu1 %v6883_v32  ;;  %v3006_v32 = vpop.trf.xlu1 }
 0x3e5   : > { %5291 = vmatprep.mubr.f32.mxu1 %v6885_v43  ;;  %5728 = vmatpush3.bf16.msra.mxu1 %v6898_v59 }
 0x3e6   : > { %5730 = vmatprep.subr.bf16.mxu1 %v5697_v38 }
 0x3e8   : > { %5292 = vmatmul.mubr.f32.gmra.mrb[36].mxu1 %v6890_v19  ;;  %v3007_v43 = vpop.trf.xlu1  ;;  %v2932_v19 = vld [vmem:[#allocation4] sm:$0xff] }
 0x3e9   : > { %5294 = vmatprep.mubr.f32.mxu1 %v6900_v5  ;;  %5732 = vmatpush3.bf16.msra.mxu1 %v5697_v38  ;;  %v2937_v5 = vld [vmem:[#allocation4 + $0x28] sm:$0xff] }
 0x3ea   : > { %5734 = vmatprep.subr.bf16.mxu1 %v5701_v12 }
 0x3ec   : > { %5295 = vmatmul.mubr.f32.gmra.mrb[38].mxu1 %v2778_v52  ;;  %v3008_v10 = vpop.trf.xlu1 }
 0x3ed   : > { %5297 = vmatprep.mubr.f32.mxu1 %v2779_v28  ;;  %5736 = vmatpush3.bf16.msra.mxu1 %v5701_v12  ;;  %v2942_v28 = vld [vmem:[#allocation4 + $0x50] sm:$0xff] }
 0x3ee   : > { %5738 = vmatprep.subr.bf16.mxu1 %v5705_v20 }
 0x3f0   : > { %5298 = vmatmul.mubr.f32.gmra.mrb[40].mxu1 %v2780_v45  ;;  %v3009_v15 = vpop.trf.xlu1 }
 0x3f1   : > { %5300 = vmatprep.mubr.f32.mxu1 %v2781_v3  ;;  %5740 = vmatpush3.bf16.msra.mxu1 %v5705_v20 }
 0x3f2   : > { %5742 = vmatprep.subr.bf16.mxu1 %v5709_v6 }
 0x3f4   : > { %5301 = vmatmul.mubr.f32.gmra.mrb[42].mxu1 %v2782_v14  ;;  %v3010_v16 = vpop.trf.xlu1  ;;  %v3157_v14 = vld [vmem:[#allocation4 + $0x80] sm:$0xff] }
 0x3f5   : > { %5303 = vmatprep.mubr.f32.mxu1 %v2783_v23  ;;  %5744 = vmatpush3.bf16.msra.mxu1 %v5709_v6 }
 0x3f6   : > { %5746 = vmatprep.subr.bf16.mxu1 %v5713_v46 }
 0x3f8   : > { %5304 = vmatmul.mubr.f32.gmra.mrb[44].mxu1 %v2784_v0  ;;  %v3011_v17 = vpop.trf.xlu1 }
 0x3f9   : > { %5306 = vmatprep.mubr.f32.mxu1 %v2785_v31  ;;  %5748 = vmatpush3.bf16.msra.mxu1 %v5713_v46  ;;  %v3159_v31 = vld [vmem:[#allocation4 + $0x90] sm:$0xff] }
 0x3fa   : > { %5750 = vmatprep.subr.bf16.mxu1 %v5717_v54 }
 0x3fc   : > { %5307 = vmatmul.mubr.f32.gmra.mrb[46].mxu1 %v2786_v9 }
 0x3fd   : > { %5752 = vmatpush3.bf16.msra.mxu1 %v5717_v54  ;;  %5341 = vmatprep.mubr.f32.mxu1 %v6894_v27  ;;  %v2935_v27 = vld [vmem:[#allocation4 + $0x18] sm:$0xff] }
 0x400   : > { %5342 = vmatmul.mubr.f32.vlgmr.msra.gmra.mrb[48].mxu1 %v6904_v37 }
 0x401   : > { %5344 = vmatprep.mubr.f32.mxu1 %v6906_v56  ;;  %v2940_v56 = vld [vmem:[#allocation4 + $0x40] sm:$0xff] }
 0x404   : > { %5345 = vmatmul.mubr.f32.gmra.mrb[50].mxu1 %v6908_v1 }
 0x405   : > { %5347 = vmatprep.mubr.f32.mxu1 %v3000_v2 }
 0x408   : > { %5348 = vmatmul.mubr.f32.gmra.mrb[52].mxu1 %v3001_v11  ;;  %v3158_v11 = vld [vmem:[#allocation4 + $0x88] sm:$0xff] }
 0x409   : > { %5350 = vmatprep.mubr.f32.mxu1 %v3002_v22 }
 0x40c   : > { %5351 = vmatmul.mubr.f32.gmra.mrb[54].mxu1 %v3003_v44 }
 0x40d   : > { %5353 = vmatprep.mubr.f32.mxu1 %v3004_v7  ;;  %v3160_v7 = vld [vmem:[#allocation4 + $0x98] sm:$0xff] }
 0x410   : > { %5354 = vmatmul.mubr.f32.gmra.mrb[56].mxu1 %v3005_v8 }
 0x411   : > { %5356 = vmatprep.mubr.f32.mxu1 %v3006_v32 }
 0x414   : > { %5357 = vmatmul.mubr.f32.gmra.mrb[58].mxu1 %v3007_v43 }
 0x415   : > { %5359 = vmatprep.mubr.f32.mxu1 %v3008_v10  ;;  %v3162_v10 = vld [vmem:[#allocation4 + $0xa8] sm:$0xff] }
 0x418   : > { %5360 = vmatmul.mubr.f32.gmra.mrb[60].mxu1 %v3009_v15  ;;  %v3161_v15 = vld [vmem:[#allocation4 + $0xa0] sm:$0xff] }
 0x419   : > { %5362 = vmatprep.mubr.f32.mxu1 %v3010_v16 }
 0x41c   : > { %5363 = vmatmul.mubr.f32.gmra.mrb[62].mxu1 %v3011_v17 }
 0x4b3   : > { %v5287_v24 = vpop.f32.mrb[32].mxu1 }
 0x4b4   : > { %v2949_v51 = vadd.f32 %v5287_v24, %v2933_v18  ;;  %v2853_v25 = vpop.f32.mrb[33].mxu1  ;;  %v3164_v24 = vld [vmem:[#allocation4 + $0xb8] sm:$0xff] }
 0x4b5   : > { %v2948_v26 = vadd.f32 %v2932_v19, %v2853_v25 }
 0x4b6   : > { %2965 = vst [vmem:[#allocation4 + $0x8] sm:$0xff] %v2949_v51  ;;  %v3163_v51 = vld [vmem:[#allocation4 + $0xb0] sm:$0xff] }
 0x4b7   : > { %2964 = vst [vmem:[#allocation4] sm:$0xff] %v2948_v26  ;;  %v5290_v59 = vpop.f32.mrb[34].mxu1 }
 0x4b8   : > { %v2951_v30 = vadd.f32 %v5290_v59, %v2935_v27  ;;  %v2863_v33 = vpop.f32.mrb[35].mxu1  ;;  %v3166_v59 = vld [vmem:[#allocation4 + $0xc8] sm:$0xff] }
 0x4b9   : > { %v2950_v58 = vadd.f32 %v2934_v50, %v2863_v33 }
 0x4ba   : > { %2967 = vst [vmem:[#allocation4 + $0x18] sm:$0xff] %v2951_v30  ;;  %v3165_v30 = vld [vmem:[#allocation4 + $0xc0] sm:$0xff] }
 0x4bb   : > { %2966 = vst [vmem:[#allocation4 + $0x10] sm:$0xff] %v2950_v58  ;;  %v5293_v37 = vpop.f32.mrb[36].mxu1 }
 0x4bc   : > { %v2953_v38 = vadd.f32 %v5293_v37, %v2937_v5  ;;  %v2873_v42 = vpop.f32.mrb[37].mxu1  ;;  %v3168_v37 = vld [vmem:[#allocation4 + $0xd8] sm:$0xff] }
 0x4bd   : > { %v2952_v4 = vadd.f32 %v2936_v36, %v2873_v42 }
 0x4be   : > { %2969 = vst [vmem:[#allocation4 + $0x28] sm:$0xff] %v2953_v38  ;;  %v3167_v38 = vld [vmem:[#allocation4 + $0xd0] sm:$0xff] }
 0x4bf   : > { %2968 = vst [vmem:[#allocation4 + $0x20] sm:$0xff] %v2952_v4  ;;  %v5296_v52 = vpop.f32.mrb[38].mxu1 }
 0x4c0   : > { %v2955_v12 = vadd.f32 %v5296_v52, %v2939_v13  ;;  %v2883_v21 = vpop.f32.mrb[39].mxu1  ;;  %v3170_v52 = vld [vmem:[#allocation4 + $0xe8] sm:$0xff] }
 0x4c1   : > { %v2954_v53 = vadd.f32 %v2938_v47, %v2883_v21 }
 0x4c2   : > { %2971 = vst [vmem:[#allocation4 + $0x38] sm:$0xff] %v2955_v12  ;;  %v3169_v12 = vld [vmem:[#allocation4 + $0xe0] sm:$0xff] }
 0x4c3   : > { %2970 = vst [vmem:[#allocation4 + $0x30] sm:$0xff] %v2954_v53  ;;  %v5299_v61 = vpop.f32.mrb[40].mxu1 }
 0x4c4   : > { %v2957_v20 = vadd.f32 %v5299_v61, %v2941_v55  ;;  %v2893_v29 = vpop.f32.mrb[41].mxu1  ;;  %v3172_v61 = vld [vmem:[#allocation4 + $0xf8] sm:$0xff] }
 0x4c5   : > { %v2956_v62 = vadd.f32 %v2940_v56, %v2893_v29 }
 0x4c6   : > { %2973 = vst [vmem:[#allocation4 + $0x48] sm:$0xff] %v2957_v20  ;;  %v3171_v20 = vld [vmem:[#allocation4 + $0xf0] sm:$0xff] }
 0x4c7   : > { %2972 = vst [vmem:[#allocation4 + $0x40] sm:$0xff] %v2956_v62  ;;  %v5302_v35 = vpop.f32.mrb[42].mxu1 }
 0x4c8   : > { %v2959_v1 = vadd.f32 %v5302_v35, %v2943_v63  ;;  %v2903_v6 = vpop.f32.mrb[43].mxu1  ;;  %v3209_v35 = vld [vmem:[%s7272_s4] sm:$0xf] (!%p4393_p5) }
 0x4c9   : > { %v2958_v48 = vadd.f32 %v2942_v28, %v2903_v6  ;;  %v3227_v6 = vld [vmem:[%s7271_s3 + $0x8] sm:$0xff] (!%p4393_p5)  ;;  %5365 = vmatprep.subr.msk.mxu0 (!%p4393_p5), %vm3298_vm0, %v3209_v35 }
 0x4ca   : > { %2975 = vst [vmem:[#allocation4 + $0x58] sm:$0xff] %v2959_v1  ;;  %v3226_v1 = vld [vmem:[%s7271_s3] sm:$0xff] (!%p4393_p5)  ;;  %5366 = vmatpush3.msk.msra.mxu0 (!%p4393_p5), %vm3298_vm0, %v3209_v35 }
 0x4cb   : > { %2974 = vst [vmem:[#allocation4 + $0x50] sm:$0xff] %v2958_v48  ;;  %v5305_v41 = vpop.f32.mrb[44].mxu1  ;;  %5367 = vmatprep.mubr.msk.f32.mxu0 (!%p4393_p5), %vm3249_vm3, %v3226_v1  ;;  %v3228_v48 = vld [vmem:[%s7271_s3 + $0x10] sm:$0xff] (!%p4393_p5)  ;;  %5447 = vmatprep.subr.msk.mxu0 (!%p4393_p5), %vm3298_vm0, %v3209_v35 }
 0x4cc   : > { %v2961_v45 = vadd.f32 %v5305_v41, %v2945_v34  ;;  %v2913_v46 = vpop.f32.mrb[45].mxu1  ;;  %5368 = vmatmul.mubr.msk.f32.vlgmr.msra.gmra.mrb[0].mxu0 (!%p4393_p5), %vm3249_vm3, %v3227_v6  ;;  %v3229_v34 = vld [vmem:[%s7271_s3 + $0x18] sm:$0xff] (!%p4393_p5)  ;;  %v3231_v41 = vld [vmem:[%s7271_s3 + $0x28] sm:$0xff] (!%p4393_p5) }
 0x4cd   : > { %v2960_v49 = vadd.f32 %v2944_v40, %v2913_v46  ;;  %5448 = vmatpush3.msk.msra.mxu0 (!%p4393_p5), %vm3298_vm0, %v3209_v35  ;;  %5370 = vmatprep.mubr.msk.f32.mxu0 (!%p4393_p5), %vm3249_vm3, %v3228_v48  ;;  %v3230_v40 = vld [vmem:[%s7271_s3 + $0x20] sm:$0xff] (!%p4393_p5) }
 0x4ce   : > { %2977 = vst [vmem:[#allocation4 + $0x68] sm:$0xff] %v2961_v45  ;;  %v3232_v45 = vld [vmem:[%s7271_s3 + $0x30] sm:$0xff] (!%p4393_p5)  ;;  %v3210_v46 = vld [vmem:[%s7274_s6] sm:$0xff] (!%p4393_p5) }
 0x4cf   : > { %2976 = vst [vmem:[#allocation4 + $0x60] sm:$0xff] %v2960_v49  ;;  %v5308_v2 = vpop.f32.mrb[46].mxu1  ;;  %v3211_v49 = vld [vmem:[%s7274_s6 + $0x8] sm:$0xff] (!%p4393_p5) }
 0x4d0   : > { %v2963_v39 = vadd.f32 %v5308_v2, %v2947_v57  ;;  %v2923_v54 = vpop.f32.mrb[47].mxu1  ;;  %5371 = vmatmul.mubr.msk.f32.gmra.mrb[2].mxu0 (!%p4393_p5), %vm3249_vm3, %v3229_v34  ;;  %v3212_v57 = vld [vmem:[%s7274_s6 + $0x10] sm:$0xff] (!%p4393_p5)  ;;  %v6968_v2 = vpack.c.bf16 (!%p4393_p5), %v3211_v49, %v3210_v46 }
 0x4d1   : > { %v2962_v3 = vadd.f32 %v2946_v60, %v2923_v54  ;;  %5373 = vmatprep.mubr.msk.f32.mxu0 (!%p4393_p5), %vm3249_vm3, %v3230_v40  ;;  %v3233_v60 = vld [vmem:[%s7271_s3 + $0x38] sm:$0xff] (!%p4393_p5)  ;;  %v3234_v54 = vld [vmem:[%s7271_s3 + $0x40] sm:$0xff] (!%p4393_p5) }
 0x4d2   : > { %2979 = vst [vmem:[#allocation4 + $0x78] sm:$0xff] %v2963_v39  ;;  %v3213_v39 = vld [vmem:[%s7274_s6 + $0x18] sm:$0xff] (!%p4393_p5)  ;;  %5754 = vmatprep.subr.bf16.mxu1 (!%p4393_p5), %v6968_v2  ;;  %5786 = vmatprep.subr.bf16.mxu0 (!%p4393_p5), %v6968_v2 }
 0x4d3   : > { %2978 = vst [vmem:[#allocation4 + $0x70] sm:$0xff] %v2962_v3  ;;  %v5343_v22 = vpop.f32.mrb[48].mxu1  ;;  %v6976_v3 = vpack.c.bf16 (!%p4393_p5), %v3213_v39, %v3212_v57  ;;  %5756 = vmatpush3.bf16.msra.mxu1 (!%p4393_p5), %v6968_v2 }
 0x4d4   : > { %v3174_v23 = vadd.f32 %v5343_v22, %v3158_v11  ;;  %v3078_v44 = vpop.f32.mrb[49].mxu1  ;;  %5374 = vmatmul.mubr.msk.f32.gmra.mrb[4].mxu0 (!%p4393_p5), %vm3249_vm3, %v3231_v41  ;;  %v3214_v11 = vld [vmem:[%s7274_s6 + $0x20] sm:$0xff] (!%p4393_p5)  ;;  %v3235_v22 = vld [vmem:[%s7271_s3 + $0x48] sm:$0xff] (!%p4393_p5) }
 0x4d5   : > { %v3173_v0 = vadd.f32 %v3157_v14, %v3078_v44  ;;  %5376 = vmatprep.mubr.msk.f32.mxu0 (!%p4393_p5), %vm3249_vm3, %v3232_v45  ;;  %v3215_v14 = vld [vmem:[%s7274_s6 + $0x28] sm:$0xff] (!%p4393_p5)  ;;  %5758 = vmatprep.subr.bf16.mxu1 (!%p4393_p5), %v6976_v3  ;;  %v3236_v44 = vld [vmem:[%s7271_s3 + $0x50] sm:$0xff] (!%p4393_p5) }
 0x4d6   : > { %3190 = vst [vmem:[#allocation4 + $0x88] sm:$0xff] %v3174_v23  ;;  %v6993_v23 = vpack.c.bf16 (!%p4393_p5), %v3215_v14, %v3214_v11 }
 0x4d7   : > { %3189 = vst [vmem:[#allocation4 + $0x80] sm:$0xff] %v3173_v0  ;;  %v5346_v8 = vpop.f32.mrb[50].mxu1  ;;  %v3216_v0 = vld [vmem:[%s7274_s6 + $0x30] sm:$0xff] (!%p4393_p5)  ;;  %5760 = vmatpush3.bf16.msra.mxu1 (!%p4393_p5), %v6976_v3 }
 0x4d8   : > { %v3176_v9 = vadd.f32 %v5346_v8, %v3160_v7  ;;  %v3088_v32 = vpop.f32.mrb[51].mxu1  ;;  %5377 = vmatmul.mubr.msk.f32.gmra.mrb[6].mxu0 (!%p4393_p5), %vm3249_vm3, %v3233_v60  ;;  %v3217_v7 = vld [vmem:[%s7274_s6 + $0x38] sm:$0xff] (!%p4393_p5)  ;;  %5762 = vmatprep.subr.bf16.mxu1 (!%p4393_p5), %v6993_v23 }
 0x4d9   : > { %v3175_v43 = vadd.f32 %v3159_v31, %v3088_v32  ;;  %5379 = vmatprep.mubr.msk.f32.mxu0 (!%p4393_p5), %vm3249_vm3, %v3234_v54  ;;  %v3237_v31 = vld [vmem:[%s7271_s3 + $0x58] sm:$0xff] (!%p4393_p5)  ;;  %v7011_v8 = vpack.c.bf16 (!%p4393_p5), %v3217_v7, %v3216_v0  ;;  %v3218_v32 = vld [vmem:[%s7274_s6 + $0x40] sm:$0xff] (!%p4393_p5) }
 0x4da   : > { %3192 = vst [vmem:[#allocation4 + $0x98] sm:$0xff] %v3176_v9  ;;  %v3238_v9 = vld [vmem:[%s7271_s3 + $0x60] sm:$0xff] (!%p4393_p5) }
 0x4db   : > { %3191 = vst [vmem:[#allocation4 + $0x90] sm:$0xff] %v3175_v43  ;;  %v5349_v16 = vpop.f32.mrb[52].mxu1  ;;  %v3219_v43 = vld [vmem:[%s7274_s6 + $0x48] sm:$0xff] (!%p4393_p5)  ;;  %5764 = vmatpush3.bf16.msra.mxu1 (!%p4393_p5), %v6993_v23 }
 0x4dc   : > { %v3178_v17 = vadd.f32 %v5349_v16, %v3162_v10  ;;  %v3098_v18 = vpop.f32.mrb[53].mxu1  ;;  %5380 = vmatmul.mubr.msk.f32.gmra.mrb[8].mxu0 (!%p4393_p5), %vm3249_vm3, %v3235_v22  ;;  %v3239_v10 = vld [vmem:[%s7271_s3 + $0x68] sm:$0xff] (!%p4393_p5)  ;;  %5766 = vmatprep.subr.bf16.mxu1 (!%p4393_p5), %v7011_v8  ;;  %v3240_v16 = vld [vmem:[%s7271_s3 + $0x70] sm:$0xff] (!%p4393_p5) }
 0x4dd   : > { %v3177_v19 = vadd.f32 %v3161_v15, %v3098_v18  ;;  %5382 = vmatprep.mubr.msk.f32.mxu0 (!%p4393_p5), %vm3249_vm3, %v3236_v44  ;;  %v7029_v15 = vpack.c.bf16 (!%p4393_p5), %v3219_v43, %v3218_v32  ;;  %v3221_v18 = vld [vmem:[%s7274_s6 + $0x58] sm:$0xff] (!%p4393_p5) }
 0x4de   : > { %3194 = vst [vmem:[#allocation4 + $0xa8] sm:$0xff] %v3178_v17  ;;  %v3220_v17 = vld [vmem:[%s7274_s6 + $0x50] sm:$0xff] (!%p4393_p5) }
 0x4df   : > { %3193 = vst [vmem:[#allocation4 + $0xa0] sm:$0xff] %v3177_v19  ;;  %v5352_v25 = vpop.f32.mrb[54].mxu1  ;;  %5768 = vmatpush3.bf16.msra.mxu1 (!%p4393_p5), %v7011_v8  ;;  %v3241_v19 = vld [vmem:[%s7271_s3 + $0x78] sm:$0xff] (!%p4393_p5) }
 0x4e0   : > { %v3180_v26 = vadd.f32 %v5352_v25, %v3164_v24  ;;  %v3108_v27 = vpop.f32.mrb[55].mxu1  ;;  %5383 = vmatmul.mubr.msk.f32.gmra.mrb[10].mxu0 (!%p4393_p5), %vm3249_vm3, %v3237_v31  ;;  %5770 = vmatprep.subr.bf16.mxu1 (!%p4393_p5), %v7029_v15  ;;  %v7047_v24 = vpack.c.bf16 (!%p4393_p5), %v3221_v18, %v3220_v17  ;;  %v3222_v25 = vld [vmem:[%s7274_s6 + $0x60] sm:$0xff] (!%p4393_p5) }
 0x4e1   : > { %v3179_v50 = vadd.f32 %v3163_v51, %v3108_v27  ;;  %5385 = vmatprep.mubr.msk.f32.mxu0 (!%p4393_p5), %vm3249_vm3, %v3238_v9  ;;  %v3663_v51 = vld [vmem:[%s7271_s3 + $0x80] sm:$0xff] (!%p4393_p5)  ;;  %v3664_v27 = vld [vmem:[%s7271_s3 + $0x88] sm:$0xff] (!%p4393_p5) }
 0x4e2   : > { %3196 = vst [vmem:[#allocation4 + $0xb8] sm:$0xff] %v3180_v26  ;;  %v3223_v26 = vld [vmem:[%s7274_s6 + $0x68] sm:$0xff] (!%p4393_p5) }
 0x4e3   : > { %3195 = vst [vmem:[#allocation4 + $0xb0] sm:$0xff] %v3179_v50  ;;  %v5355_v33 = vpop.f32.mrb[56].mxu1  ;;  %5772 = vmatpush3.bf16.msra.mxu1 (!%p4393_p5), %v7029_v15  ;;  %v7065_v50 = vpack.c.bf16 (!%p4393_p5), %v3223_v26, %v3222_v25 }
 0x4e4   : > { %v3182_v58 = vadd.f32 %v5355_v33, %v3166_v59  ;;  %v3118_v5 = vpop.f32.mrb[57].mxu1  ;;  %5386 = vmatmul.mubr.msk.f32.gmra.mrb[12].mxu0 (!%p4393_p5), %vm3249_vm3, %v3239_v10  ;;  %5774 = vmatprep.subr.bf16.mxu1 (!%p4393_p5), %v7047_v24  ;;  %v3665_v59 = vld [vmem:[%s7271_s3 + $0x90] sm:$0xff] (!%p4393_p5)  ;;  %v3667_v33 = vld [vmem:[%s7271_s3 + $0xa0] sm:$0xff] (!%p4393_p5) }
 0x4e5   : > { %v3181_v36 = vadd.f32 %v3165_v30, %v3118_v5  ;;  %5388 = vmatprep.mubr.msk.f32.mxu0 (!%p4393_p5), %vm3249_vm3, %v3240_v16  ;;  %v3666_v30 = vld [vmem:[%s7271_s3 + $0x98] sm:$0xff] (!%p4393_p5)  ;;  %v3669_v5 = vld [vmem:[%s7271_s3 + $0xb0] sm:$0xff] (!%p4393_p5) }
 0x4e6   : > { %3198 = vst [vmem:[#allocation4 + $0xc8] sm:$0xff] %v3182_v58  ;;  %v3668_v58 = vld [vmem:[%s7271_s3 + $0xa8] sm:$0xff] (!%p4393_p5) }
 0x4e7   : > { %3197 = vst [vmem:[#allocation4 + $0xc0] sm:$0xff] %v3181_v36  ;;  %v5358_v42 = vpop.f32.mrb[58].mxu1  ;;  %5776 = vmatpush3.bf16.msra.mxu1 (!%p4393_p5), %v7047_v24  ;;  %v3670_v36 = vld [vmem:[%s7271_s3 + $0xb8] sm:$0xff] (!%p4393_p5) }
 0x4e8   : > { %v3184_v4 = vadd.f32 %v5358_v42, %v3168_v37  ;;  %v3128_v13 = vpop.f32.mrb[59].mxu1  ;;  %5389 = vmatmul.mubr.msk.f32.gmra.mrb[14].mxu0 (!%p4393_p5), %vm3249_vm3, %v3241_v19  ;;  %5778 = vmatprep.subr.bf16.mxu1 (!%p4393_p5), %v7065_v50  ;;  %v3671_v37 = vld [vmem:[%s7271_s3 + $0xc0] sm:$0xff] (!%p4393_p5)  ;;  %v3673_v42 = vld [vmem:[%s7271_s3 + $0xd0] sm:$0xff] (!%p4393_p5) }
 0x4e9   : > { %v3183_v47 = vadd.f32 %v3167_v38, %v3128_v13  ;;  %5449 = vmatprep.mubr.msk.f32.mxu0 (!%p4393_p5), %vm3249_vm3, %v3663_v51  ;;  %v3672_v38 = vld [vmem:[%s7271_s3 + $0xc8] sm:$0xff] (!%p4393_p5)  ;;  %v3675_v13 = vld [vmem:[%s7271_s3 + $0xe0] sm:$0xff] (!%p4393_p5) }
 0x4ea   : > { %3200 = vst [vmem:[#allocation4 + $0xd8] sm:$0xff] %v3184_v4  ;;  %v3674_v4 = vld [vmem:[%s7271_s3 + $0xd8] sm:$0xff] (!%p4393_p5) }
 0x4eb   : > { %3199 = vst [vmem:[#allocation4 + $0xd0] sm:$0xff] %v3183_v47  ;;  %v5361_v21 = vpop.f32.mrb[60].mxu1  ;;  %5780 = vmatpush3.bf16.msra.mxu1 (!%p4393_p5), %v7065_v50  ;;  %v3676_v47 = vld [vmem:[%s7271_s3 + $0xe8] sm:$0xff] (!%p4393_p5) }
 0x4ec   : > { %v3186_v53 = vadd.f32 %v5361_v21, %v3170_v52  ;;  %v3138_v55 = vpop.f32.mrb[61].mxu1  ;;  %5450 = vmatmul.mubr.msk.f32.vlgmr.msra.gmra.mrb[16].mxu0 (!%p4393_p5), %vm3249_vm3, %v3664_v27  ;;  %v3677_v52 = vld [vmem:[%s7271_s3 + $0xf0] sm:$0xff] (!%p4393_p5) }
 0x4ed   : > { %v3185_v56 = vadd.f32 %v3169_v12, %v3138_v55  ;;  %3208 = sbr.rel (%p4393_p5) target bundleno = 1724 (0x6bc), region = 84  ;;  %5452 = vmatprep.mubr.msk.f32.mxu0 (!%p4393_p5), %vm3249_vm3, %v3665_v59  ;;  %5788 = vmatpush3.bf16.msra.mxu0 (!%p4393_p5), %v6968_v2  ;;  %v3678_v12 = vld [vmem:[%s7271_s3 + $0xf8] sm:$0xff] (!%p4393_p5)  ;;  %v3224_v21 = vld [vmem:[%s7274_s6 + $0x70] sm:$0xff] (!%p4393_p5) }
 0x4ee   : > { %3202 = vst [vmem:[#allocation4 + $0xe8] sm:$0xff] %v3186_v53  ;;  %5790 = vmatprep.subr.bf16.mxu0 (!%p4393_p5), %v6976_v3  ;;  %v3225_v53 = vld [vmem:[%s7274_s6 + $0x78] sm:$0xff] (!%p4393_p5) }
 0x4ef   : > { %3201 = vst [vmem:[#allocation4 + $0xe0] sm:$0xff] %v3185_v56  ;;  %v5364_v29 = vpop.f32.mrb[62].mxu1  ;;  %v7146_v55 = vpack.c.bf16 (!%p4393_p5), %v3225_v53, %v3224_v21  ;;  %v7156_v56 = vld [vmem:[%s7273_s5] ss:$0 sm:$0xff] (!%p4393_p5) }
 0x4f0   : > { %v3188_v62 = vadd.f32 %v5364_v29, %v3172_v61  ;;  %v3148_v63 = vpop.f32.mrb[63].mxu1  ;;  %5453 = vmatmul.mubr.msk.f32.gmra.mrb[18].mxu0 (!%p4393_p5), %vm3249_vm3, %v3666_v30 }
 0x4f1   : > { %v3187_v28 = vadd.f32 %v3171_v20, %v3148_v63  ;;  %5455 = vmatprep.mubr.msk.f32.mxu0 (!%p4393_p5), %vm3249_vm3, %v3667_v33  ;;  %5792 = vmatpush3.bf16.msra.mxu0 (!%p4393_p5), %v6976_v3 }
 0x4f2   : > { %3204 = vst [vmem:[#allocation4 + $0xf8] sm:$0xff] %v3188_v62  ;;  %5794 = vmatprep.subr.bf16.mxu0 (!%p4393_p5), %v6993_v23  ;;  %5782 = vmatprep.subr.bf16.mxu1 (!%p4393_p5), %v7146_v55 }
 0x4f3   : > { %3203 = vst [vmem:[#allocation4 + $0xf0] sm:$0xff] %v3187_v28  ;;  %5784 = vmatpush3.bf16.msra.mxu1 (!%p4393_p5), %v7146_v55 }
 0x4f4   : > { %5456 = vmatmul.mubr.msk.f32.gmra.mrb[20].mxu0 %vm3249_vm3, %v3668_v58  ;;  %5897 = vmatprep.subr.bf16.mxu1 %v6968_v2 }
 0x4f5   : > { %5458 = vmatprep.mubr.msk.f32.mxu0 %vm3249_vm3, %v3669_v5  ;;  %5796 = vmatpush3.bf16.msra.mxu0 %v6993_v23 }
 0x4f6   : > { %5798 = vmatprep.subr.bf16.mxu0 %v7011_v8 }
 0x4f8   : > { %5459 = vmatmul.mubr.msk.f32.gmra.mrb[22].mxu0 %vm3249_vm3, %v3670_v36 }
 0x4f9   : > { %5461 = vmatprep.mubr.msk.f32.mxu0 %vm3249_vm3, %v3671_v37  ;;  %5800 = vmatpush3.bf16.msra.mxu0 %v7011_v8 }
 0x4fa   : > { %5802 = vmatprep.subr.bf16.mxu0 %v7029_v15 }
 0x4fc   : > { %5462 = vmatmul.mubr.msk.f32.gmra.mrb[24].mxu0 %vm3249_vm3, %v3672_v38 }
 0x4fd   : > { %5464 = vmatprep.mubr.msk.f32.mxu0 %vm3249_vm3, %v3673_v42  ;;  %5804 = vmatpush3.bf16.msra.mxu0 %v7029_v15 }
 0x4fe   : > { %5806 = vmatprep.subr.bf16.mxu0 %v7047_v24 }
 0x500   : > { %5465 = vmatmul.mubr.msk.f32.gmra.mrb[26].mxu0 %vm3249_vm3, %v3674_v4 }
 0x501   : > { %5467 = vmatprep.mubr.msk.f32.mxu0 %vm3249_vm3, %v3675_v13  ;;  %5808 = vmatpush3.bf16.msra.mxu0 %v7047_v24 }
 0x502   : > { %5810 = vmatprep.subr.bf16.mxu0 %v7065_v50 }
 0x504   : > { %5468 = vmatmul.mubr.msk.f32.gmra.mrb[28].mxu0 %vm3249_vm3, %v3676_v47 }
 0x505   : > { %5470 = vmatprep.mubr.msk.f32.mxu0 %vm3249_vm3, %v3677_v52  ;;  %5812 = vmatpush3.bf16.msra.mxu0 %v7065_v50 }
 0x506   : > { %5814 = vmatprep.subr.bf16.mxu0 %v7146_v55 }
 0x508   : > { %5471 = vmatmul.mubr.msk.f32.gmra.mrb[30].mxu0 %vm3249_vm3, %v3678_v12 }
 0x509   : > { %5816 = vmatpush3.bf16.msra.mxu0 %v7146_v55 }
 0x59f   : > { %v5369_v61 = vpop.f32.mrb[0].mxu0 }
 0x5a0   : > { %v3374_v20 = vadd.f32 %v5369_v61, %v7156_v56  ;;  %v3368_v29 = vpop.f32.mrb[1].mxu0 }
 0x5a1   : > { %v3369_v62 = vadd.f32 %v7156_v56, %v3368_v29 }
 0x5a2   : > { %v3448_v35 = vmax.f32 %v3374_v20, 0.0 }
 0x5a3   : > { %v5372_v63 = vpop.f32.mrb[2].mxu0  ;;  %v3447_v28 = vmax.f32 %v3369_v62, 0.0 }
 0x5a4   : > { %v3384_v1 = vadd.f32 %v5372_v63, %v7156_v56  ;;  %v3378_v6 = vpop.f32.mrb[3].mxu0 }
 0x5a5   : > { %v3379_v48 = vadd.f32 %v7156_v56, %v3378_v6  ;;  %5423 = vmatprep.mubr.f32.mxu1 %v3447_v28 }
 0x5a6   : > { %5424 = vmatmul.mubr.f32.vlgmr.msra.gmra.mrb[0].mxu1 %v3448_v35  ;;  %v3450_v41 = vmax.f32 %v3384_v1, 0.0 }
 0x5a7   : > { %v3449_v34 = vmax.f32 %v3379_v48, 0.0  ;;  %v5375_v40 = vpop.f32.mrb[4].mxu0  ;;  %5905 = vmatpush3.bf16.msra.mxu1 %v6968_v2 }
 0x5a8   : > { %v3394_v45 = vadd.f32 %v5375_v40, %v7156_v56  ;;  %v3388_v46 = vpop.f32.mrb[5].mxu0  ;;  %5898 = vmatprep.subr.bf16.mxu1 %v6976_v3 }
 0x5a9   : > { %v3389_v49 = vadd.f32 %v7156_v56, %v3388_v46  ;;  %5426 = vmatprep.mubr.f32.mxu1 %v3449_v34 }
 0x5aa   : > { %5427 = vmatmul.mubr.f32.gmra.mrb[2].mxu1 %v3450_v41  ;;  %v3452_v39 = vmax.f32 %v3394_v45, 0.0 }
 0x5ab   : > { %v3451_v57 = vmax.f32 %v3389_v49, 0.0  ;;  %v5378_v60 = vpop.f32.mrb[6].mxu0  ;;  %5906 = vmatpush3.bf16.msra.mxu1 %v6976_v3 }
 0x5ac   : > { %v3404_v54 = vadd.f32 %v5378_v60, %v7156_v56  ;;  %v3398_v11 = vpop.f32.mrb[7].mxu0  ;;  %5899 = vmatprep.subr.bf16.mxu1 %v6993_v23 }
 0x5ad   : > { %v3399_v2 = vadd.f32 %v7156_v56, %v3398_v11  ;;  %5429 = vmatprep.mubr.f32.mxu1 %v3451_v57 }
 0x5ae   : > { %5430 = vmatmul.mubr.f32.gmra.mrb[4].mxu1 %v3452_v39  ;;  %v3454_v44 = vmax.f32 %v3404_v54, 0.0 }
 0x5af   : > { %v3453_v14 = vmax.f32 %v3399_v2, 0.0  ;;  %v5381_v22 = vpop.f32.mrb[8].mxu0  ;;  %5907 = vmatpush3.bf16.msra.mxu1 %v6993_v23 }
 0x5b0   : > { %v3414_v0 = vadd.f32 %v5381_v22, %v7156_v56  ;;  %v3408_v7 = vpop.f32.mrb[9].mxu0  ;;  %5900 = vmatprep.subr.bf16.mxu1 %v7011_v8 }
 0x5b1   : > { %v3409_v3 = vadd.f32 %v7156_v56, %v3408_v7  ;;  %5432 = vmatprep.mubr.f32.mxu1 %v3453_v14 }
 0x5b2   : > { %5433 = vmatmul.mubr.f32.gmra.mrb[6].mxu1 %v3454_v44  ;;  %v3456_v32 = vmax.f32 %v3414_v0, 0.0 }
 0x5b3   : > { %v3455_v31 = vmax.f32 %v3409_v3, 0.0  ;;  %v5384_v9 = vpop.f32.mrb[10].mxu0  ;;  %5908 = vmatpush3.bf16.msra.mxu1 %v7011_v8 }
 0x5b4   : > { %v3424_v43 = vadd.f32 %v5384_v9, %v7156_v56  ;;  %v3418_v10 = vpop.f32.mrb[11].mxu0  ;;  %5901 = vmatprep.subr.bf16.mxu1 %v7029_v15 }
 0x5b5   : > { %v3419_v23 = vadd.f32 %v7156_v56, %v3418_v10  ;;  %5435 = vmatprep.mubr.f32.mxu1 %v3455_v31 }
 0x5b6   : > { %5436 = vmatmul.mubr.f32.gmra.mrb[8].mxu1 %v3456_v32  ;;  %v3458_v18 = vmax.f32 %v3424_v43, 0.0 }
 0x5b7   : > { %v3457_v16 = vmax.f32 %v3419_v23, 0.0  ;;  %v5387_v17 = vpop.f32.mrb[12].mxu0  ;;  %5909 = vmatpush3.bf16.msra.mxu1 %v7029_v15  ;;  %v7208_v23 = vld [vmem:[%s7281_s13] ss:$0 sm:$0xff] }
 0x5b8   : > { %v3434_v19 = vadd.f32 %v5387_v17, %v7156_v56  ;;  %v3428_v51 = vpop.f32.mrb[13].mxu0  ;;  %5902 = vmatprep.subr.bf16.mxu1 %v7047_v24  ;;  %v3616_v17 = vld [vmem:[#allocation4 + $0x8] sm:$0xff] }
 0x5b9   : > { %v3429_v8 = vadd.f32 %v7156_v56, %v3428_v51  ;;  %5438 = vmatprep.mubr.f32.mxu1 %v3457_v16  ;;  %v3615_v51 = vld [vmem:[#allocation4] sm:$0xff] }
 0x5ba   : > { %5439 = vmatmul.mubr.f32.gmra.mrb[10].mxu1 %v3458_v18  ;;  %v3460_v27 = vmax.f32 %v3434_v19, 0.0 }
 0x5bb   : > { %v3459_v25 = vmax.f32 %v3429_v8, 0.0  ;;  %v5390_v26 = vpop.f32.mrb[14].mxu0  ;;  %5910 = vmatpush3.bf16.msra.mxu1 %v7047_v24 }
 0x5bc   : > { %v3444_v59 = vadd.f32 %v5390_v26, %v7156_v56  ;;  %v3438_v30 = vpop.f32.mrb[15].mxu0  ;;  %5903 = vmatprep.subr.bf16.mxu1 %v7065_v50 }
 0x5bd   : > { %v3439_v15 = vadd.f32 %v7156_v56, %v3438_v30  ;;  %5441 = vmatprep.mubr.f32.mxu1 %v3459_v25 }
 0x5be   : > { %5442 = vmatmul.mubr.f32.gmra.mrb[12].mxu1 %v3460_v27  ;;  %v3462_v5 = vmax.f32 %v3444_v59, 0.0  ;;  %v3618_v27 = vld [vmem:[#allocation4 + $0x18] sm:$0xff] }
 0x5bf   : > { %v3461_v33 = vmax.f32 %v3439_v15, 0.0  ;;  %v5451_v58 = vpop.f32.mrb[16].mxu0  ;;  %5911 = vmatpush3.bf16.msra.mxu1 %v7065_v50  ;;  %v3617_v15 = vld [vmem:[#allocation4 + $0x10] sm:$0xff] }
 0x5c0   : > { %v3806_v36 = vadd.f32 %v5451_v58, %v7156_v56  ;;  %v3800_v37 = vpop.f32.mrb[17].mxu0  ;;  %5904 = vmatprep.subr.bf16.mxu1 %v7146_v55 }
 0x5c1   : > { %v3801_v24 = vadd.f32 %v7156_v56, %v3800_v37  ;;  %5444 = vmatprep.mubr.f32.mxu1 %v3461_v33  ;;  %v3620_v37 = vld [vmem:[#allocation4 + $0x28] sm:$0xff] }
 0x5c2   : > { %5445 = vmatmul.mubr.f32.gmra.mrb[14].mxu1 %v3462_v5  ;;  %v3880_v4 = vmax.f32 %v3806_v36, 0.0 }
 0x5c3   : > { %v3879_v38 = vmax.f32 %v3801_v24, 0.0  ;;  %v5454_v42 = vpop.f32.mrb[18].mxu0  ;;  %5912 = vmatpush3.bf16.msra.mxu1 %v7146_v55 }
 0x5c4   : > { %v3816_v13 = vadd.f32 %v5454_v42, %v7156_v56  ;;  %v3810_v47 = vpop.f32.mrb[19].mxu0  ;;  %v3619_v42 = vld [vmem:[#allocation4 + $0x20] sm:$0xff] }
 0x5c5   : > { %v3811_v50 = vadd.f32 %v7156_v56, %v3810_v47  ;;  %5505 = vmatprep.mubr.f32.mxu0 %v3879_v38 }
 0x5c6   : > { %5506 = vmatmul.mubr.f32.vlgmr.msra.gmra.mrb[32].mxu0 %v3880_v4  ;;  %v3882_v21 = vmax.f32 %v3816_v13, 0.0 }
 0x5c7   : > { %v3881_v52 = vmax.f32 %v3811_v50, 0.0  ;;  %v5457_v12 = vpop.f32.mrb[20].mxu0 }
 0x5c8   : > { %v3826_v53 = vadd.f32 %v5457_v12, %v7156_v56  ;;  %v3820_v61 = vpop.f32.mrb[21].mxu0 }
 0x5c9   : > { %v3821_v20 = vadd.f32 %v7156_v56, %v3820_v61  ;;  %5508 = vmatprep.mubr.f32.mxu0 %v3881_v52  ;;  %v3622_v52 = vld [vmem:[#allocation4 + $0x38] sm:$0xff] }
 0x5ca   : > { %5509 = vmatmul.mubr.f32.gmra.mrb[34].mxu0 %v3882_v21  ;;  %v3884_v62 = vmax.f32 %v3826_v53, 0.0  ;;  %v3621_v53 = vld [vmem:[#allocation4 + $0x30] sm:$0xff] }
 0x5cb   : > { %v3883_v29 = vmax.f32 %v3821_v20, 0.0  ;;  %v5460_v55 = vpop.f32.mrb[22].mxu0 }
 0x5cc   : > { %v3836_v63 = vadd.f32 %v5460_v55, %v7156_v56  ;;  %v3830_v28 = vpop.f32.mrb[23].mxu0 }
 0x5cd   : > { %v3831_v35 = vadd.f32 %v7156_v56, %v3830_v28  ;;  %5511 = vmatprep.mubr.f32.mxu0 %v3883_v29 }
 0x5ce   : > { %5512 = vmatmul.mubr.f32.gmra.mrb[36].mxu0 %v3884_v62  ;;  %v3886_v48 = vmax.f32 %v3836_v63, 0.0  ;;  %v3624_v62 = vld [vmem:[#allocation4 + $0x48] sm:$0xff] }
 0x5cf   : > { %v3885_v1 = vmax.f32 %v3831_v35, 0.0  ;;  %v5463_v6 = vpop.f32.mrb[24].mxu0  ;;  %v3623_v35 = vld [vmem:[#allocation4 + $0x40] sm:$0xff] }
 0x5d0   : > { %v3846_v34 = vadd.f32 %v5463_v6, %v7156_v56  ;;  %v3840_v40 = vpop.f32.mrb[25].mxu0 }
 0x5d1   : > { %v3841_v41 = vadd.f32 %v7156_v56, %v3840_v40  ;;  %5514 = vmatprep.mubr.f32.mxu1 %v3885_v1  ;;  %v3626_v40 = vld [vmem:[#allocation4 + $0x58] sm:$0xff] }
 0x5d2   : > { %5515 = vmatmul.mubr.f32.vlgmr.msra.gmra.mrb[16].mxu1 %v3886_v48  ;;  %v3888_v49 = vmax.f32 %v3846_v34, 0.0 }
 0x5d3   : > { %v3887_v45 = vmax.f32 %v3841_v41, 0.0  ;;  %v5466_v46 = vpop.f32.mrb[26].mxu0 }
 0x5d4   : > { %v3856_v57 = vadd.f32 %v5466_v46, %v7156_v56  ;;  %v3850_v60 = vpop.f32.mrb[27].mxu0  ;;  %v3625_v46 = vld [vmem:[#allocation4 + $0x50] sm:$0xff] }
 0x5d5   : > { %v3851_v39 = vadd.f32 %v7156_v56, %v3850_v60  ;;  %5517 = vmatprep.mubr.f32.mxu1 %v3887_v45 }
 0x5d6   : > { %5518 = vmatmul.mubr.f32.gmra.mrb[18].mxu1 %v3888_v49  ;;  %v3890_v2 = vmax.f32 %v3856_v57, 0.0 }
 0x5d7   : > { %v3889_v54 = vmax.f32 %v3851_v39, 0.0  ;;  %v5469_v11 = vpop.f32.mrb[28].mxu0 }
 0x5d8   : > { %v3866_v14 = vadd.f32 %v5469_v11, %v7156_v56  ;;  %v3860_v22 = vpop.f32.mrb[29].mxu0 }
 0x5d9   : > { %v3861_v44 = vadd.f32 %v7156_v56, %v3860_v22  ;;  %5520 = vmatprep.mubr.f32.mxu1 %v3889_v54  ;;  %v3628_v54 = vld [vmem:[#allocation4 + $0x68] sm:$0xff] }
 0x5da   : > { %5521 = vmatmul.mubr.f32.gmra.mrb[20].mxu1 %v3890_v2  ;;  %v3892_v3 = vmax.f32 %v3866_v14, 0.0  ;;  %v3627_v14 = vld [vmem:[#allocation4 + $0x60] sm:$0xff] }
 0x5db   : > { %v3891_v0 = vmax.f32 %v3861_v44, 0.0  ;;  %v5472_v7 = vpop.f32.mrb[30].mxu0 }
 0x5dc   : > { %v3876_v31 = vadd.f32 %v5472_v7, %v7156_v56  ;;  %v3870_v9 = vpop.f32.mrb[31].mxu0 }
 0x5dd   : > { %v3871_v32 = vadd.f32 %v7156_v56, %v3870_v9  ;;  %5523 = vmatprep.mubr.f32.mxu1 %v3891_v0 }
 0x5de   : > { %5524 = vmatmul.mubr.f32.gmra.mrb[22].mxu1 %v3892_v3  ;;  %v3894_v10 = vmax.f32 %v3876_v31, 0.0  ;;  %v3630_v3 = vld [vmem:[#allocation4 + $0x78] sm:$0xff] }
 0x5df   : > { %v3893_v43 = vmax.f32 %v3871_v32, 0.0  ;;  %v3629_v32 = vld [vmem:[#allocation4 + $0x70] sm:$0xff] }
 0x5e1   : > { %5526 = vmatprep.mubr.f32.mxu1 %v3893_v43 }
 0x5e2   : > { %5527 = vmatmul.mubr.f32.gmra.mrb[24].mxu1 %v3894_v10 }
 0x679   : > { %v5425_v16 = vpop.f32.mrb[0].mxu1 }
 0x67a   : > { %v3542_v18 = vadd.f32 %v5425_v16, %v7208_v23  ;;  %v3536_v19 = vpop.f32.mrb[1].mxu1 }
 0x67b   : > { %v3537_v8 = vadd.f32 %v7208_v23, %v3536_v19 }
 0x67c   : > { %v3632_v56 = vadd.f32 %v3616_v17, %v3542_v18  ;;  %v4048_v18 = vld [vmem:[#allocation4 + $0x88] sm:$0xff] }
 0x67d   : > { %v3631_v25 = vadd.f32 %v3615_v51, %v3537_v8  ;;  %v5428_v26 = vpop.f32.mrb[2].mxu1  ;;  %v4047_v8 = vld [vmem:[#allocation4 + $0x80] sm:$0xff] }
 0x67e   : > { %3648 = vst [vmem:[#allocation4 + $0x8] sm:$0xff] %v3632_v56  ;;  %v3552_v59 = vadd.f32 %v5428_v26, %v7208_v23  ;;  %v3546_v30 = vpop.f32.mrb[3].mxu1 }
 0x67f   : > { %3647 = vst [vmem:[#allocation4] sm:$0xff] %v3631_v25  ;;  %v3547_v33 = vadd.f32 %v7208_v23, %v3546_v30 }
 0x680   : > { %v3634_v58 = vadd.f32 %v3618_v27, %v3552_v59  ;;  %v4050_v59 = vld [vmem:[#allocation4 + $0x98] sm:$0xff] }
 0x681   : > { %v3633_v5 = vadd.f32 %v3617_v15, %v3547_v33  ;;  %v5431_v36 = vpop.f32.mrb[4].mxu1  ;;  %v4049_v33 = vld [vmem:[#allocation4 + $0x90] sm:$0xff] }
 0x682   : > { %3650 = vst [vmem:[#allocation4 + $0x18] sm:$0xff] %v3634_v58  ;;  %v3562_v24 = vadd.f32 %v5431_v36, %v7208_v23  ;;  %v3556_v38 = vpop.f32.mrb[5].mxu1 }
 0x683   : > { %3649 = vst [vmem:[#allocation4 + $0x10] sm:$0xff] %v3633_v5  ;;  %v3557_v4 = vadd.f32 %v7208_v23, %v3556_v38 }
 0x684   : > { %v3636_v13 = vadd.f32 %v3620_v37, %v3562_v24  ;;  %v4052_v24 = vld [vmem:[#allocation4 + $0xa8] sm:$0xff] }
 0x685   : > { %v3635_v47 = vadd.f32 %v3619_v42, %v3557_v4  ;;  %v5434_v50 = vpop.f32.mrb[6].mxu1  ;;  %v4051_v4 = vld [vmem:[#allocation4 + $0xa0] sm:$0xff] }
 0x686   : > { %3652 = vst [vmem:[#allocation4 + $0x28] sm:$0xff] %v3636_v13  ;;  %v3572_v12 = vadd.f32 %v5434_v50, %v7208_v23  ;;  %v3566_v21 = vpop.f32.mrb[7].mxu1 }
 0x687   : > { %3651 = vst [vmem:[#allocation4 + $0x20] sm:$0xff] %v3635_v47  ;;  %v3567_v61 = vadd.f32 %v7208_v23, %v3566_v21 }
 0x688   : > { %v3638_v20 = vadd.f32 %v3622_v52, %v3572_v12  ;;  %v4054_v12 = vld [vmem:[#allocation4 + $0xb8] sm:$0xff] }
 0x689   : > { %v3637_v29 = vadd.f32 %v3621_v53, %v3567_v61  ;;  %v5437_v55 = vpop.f32.mrb[8].mxu1  ;;  %v4053_v61 = vld [vmem:[#allocation4 + $0xb0] sm:$0xff] }
 0x68a   : > { %3654 = vst [vmem:[#allocation4 + $0x38] sm:$0xff] %v3638_v20  ;;  %v3582_v63 = vadd.f32 %v5437_v55, %v7208_v23  ;;  %v3576_v28 = vpop.f32.mrb[9].mxu1 }
 0x68b   : > { %3653 = vst [vmem:[#allocation4 + $0x30] sm:$0xff] %v3637_v29  ;;  %v3577_v1 = vadd.f32 %v7208_v23, %v3576_v28 }
 0x68c   : > { %v3640_v6 = vadd.f32 %v3624_v62, %v3582_v63  ;;  %v4056_v63 = vld [vmem:[#allocation4 + $0xc8] sm:$0xff] }
 0x68d   : > { %v3639_v48 = vadd.f32 %v3623_v35, %v3577_v1  ;;  %v5440_v34 = vpop.f32.mrb[10].mxu1  ;;  %v4055_v1 = vld [vmem:[#allocation4 + $0xc0] sm:$0xff] }
 0x68e   : > { %3656 = vst [vmem:[#allocation4 + $0x48] sm:$0xff] %v3640_v6  ;;  %v3592_v41 = vadd.f32 %v5440_v34, %v7208_v23  ;;  %v3586_v45 = vpop.f32.mrb[11].mxu1 }
 0x68f   : > { %3655 = vst [vmem:[#allocation4 + $0x40] sm:$0xff] %v3639_v48  ;;  %v3587_v49 = vadd.f32 %v7208_v23, %v3586_v45 }
 0x690   : > { %v3642_v57 = vadd.f32 %v3626_v40, %v3592_v41  ;;  %v4058_v41 = vld [vmem:[#allocation4 + $0xd8] sm:$0xff] }
 0x691   : > { %v3641_v60 = vadd.f32 %v3625_v46, %v3587_v49  ;;  %v5443_v39 = vpop.f32.mrb[12].mxu1  ;;  %v4057_v49 = vld [vmem:[#allocation4 + $0xd0] sm:$0xff] }
 0x692   : > { %3658 = vst [vmem:[#allocation4 + $0x58] sm:$0xff] %v3642_v57  ;;  %v3602_v11 = vadd.f32 %v5443_v39, %v7208_v23  ;;  %v3596_v2 = vpop.f32.mrb[13].mxu1 }
 0x693   : > { %3657 = vst [vmem:[#allocation4 + $0x50] sm:$0xff] %v3641_v60  ;;  %v3597_v22 = vadd.f32 %v7208_v23, %v3596_v2 }
 0x694   : > { %v3644_v44 = vadd.f32 %v3628_v54, %v3602_v11  ;;  %v4060_v11 = vld [vmem:[#allocation4 + $0xe8] sm:$0xff] }
 0x695   : > { %v3643_v0 = vadd.f32 %v3627_v14, %v3597_v22  ;;  %v5446_v7 = vpop.f32.mrb[14].mxu1  ;;  %v4059_v22 = vld [vmem:[#allocation4 + $0xe0] sm:$0xff] }
 0x696   : > { %3660 = vst [vmem:[#allocation4 + $0x68] sm:$0xff] %v3644_v44  ;;  %v3612_v31 = vadd.f32 %v5446_v7, %v7208_v23  ;;  %v3606_v9 = vpop.f32.mrb[15].mxu1 }
 0x697   : > { %3659 = vst [vmem:[#allocation4 + $0x60] sm:$0xff] %v3643_v0  ;;  %v3607_v43 = vadd.f32 %v7208_v23, %v3606_v9 }
 0x698   : > { %v3646_v10 = vadd.f32 %v3630_v3, %v3612_v31  ;;  %v4062_v31 = vld [vmem:[#allocation4 + $0xf8] sm:$0xff] }
 0x699   : > { %v3645_v16 = vadd.f32 %v3629_v32, %v3607_v43  ;;  %v5507_v17 = vpop.f32.mrb[32].mxu0  ;;  %v4061_v43 = vld [vmem:[#allocation4 + $0xf0] sm:$0xff] }
 0x69a   : > { %3662 = vst [vmem:[#allocation4 + $0x78] sm:$0xff] %v3646_v10  ;;  %v3974_v19 = vadd.f32 %v5507_v17, %v7208_v23  ;;  %v3968_v51 = vpop.f32.mrb[33].mxu0 }
 0x69b   : > { %3661 = vst [vmem:[#allocation4 + $0x70] sm:$0xff] %v3645_v16  ;;  %v3969_v56 = vadd.f32 %v7208_v23, %v3968_v51 }
 0x69c   : > { %v4064_v25 = vadd.f32 %v4048_v18, %v3974_v19 }
 0x69d   : > { %v4063_v26 = vadd.f32 %v4047_v8, %v3969_v56  ;;  %v5510_v27 = vpop.f32.mrb[34].mxu0 }
 0x69e   : > { %4080 = vst [vmem:[#allocation4 + $0x88] sm:$0xff] %v4064_v25  ;;  %v3984_v30 = vadd.f32 %v5510_v27, %v7208_v23  ;;  %v3978_v15 = vpop.f32.mrb[35].mxu0 }
 0x69f   : > { %4079 = vst [vmem:[#allocation4 + $0x80] sm:$0xff] %v4063_v26  ;;  %v3979_v58 = vadd.f32 %v7208_v23, %v3978_v15 }
 0x6a0   : > { %v4066_v5 = vadd.f32 %v4050_v59, %v3984_v30 }
 0x6a1   : > { %v4065_v36 = vadd.f32 %v4049_v33, %v3979_v58  ;;  %v5513_v37 = vpop.f32.mrb[36].mxu0 }
 0x6a2   : > { %4082 = vst [vmem:[#allocation4 + $0x98] sm:$0xff] %v4066_v5  ;;  %v3994_v38 = vadd.f32 %v5513_v37, %v7208_v23  ;;  %v3988_v42 = vpop.f32.mrb[37].mxu0 }
 0x6a3   : > { %4081 = vst [vmem:[#allocation4 + $0x90] sm:$0xff] %v4065_v36  ;;  %v3989_v13 = vadd.f32 %v7208_v23, %v3988_v42 }
 0x6a4   : > { %v4068_v47 = vadd.f32 %v4052_v24, %v3994_v38 }
 0x6a5   : > { %v4067_v50 = vadd.f32 %v4051_v4, %v3989_v13  ;;  %v5516_v52 = vpop.f32.mrb[16].mxu1 }
 0x6a6   : > { %4084 = vst [vmem:[#allocation4 + $0xa8] sm:$0xff] %v4068_v47  ;;  %v4004_v21 = vadd.f32 %v5516_v52, %v7208_v23  ;;  %v3998_v53 = vpop.f32.mrb[17].mxu1 }
 0x6a7   : > { %4083 = vst [vmem:[#allocation4 + $0xa0] sm:$0xff] %v4067_v50  ;;  %v3999_v20 = vadd.f32 %v7208_v23, %v3998_v53 }
 0x6a8   : > { %v4070_v29 = vadd.f32 %v4054_v12, %v4004_v21 }
 0x6a9   : > { %v4069_v55 = vadd.f32 %v4053_v61, %v3999_v20  ;;  %v5519_v62 = vpop.f32.mrb[18].mxu1 }
 0x6aa   : > { %4086 = vst [vmem:[#allocation4 + $0xb8] sm:$0xff] %v4070_v29  ;;  %v4014_v28 = vadd.f32 %v5519_v62, %v7208_v23  ;;  %v4008_v35 = vpop.f32.mrb[19].mxu1 }
 0x6ab   : > { %4085 = vst [vmem:[#allocation4 + $0xb0] sm:$0xff] %v4069_v55  ;;  %v4009_v6 = vadd.f32 %v7208_v23, %v4008_v35 }
 0x6ac   : > { %v4072_v48 = vadd.f32 %v4056_v63, %v4014_v28 }
 0x6ad   : > { %v4071_v34 = vadd.f32 %v4055_v1, %v4009_v6  ;;  %v5522_v40 = vpop.f32.mrb[20].mxu1 }
 0x6ae   : > { %4088 = vst [vmem:[#allocation4 + $0xc8] sm:$0xff] %v4072_v48  ;;  %v4024_v45 = vadd.f32 %v5522_v40, %v7208_v23  ;;  %v4018_v46 = vpop.f32.mrb[21].mxu1 }
 0x6af   : > { %4087 = vst [vmem:[#allocation4 + $0xc0] sm:$0xff] %v4071_v34  ;;  %v4019_v57 = vadd.f32 %v7208_v23, %v4018_v46 }
 0x6b0   : > { %v4074_v60 = vadd.f32 %v4058_v41, %v4024_v45 }
 0x6b1   : > { %v4073_v39 = vadd.f32 %v4057_v49, %v4019_v57  ;;  %v5525_v54 = vpop.f32.mrb[22].mxu1 }
 0x6b2   : > { %4090 = vst [vmem:[#allocation4 + $0xd8] sm:$0xff] %v4074_v60  ;;  %v4034_v2 = vadd.f32 %v5525_v54, %v7208_v23  ;;  %v4028_v14 = vpop.f32.mrb[23].mxu1 }
 0x6b3   : > { %4089 = vst [vmem:[#allocation4 + $0xd0] sm:$0xff] %v4073_v39  ;;  %v4029_v44 = vadd.f32 %v7208_v23, %v4028_v14 }
 0x6b4   : > { %v4076_v0 = vadd.f32 %v4060_v11, %v4034_v2 }
 0x6b5   : > { %v4075_v7 = vadd.f32 %v4059_v22, %v4029_v44  ;;  %v5528_v3 = vpop.f32.mrb[24].mxu1 }
 0x6b6   : > { %4092 = vst [vmem:[#allocation4 + $0xe8] sm:$0xff] %v4076_v0  ;;  %v4044_v9 = vadd.f32 %v5528_v3, %v7208_v23  ;;  %v4038_v32 = vpop.f32.mrb[25].mxu1 }
 0x6b7   : > { %4091 = vst [vmem:[#allocation4 + $0xe0] sm:$0xff] %v4075_v7  ;;  %v4039_v10 = vadd.f32 %v7208_v23, %v4038_v32 }
 0x6b8   : > { %v4078_v16 = vadd.f32 %v4062_v31, %v4044_v9 }
 0x6b9   : > { %v4077_v17 = vadd.f32 %v4061_v43, %v4039_v10 }
 0x6ba   : > { %4094 = vst [vmem:[#allocation4 + $0xf8] sm:$0xff] %v4078_v16 }
 0x6bb   : > { %4093 = vst [vmem:[#allocation4 + $0xf0] sm:$0xff] %v4077_v17 }
 0x6bc PF: > { %p5917_p6 = scmp.eq.s32.totalorder %s6062_s30, 2  ;;  %s5978_s19 = smov [#allocation4]  }
 0x6bd   : > { %s4101_s28 = sshll.u32 %s5978_s19, 4  ;;  %s4102_s28 = int_to_ptr.vmem [resolvable:$true] %s4101_s28 }
 0x6be   : > { %s5936_s22 = scalar_lea.vmem %s4102_s28, 4096  ;;  %p5943_p10 = scmp.lt.s32.totalorder %s4102_s28, %s4102_s28 }
 0x6bf   : > { %p5937_p7 = scmp.ne.s32.totalorder %s4102_s28, %s5936_s22  ;;  %p5944_p11 = scmp.lt.s32.totalorder %s5936_s22, %s5936_s22 }
 0x6c1   : > { %p5938_p8 = pnand %p5937_p7, %p5917_p6  ;;  %p5945_p12 = por %p5944_p11, %p5943_p10 }
 0x6c3   : > { %p5939_p9 = pneg %p5938_p8 }
 0x6c5   : > { %p5946_p13 = pnand %p5945_p12, %p5939_p9 }
 0x6c7   : > { %5949 = shalt.err (!%p5946_p13)
}
 0x6c8   : > { %s5950_s25 = scalar_lea.hbm %s7282_s14, 4096 }
 0x6c9   : > { %p5951_p0 = scmp.ne.s32.totalorder %s7282_s14, %s5950_s25  ;;  %p5956_p3 = scmp.lt.u32.totalorder %s5950_s25, %s7282_s14 }
 0x6cb   : > { %p5952_p1 = pnand %p5951_p0, %p5917_p6 }
 0x6cd   : > { %p5953_p2 = pneg %p5952_p1 }
 0x6cf   : > { %p5958_p4 = pnand %p5956_p3, %p5953_p2 }
 0x6d1   : > { %5961 = shalt.err (!%p5958_p4)
}
 0x6d2   : > { %s5979_s23 = smov 128   ;;  %s5980_s24 = smov 8  }
 0x6d3   : > { %5914 = dma.vmem_to_hbm [thread:$0]  (%p5917_p6), %s4102_s28, 4096, %s7282_s14, [#allocation5], %s5979_s23, %s5979_s23, %s5980_s24  }
 0x6d4   : > { %5967 = dma.done.wait (%p5917_p6), [#allocation5], 4096  }
 0x6d5   : > { %5969 = vsyncadd (%p5917_p6), [#allocation5], 4294963200 }
 0x6d6 PF: > { %s25_s29 = sadd.s32 1, %s5972_s29  }
 0x6d7   : > { %p22_p5 = scmp.ge.s32.totalorder %s25_s29, 5  }
 0x6d9   :  { %24 = sbr.rel (!%p22_p5) target bundleno = 1 (0x1), region = 117 }
 0x6e0   :  { %4117 = vsyncpa [#allocation5], 1 }
 0x6e1   :  { %4119 = vsyncpa [#allocation5 + $0x1], 1 }

</bundles_post_ra>
